<compile_context>
chip_gen: v7x
topology: tpu7x:2x2x1
jax: 0.10.0
libtpu: 0.0.40
codegen_flags: <defaults>
</compile_context>

<pallas_src>
import functools
import math

import jax
import jax.numpy as jnp
from jax.experimental import pallas as pl
from jax.experimental.pallas import tpu as pltpu


# ----------------------------------------------------------------------------
# Fused Pallas kernel
# ----------------------------------------------------------------------------

def _qformer_kernel(q_ref, vis_ref, txt_ref, w_ref, vec_ref, *o,
                    B, n_q, Lv, Lt, nhead, d_ff, eps, want_attn):
    f32 = jnp.float32
    D = q_ref.shape[1]
    Dv = vis_ref.shape[1]
    dh = D // nhead
    R = B * (n_q + Lv)
    per_layer_rows = 5 * D + d_ff          # wq,wk,wv,wo,w1 (D rows each) + w2 (d_ff rows)

    if want_attn:
        tgt_out_ref, attn_out_ref, tgt_scr = o
    else:
        tgt_out_ref, tgt_scr = o
        attn_out_ref = None

    # ---- packed-parameter accessors (all static, sublane-aligned slices) ----
    def wblk(r0, nr, nc):
        return w_ref[r0:r0 + nr, 0:nc]

    def vrow(i, nc):
        return vec_ref[i:i + 1, 0:nc]

    def layer_params(layer):
        wb = layer * per_layer_rows
        vb = 1 + layer * 10
        return dict(
            wq=wblk(wb, D, D), wk=wblk(wb + D, D, D),
            wv=wblk(wb + 2 * D, D, D), wo=wblk(wb + 3 * D, D, D),
            w1=wblk(wb + 4 * D, D, d_ff), w2=wblk(wb + 5 * D, d_ff, D),
            bq=vrow(vb + 0, D), bk=vrow(vb + 1, D), bv=vrow(vb + 2, D),
            bo=vrow(vb + 3, D), ln1g=vrow(vb + 4, D), ln1b=vrow(vb + 5, D),
            fb1=vrow(vb + 6, d_ff), fb2=vrow(vb + 7, D),
            ln2g=vrow(vb + 8, D), ln2b=vrow(vb + 9, D))

    # ---- constants shared by both layers (built once, hoisted) ----
    # head h <-> lane group [h*dh, (h+1)*dh)
    lane = jax.lax.broadcasted_iota(jnp.int32, (nhead, D), 1)
    hidx = jax.lax.broadcasted_iota(jnp.int32, (nhead, D), 0)
    hmask2d = ((lane >= hidx * dh) & (lane < (hidx + 1) * dh)).astype(f32)   # (nhead, D)
    hmask3 = hmask2d[:, None, :]                                             # (nhead, 1, D)

    # per-row batch id for the grouped row layout: [B*n_q query rows | B*Lv vis rows]
    ridx = jax.lax.broadcasted_iota(jnp.int32, (R, 1), 0)
    qb = jnp.zeros((R, 1), jnp.int32)
    vb = jnp.zeros((R, 1), jnp.int32)
    for b in range(1, B):
        qb = qb + (ridx >= b * n_q).astype(jnp.int32)
        vb = vb + (ridx >= B * n_q + b * Lv).astype(jnp.int32)
    row_batch = jnp.where(ridx < B * n_q, qb, vb)                            # (R, 1)

    inv_sqrt_dh = 1.0 / math.sqrt(dh)

    def add_ln(x, res, g, beta):
        y = x + res
        mu = jnp.mean(y, axis=-1, keepdims=True)
        yc = y - mu
        var = jnp.mean(yc * yc, axis=-1, keepdims=True)
        return yc * jax.lax.rsqrt(var + eps) * g + beta

    def stack_heads(x2, Sk):
        # (B*Sk, D) -> (B*nhead*Sk, D); row (b*nhead+h)*Sk+t = x2[b*Sk+t] * head-mask h
        parts = []
        for b in range(B):
            xb = x2[b * Sk:(b + 1) * Sk, :]
            parts.append((xb[None, :, :] * hmask3).reshape(nhead * Sk, D))
        return jnp.concatenate(parts, axis=0)

    def mha(x, mem, Sk, p, want):
        # x: (R, D) queries; mem: (B*Sk, D) keys/values; all batches + heads folded.
        C = B * nhead * Sk
        NB = B * nhead
        q2 = jnp.dot(x, p['wq'], preferred_element_type=f32) + p['bq']
        k2 = jnp.dot(mem, p['wk'], preferred_element_type=f32) + p['bk']
        v2 = jnp.dot(mem, p['wv'], preferred_element_type=f32) + p['bv']
        ks = stack_heads(k2, Sk)                                             # (C, D)
        vs = stack_heads(v2, Sk)                                             # (C, D)

        # one lane-dense score matmul for all batches and heads
        sc = jax.lax.dot_general(q2, ks, (((1,), (1,)), ((), ())),
                                 preferred_element_type=f32) * inv_sqrt_dh   # (R, C)

        # mask keys belonging to other batches
        cidx = jax.lax.broadcasted_iota(jnp.int32, (1, C), 1)
        col_batch = jnp.zeros((1, C), jnp.int32)
        for b in range(1, B):
            col_batch = col_batch + (cidx >= b * nhead * Sk).astype(jnp.int32)
        sc = jnp.where(row_batch == col_batch, sc, -1e30)

        # single row-wise softmax; per-(row, head-block) denominators come from
        # one MXU contraction with a 0/1 block matrix (no lane-axis reshapes).
        e = jnp.exp(sc - jnp.max(sc, axis=-1, keepdims=True))                # (R, C)
        jrow = jax.lax.broadcasted_iota(jnp.int32, (NB, 1), 0)
        bst = ((cidx >= jrow * Sk) & (cidx < jrow * Sk + Sk)).astype(f32)    # (NB, C)
        denom = jax.lax.dot_general(e, bst, (((1,), (1,)), ((), ())),
                                    preferred_element_type=f32)              # (R, NB)
        dinv = pl.reciprocal(denom + 1e-30, approx=True)
        dfull = jnp.dot(dinv, bst, preferred_element_type=f32)               # (R, C)
        prob = e * dfull                                                     # per-block softmax

        ctx = jnp.dot(prob, vs, preferred_element_type=f32)                  # (R, D)
        out = jnp.dot(ctx, p['wo'], preferred_element_type=f32) + p['bo']

        attn = None
        if want:
            # fold the NB head/batch blocks down to Sk lanes, average over heads
            eye = (jax.lax.broadcasted_iota(jnp.int32, (Sk, Sk), 0) ==
                   jax.lax.broadcasted_iota(jnp.int32, (Sk, Sk), 1)).astype(f32)
            fold = jnp.broadcast_to(eye[None, :, :], (NB, Sk, Sk)).reshape(C, Sk)
            attn = jnp.dot(prob, fold, preferred_element_type=f32) * (1.0 / nhead)
        return out, attn

    def layer_fwd(x, mem, Sk, p, want):
        a, attn = mha(x, mem, Sk, p, want)
        y1 = add_ln(a, x, p['ln1g'], p['ln1b'])
        h = jnp.maximum(jnp.dot(y1, p['w1'], preferred_element_type=f32) + p['fb1'], 0.0)
        f = jnp.dot(h, p['w2'], preferred_element_type=f32) + p['fb2']
        return add_ln(f, y1, p['ln2g'], p['ln2b']), attn

    # fc(vis) and [queries ; vis] assembled directly in a VMEM scratch slab
    fcw = wblk(2 * per_layer_rows, Dv, D)
    fcb = vrow(0, D)
    vis_p = jnp.dot(vis_ref[...], fcw, preferred_element_type=f32) + fcb
    tgt_scr[0:B * n_q, :] = q_ref[...]
    tgt_scr[B * n_q:R, :] = vis_p
    x0 = tgt_scr[...]

    # layer 1: cross-attention against txt (attention weights never needed)
    x1, _ = layer_fwd(x0, txt_ref[...], Lt, layer_params(0), False)
    # layer 2: attention against the vis rows of x1 (contiguous in grouped layout);
    # query_pos is all-zeros in the reference -> identity, dropped.
    mem2 = x1[B * n_q:, :]
    x2, attn = layer_fwd(x1, mem2, Lv, layer_params(1), want_attn)

    tgt_out_ref[...] = x2
    if want_attn:
        attn_out_ref[...] = attn


# ----------------------------------------------------------------------------
# Parameter packing (2 slabs -> 5 kernel input refs total)
# ----------------------------------------------------------------------------

def pack_qformer_params(params):
    fc_w = params["fc_w"]
    Dv, D = fc_w.shape
    d_ff = params["cross"]["w1"].shape[1]
    W = max(D, d_ff)

    def padw(m):
        return jnp.pad(m, ((0, 0), (0, W - m.shape[1])))

    def padv(v):
        return jnp.pad(v, (0, W - v.shape[0]))[None, :]

    wblocks = []
    vrows = [padv(params["fc_b"])]
    for name in ("cross", "self"):
        p = params[name]
        wblocks += [padw(p["wq"]), padw(p["wk"]), padw(p["wv"]), padw(p["wo"]),
                    padw(p["w1"]), padw(p["w2"])]
        vrows += [padv(p["bq"]), padv(p["bk"]), padv(p["bv"]), padv(p["bo"]),
                  padv(p["ln1_g"]), padv(p["ln1_b"]), padv(p["b1"]), padv(p["b2"]),
                  padv(p["ln2_g"]), padv(p["ln2_b"])]
    wblocks.append(padw(fc_w))
    return jnp.concatenate(wblocks, axis=0), jnp.concatenate(vrows, axis=0)


# ----------------------------------------------------------------------------
# Wrapper (layout plumbing only)
# ----------------------------------------------------------------------------

def qformer4_forward(wslab, vecslab, queries, vis, txt, *, nhead, d_ff,
                     return_attn=False):
    n_q, B, D = queries.shape
    Lv, _, Dv = vis.shape
    Lt = txt.shape[0]
    assert D % nhead == 0
    R = B * (n_q + Lv)

    # grouped batch-major rows: all query rows, then all vis rows
    q_bm = queries.transpose(1, 0, 2).reshape(B * n_q, D)
    vis_bm = vis.transpose(1, 0, 2).reshape(B * Lv, Dv)
    txt_bm = txt.transpose(1, 0, 2).reshape(B * Lt, D)

    kernel = functools.partial(_qformer_kernel, B=B, n_q=n_q, Lv=Lv, Lt=Lt,
                               nhead=nhead, d_ff=d_ff, eps=1e-5,
                               want_attn=return_attn)
    vmem = pl.BlockSpec(memory_space=pltpu.MemorySpace.VMEM)
    out_shape = [jax.ShapeDtypeStruct((R, D), jnp.float32)]
    if return_attn:
        out_shape.append(jax.ShapeDtypeStruct((R, Lv), jnp.float32))

    # single invocation, everything (<1 MiB) VMEM-resident
    # TODO(synk): on v7x the two independent batches could be sharded over the
    # 2 TensorCores with grid=(B,); kept single-call (optimal for v5e/v6e).
    outs = pl.pallas_call(
        kernel,
        in_specs=[vmem] * 5,
        out_specs=[vmem] * len(out_shape),
        out_shape=out_shape,
        scratch_shapes=[pltpu.VMEM((R, D), jnp.float32)],
    )(q_bm, vis_bm, txt_bm, wslab, vecslab)

    tgt_out = outs[0]
    q_out = tgt_out[:B * n_q].reshape(B, n_q, D).transpose(1, 0, 2)   # (n_q, B, D)
    v_out = tgt_out[B * n_q:].reshape(B, Lv, D).transpose(1, 0, 2)    # (Lv, B, D)
    if not return_attn:
        return q_out, v_out
    attn = outs[1]
    attn_full = jnp.concatenate(
        [attn[:B * n_q].reshape(B, n_q, Lv), attn[B * n_q:].reshape(B, Lv, Lv)],
        axis=1)                                                        # (B, n_q+Lv, Lv)
    return q_out, v_out, attn_full


# ----------------------------------------------------------------------------
# Deterministic parameter init
# ----------------------------------------------------------------------------

def init_params(key, d_model, d_vis, d_ff):
    def w(k, shape, scale=0.05):
        return scale * jax.random.normal(k, shape, jnp.float32)

    def layer_params(kk):
        k = jax.random.split(kk, 6)
        return dict(
            wq=w(k[0], (d_model, d_model)), bq=jnp.zeros((d_model,), jnp.float32),
            wk=w(k[1], (d_model, d_model)), bk=jnp.zeros((d_model,), jnp.float32),
            wv=w(k[2], (d_model, d_model)), bv=jnp.zeros((d_model,), jnp.float32),
            wo=w(k[3], (d_model, d_model)), bo=jnp.zeros((d_model,), jnp.float32),
            ln1_g=jnp.ones((d_model,), jnp.float32), ln1_b=jnp.zeros((d_model,), jnp.float32),
            w1=w(k[4], (d_model, d_ff)), b1=jnp.zeros((d_ff,), jnp.float32),
            w2=w(k[5], (d_ff, d_model)), b2=jnp.zeros((d_model,), jnp.float32),
            ln2_g=jnp.ones((d_model,), jnp.float32), ln2_b=jnp.zeros((d_model,), jnp.float32),
        )

    k0, k1, k2 = jax.random.split(key, 3)
    return dict(
        fc_w=w(k0, (d_vis, d_model)), fc_b=jnp.zeros((d_model,), jnp.float32),
        cross=layer_params(k1),
        self=layer_params(k2),
    )


# ----------------------------------------------------------------------------
# Main
# ----------------------------------------------------------------------------

if __name__ == "__main__":
    D_MODEL, D_VIS = 32, 48          # hidden_size = [32, 48]
    NHEAD = 8                        # head_dim = 4
    D_FF = 64
    N_Q, L_VIS, L_TXT, B = 8, 16, 8, 2

    key = jax.random.PRNGKey(0)
    kp, kq, kv, kt = jax.random.split(key, 4)
    params = init_params(kp, D_MODEL, D_VIS, D_FF)
    wslab, vecslab = pack_qformer_params(params)     # packed once, outside jit

    queries = jax.random.normal(kq, (N_Q, B, D_MODEL), jnp.float32)
    vis = jax.random.normal(kv, (L_VIS, B, D_VIS), jnp.float32)
    txt = jax.random.normal(kt, (L_TXT, B, D_MODEL), jnp.float32)

    fwd = jax.jit(functools.partial(qformer4_forward, nhead=NHEAD, d_ff=D_FF,
                                    return_attn=True))
    q_out, v_out, attn = fwd(wslab, vecslab, queries, vis, txt)
    jax.block_until_ready((q_out, v_out, attn))

    assert q_out.shape == (N_Q, B, D_MODEL)
    assert v_out.shape == (L_VIS, B, D_MODEL)
    assert attn.shape == (B, N_Q + L_VIS, L_VIS)
    assert bool(jnp.all(jnp.isfinite(q_out)))
    assert bool(jnp.all(jnp.isfinite(v_out)))
    # head-averaged attention rows must sum to ~1 (approx. reciprocal tolerance)
    assert bool(jnp.allclose(jnp.sum(attn, axis=-1), 1.0, atol=2e-2))
    print("KERNEL_OK")
</pallas_src>

<mosaic_0001>
module attributes {stable_mosaic.version = 11 : i64} {
  func.func @_qformer_kernel(%arg0: memref<16x32xf32, #tpu.memory_space<vmem>>, %arg1: memref<32x48xf32, #tpu.memory_space<vmem>>, %arg2: memref<16x32xf32, #tpu.memory_space<vmem>>, %arg3: memref<496x64xf32, #tpu.memory_space<vmem>>, %arg4: memref<21x64xf32, #tpu.memory_space<vmem>>, %arg5: memref<48x32xf32, #tpu.memory_space<vmem>>, %arg6: memref<48x16xf32, #tpu.memory_space<vmem>>, %arg7: memref<48x32xf32, #tpu.memory_space<vmem>>) attributes {dimension_semantics = [], scalar_prefetch = 0 : i64, scratch_operands = 1 : i64, tpu.core_type = #tpu.core_type<tc>} {
    %0 = tpu.iota {dimensions = array<i32: 1>} : vector<8x32xi32>
    %1 = tpu.iota {dimensions = array<i32: 0>} : vector<8x32xi32>
    %c4_i32 = arith.constant 4 : i32
    %2 = vector.broadcast %c4_i32 : i32 to vector<8x32xi32>
    %3 = arith.muli %1, %2 : vector<8x32xi32>
    %4 = arith.cmpi sge, %0, %3 : vector<8x32xi32>
    %c1_i32 = arith.constant 1 : i32
    %5 = vector.broadcast %c1_i32 : i32 to vector<8x32xi32>
    %6 = arith.addi %1, %5 : vector<8x32xi32>
    %c4_i32_0 = arith.constant 4 : i32
    %7 = vector.broadcast %c4_i32_0 : i32 to vector<8x32xi32>
    %8 = arith.muli %6, %7 : vector<8x32xi32>
    %9 = arith.cmpi slt, %0, %8 : vector<8x32xi32>
    %10 = arith.andi %4, %9 : vector<8x32xi1>
    %11 = arith.extui %10 : vector<8x32xi1> to vector<8x32xi32>
    %12 = arith.sitofp %11 : vector<8x32xi32> to vector<8x32xf32>
    %13 = vector.shape_cast %12 : vector<8x32xf32> to vector<8x1x32xf32>
    %14 = tpu.iota {dimensions = array<i32: 0>} : vector<48x1xi32>
    %c0_i32 = arith.constant 0 : i32
    %15 = vector.broadcast %c0_i32 : i32 to vector<48x1xi32>
    %c0_i32_1 = arith.constant 0 : i32
    %16 = vector.broadcast %c0_i32_1 : i32 to vector<48x1xi32>
    %c8_i32 = arith.constant 8 : i32
    %17 = vector.broadcast %c8_i32 : i32 to vector<48x1xi32>
    %18 = arith.cmpi sge, %14, %17 : vector<48x1xi32>
    %19 = arith.extui %18 : vector<48x1xi1> to vector<48x1xi32>
    %20 = arith.addi %15, %19 : vector<48x1xi32>
    %c32_i32 = arith.constant 32 : i32
    %21 = vector.broadcast %c32_i32 : i32 to vector<48x1xi32>
    %22 = arith.cmpi sge, %14, %21 : vector<48x1xi32>
    %23 = arith.extui %22 : vector<48x1xi1> to vector<48x1xi32>
    %24 = arith.addi %16, %23 : vector<48x1xi32>
    %c16_i32 = arith.constant 16 : i32
    %25 = vector.broadcast %c16_i32 : i32 to vector<48x1xi32>
    %26 = arith.cmpi slt, %14, %25 : vector<48x1xi32>
    %27 = arith.select %26, %20, %24 : vector<48x1xi1>, vector<48x1xi32>
    %c448 = arith.constant 448 : index
    %c0 = arith.constant 0 : index
    %28 = vector.load %arg3[%c448, %c0] : memref<496x64xf32, #tpu.memory_space<vmem>>, vector<48x32xf32>
    %c0_2 = arith.constant 0 : index
    %c0_3 = arith.constant 0 : index
    %29 = vector.load %arg4[%c0_2, %c0_3] : memref<21x64xf32, #tpu.memory_space<vmem>>, vector<1x32xf32>
    %c0_4 = arith.constant 0 : index
    %c0_5 = arith.constant 0 : index
    %30 = vector.load %arg1[%c0_4, %c0_5] : memref<32x48xf32, #tpu.memory_space<vmem>>, vector<32x48xf32>
    %cst = arith.constant dense<0.000000e+00> : vector<32x32xf32>
    %31 = tpu.matmul %30, %28, %cst {dimension_numbers = #tpu.dot_dimension_numbers<[1], [0], [0], [1], [0, 0, 1, 1], [], []>} : vector<32x48xf32>, vector<48x32xf32>, vector<32x32xf32> -> vector<32x32xf32>
    %32 = vector.broadcast %29 : vector<1x32xf32> to vector<32x32xf32>
    %33 = arith.addf %31, %32 : vector<32x32xf32>
    %c0_6 = arith.constant 0 : index
    %c0_7 = arith.constant 0 : index
    %34 = vector.load %arg0[%c0_6, %c0_7] : memref<16x32xf32, #tpu.memory_space<vmem>>, vector<16x32xf32>
    %c0_8 = arith.constant 0 : index
    %c0_9 = arith.constant 0 : index
    %35 = vector.load %arg7[%c0_8, %c0_9] : memref<48x32xf32, #tpu.memory_space<vmem>>, vector<16x32xf32>
    tpu.vector_store %arg7[%c0_8, %c0_9], %34 {strides = array<i32>} : memref<48x32xf32, #tpu.memory_space<vmem>>, vector<16x32xf32>,
    %c16 = arith.constant 16 : index
    %c0_10 = arith.constant 0 : index
    %36 = vector.load %arg7[%c16, %c0_10] : memref<48x32xf32, #tpu.memory_space<vmem>>, vector<32x32xf32>
    tpu.vector_store %arg7[%c16, %c0_10], %33 {strides = array<i32>} : memref<48x32xf32, #tpu.memory_space<vmem>>, vector<32x32xf32>,
    %c0_11 = arith.constant 0 : index
    %c0_12 = arith.constant 0 : index
    %37 = vector.load %arg7[%c0_11, %c0_12] : memref<48x32xf32, #tpu.memory_space<vmem>>, vector<48x32xf32>
    %c0_13 = arith.constant 0 : index
    %c0_14 = arith.constant 0 : index
    %38 = vector.load %arg2[%c0_13, %c0_14] : memref<16x32xf32, #tpu.memory_space<vmem>>, vector<16x32xf32>
    %c0_15 = arith.constant 0 : index
    %c0_16 = arith.constant 0 : index
    %39 = vector.load %arg3[%c0_15, %c0_16] : memref<496x64xf32, #tpu.memory_space<vmem>>, vector<32x32xf32>
    %c32 = arith.constant 32 : index
    %c0_17 = arith.constant 0 : index
    %40 = vector.load %arg3[%c32, %c0_17] : memref<496x64xf32, #tpu.memory_space<vmem>>, vector<32x32xf32>
    %c64 = arith.constant 64 : index
    %c0_18 = arith.constant 0 : index
    %41 = vector.load %arg3[%c64, %c0_18] : memref<496x64xf32, #tpu.memory_space<vmem>>, vector<32x32xf32>
    %c96 = arith.constant 96 : index
    %c0_19 = arith.constant 0 : index
    %42 = vector.load %arg3[%c96, %c0_19] : memref<496x64xf32, #tpu.memory_space<vmem>>, vector<32x32xf32>
    %c128 = arith.constant 128 : index
    %c0_20 = arith.constant 0 : index
    %43 = vector.load %arg3[%c128, %c0_20] : memref<496x64xf32, #tpu.memory_space<vmem>>, vector<32x64xf32>
    %c160 = arith.constant 160 : index
    %c0_21 = arith.constant 0 : index
    %44 = vector.load %arg3[%c160, %c0_21] : memref<496x64xf32, #tpu.memory_space<vmem>>, vector<64x32xf32>
    %c1 = arith.constant 1 : index
    %c0_22 = arith.constant 0 : index
    %45 = vector.load %arg4[%c1, %c0_22] : memref<21x64xf32, #tpu.memory_space<vmem>>, vector<1x32xf32>
    %c2 = arith.constant 2 : index
    %c0_23 = arith.constant 0 : index
    %46 = vector.load %arg4[%c2, %c0_23] : memref<21x64xf32, #tpu.memory_space<vmem>>, vector<1x32xf32>
    %c3 = arith.constant 3 : index
    %c0_24 = arith.constant 0 : index
    %47 = vector.load %arg4[%c3, %c0_24] : memref<21x64xf32, #tpu.memory_space<vmem>>, vector<1x32xf32>
    %c4 = arith.constant 4 : index
    %c0_25 = arith.constant 0 : index
    %48 = vector.load %arg4[%c4, %c0_25] : memref<21x64xf32, #tpu.memory_space<vmem>>, vector<1x32xf32>
    %c5 = arith.constant 5 : index
    %c0_26 = arith.constant 0 : index
    %49 = vector.load %arg4[%c5, %c0_26] : memref<21x64xf32, #tpu.memory_space<vmem>>, vector<1x32xf32>
    %c6 = arith.constant 6 : index
    %c0_27 = arith.constant 0 : index
    %50 = vector.load %arg4[%c6, %c0_27] : memref<21x64xf32, #tpu.memory_space<vmem>>, vector<1x32xf32>
    %c7 = arith.constant 7 : index
    %c0_28 = arith.constant 0 : index
    %51 = vector.load %arg4[%c7, %c0_28] : memref<21x64xf32, #tpu.memory_space<vmem>>, vector<1x64xf32>
    %c8 = arith.constant 8 : index
    %c0_29 = arith.constant 0 : index
    %52 = vector.load %arg4[%c8, %c0_29] : memref<21x64xf32, #tpu.memory_space<vmem>>, vector<1x32xf32>
    %c9 = arith.constant 9 : index
    %c0_30 = arith.constant 0 : index
    %53 = vector.load %arg4[%c9, %c0_30] : memref<21x64xf32, #tpu.memory_space<vmem>>, vector<1x32xf32>
    %c10 = arith.constant 10 : index
    %c0_31 = arith.constant 0 : index
    %54 = vector.load %arg4[%c10, %c0_31] : memref<21x64xf32, #tpu.memory_space<vmem>>, vector<1x32xf32>
    %cst_32 = arith.constant dense<0.000000e+00> : vector<48x32xf32>
    %55 = tpu.matmul %37, %39, %cst_32 {dimension_numbers = #tpu.dot_dimension_numbers<[1], [0], [0], [1], [0, 0, 1, 1], [], []>} : vector<48x32xf32>, vector<32x32xf32>, vector<48x32xf32> -> vector<48x32xf32>
    %56 = vector.broadcast %45 : vector<1x32xf32> to vector<48x32xf32>
    %57 = arith.addf %55, %56 : vector<48x32xf32>
    %cst_33 = arith.constant dense<0.000000e+00> : vector<16x32xf32>
    %58 = tpu.matmul %38, %40, %cst_33 {dimension_numbers = #tpu.dot_dimension_numbers<[1], [0], [0], [1], [0, 0, 1, 1], [], []>} : vector<16x32xf32>, vector<32x32xf32>, vector<16x32xf32> -> vector<16x32xf32>
    %59 = vector.broadcast %46 : vector<1x32xf32> to vector<16x32xf32>
    %60 = arith.addf %58, %59 : vector<16x32xf32>
    %cst_34 = arith.constant dense<0.000000e+00> : vector<16x32xf32>
    %61 = tpu.matmul %38, %41, %cst_34 {dimension_numbers = #tpu.dot_dimension_numbers<[1], [0], [0], [1], [0, 0, 1, 1], [], []>} : vector<16x32xf32>, vector<32x32xf32>, vector<16x32xf32> -> vector<16x32xf32>
    %62 = vector.broadcast %47 : vector<1x32xf32> to vector<16x32xf32>
    %63 = arith.addf %61, %62 : vector<16x32xf32>
    %64 = vector.extract_strided_slice %60 {offsets = [0, 0], sizes = [8, 32], strides = [1, 1]} : vector<16x32xf32> to vector<8x32xf32>
    %65 = vector.shape_cast %64 : vector<8x32xf32> to vector<1x8x32xf32>
    %66 = vector.broadcast %65 : vector<1x8x32xf32> to vector<8x8x32xf32>
    %67 = vector.broadcast %13 : vector<8x1x32xf32> to vector<8x8x32xf32>
    %68 = arith.mulf %66, %67 : vector<8x8x32xf32>
    %69 = vector.shape_cast %68 : vector<8x8x32xf32> to vector<64x32xf32>
    %70 = vector.extract_strided_slice %60 {offsets = [8, 0], sizes = [8, 32], strides = [1, 1]} : vector<16x32xf32> to vector<8x32xf32>
    %71 = vector.shape_cast %70 : vector<8x32xf32> to vector<1x8x32xf32>
    %72 = vector.broadcast %71 : vector<1x8x32xf32> to vector<8x8x32xf32>
    %73 = vector.broadcast %13 : vector<8x1x32xf32> to vector<8x8x32xf32>
    %74 = arith.mulf %72, %73 : vector<8x8x32xf32>
    %75 = vector.shape_cast %74 : vector<8x8x32xf32> to vector<64x32xf32>
    %76 = tpu.concatenate %69, %75 in 0 : vector<64x32xf32>, vector<64x32xf32> -> vector<128x32xf32>
    %77 = vector.extract_strided_slice %63 {offsets = [0, 0], sizes = [8, 32], strides = [1, 1]} : vector<16x32xf32> to vector<8x32xf32>
    %78 = vector.shape_cast %77 : vector<8x32xf32> to vector<1x8x32xf32>
    %79 = vector.broadcast %78 : vector<1x8x32xf32> to vector<8x8x32xf32>
    %80 = vector.broadcast %13 : vector<8x1x32xf32> to vector<8x8x32xf32>
    %81 = arith.mulf %79, %80 : vector<8x8x32xf32>
    %82 = vector.shape_cast %81 : vector<8x8x32xf32> to vector<64x32xf32>
    %83 = vector.extract_strided_slice %63 {offsets = [8, 0], sizes = [8, 32], strides = [1, 1]} : vector<16x32xf32> to vector<8x32xf32>
    %84 = vector.shape_cast %83 : vector<8x32xf32> to vector<1x8x32xf32>
    %85 = vector.broadcast %84 : vector<1x8x32xf32> to vector<8x8x32xf32>
    %86 = vector.broadcast %13 : vector<8x1x32xf32> to vector<8x8x32xf32>
    %87 = arith.mulf %85, %86 : vector<8x8x32xf32>
    %88 = vector.shape_cast %87 : vector<8x8x32xf32> to vector<64x32xf32>
    %89 = tpu.concatenate %82, %88 in 0 : vector<64x32xf32>, vector<64x32xf32> -> vector<128x32xf32>
    %cst_35 = arith.constant dense<0.000000e+00> : vector<48x128xf32>
    %90 = tpu.matmul %57, %76, %cst_35 {dimension_numbers = #tpu.dot_dimension_numbers<[1], [1], [0], [0], [0, 0, 1, 0], [], []>} : vector<48x32xf32>, vector<128x32xf32>, vector<48x128xf32> -> vector<48x128xf32>
    %cst_36 = arith.constant 5.000000e-01 : f32
    %91 = vector.broadcast %cst_36 : f32 to vector<48x128xf32>
    %92 = arith.mulf %90, %91 : vector<48x128xf32>
    %93 = tpu.iota {dimensions = array<i32: 1>} : vector<1x128xi32>
    %c0_i32_37 = arith.constant 0 : i32
    %94 = vector.broadcast %c0_i32_37 : i32 to vector<1x128xi32>
    %c64_i32 = arith.constant 64 : i32
    %95 = vector.broadcast %c64_i32 : i32 to vector<1x128xi32>
    %96 = arith.cmpi sge, %93, %95 : vector<1x128xi32>
    %97 = arith.extui %96 : vector<1x128xi1> to vector<1x128xi32>
    %98 = arith.addi %94, %97 : vector<1x128xi32>
    %99 = vector.broadcast %27 : vector<48x1xi32> to vector<48x128xi32>
    %100 = vector.broadcast %98 : vector<1x128xi32> to vector<48x128xi32>
    %101 = arith.cmpi eq, %99, %100 : vector<48x128xi32>
    %cst_38 = arith.constant -1.000000e+30 : f32
    %102 = vector.broadcast %cst_38 : f32 to vector<48x128xf32>
    %103 = arith.select %101, %92, %102 : vector<48x128xi1>, vector<48x128xf32>
    %cst_39 = arith.constant dense<0xFF800000> : vector<48xf32>
    %104 = vector.multi_reduction <maximumf>, %103, %cst_39 [1] : vector<48x128xf32> to vector<48xf32>
    %105 = vector.shape_cast %104 : vector<48xf32> to vector<48x1xf32>
    %106 = vector.broadcast %105 : vector<48x1xf32> to vector<48x128xf32>
    %107 = arith.subf %103, %106 : vector<48x128xf32>
    %108 = math.exp %107 : vector<48x128xf32>
    %109 = tpu.iota {dimensions = array<i32: 0>} : vector<16x1xi32>
    %c8_i32_40 = arith.constant 8 : i32
    %110 = vector.broadcast %c8_i32_40 : i32 to vector<16x1xi32>
    %111 = arith.muli %109, %110 : vector<16x1xi32>
    %112 = vector.broadcast %93 : vector<1x128xi32> to vector<16x128xi32>
    %113 = vector.broadcast %111 : vector<16x1xi32> to vector<16x128xi32>
    %114 = arith.cmpi sge, %112, %113 : vector<16x128xi32>
    %c8_i32_41 = arith.constant 8 : i32
    %115 = vector.broadcast %c8_i32_41 : i32 to vector<16x1xi32>
    %116 = arith.muli %109, %115 : vector<16x1xi32>
    %c8_i32_42 = arith.constant 8 : i32
    %117 = vector.broadcast %c8_i32_42 : i32 to vector<16x1xi32>
    %118 = arith.addi %116, %117 : vector<16x1xi32>
    %119 = vector.broadcast %93 : vector<1x128xi32> to vector<16x128xi32>
    %120 = vector.broadcast %118 : vector<16x1xi32> to vector<16x128xi32>
    %121 = arith.cmpi slt, %119, %120 : vector<16x128xi32>
    %122 = arith.andi %114, %121 : vector<16x128xi1>
    %123 = arith.extui %122 : vector<16x128xi1> to vector<16x128xi32>
    %124 = arith.sitofp %123 : vector<16x128xi32> to vector<16x128xf32>
    %cst_43 = arith.constant dense<0.000000e+00> : vector<48x16xf32>
    %125 = tpu.matmul %108, %124, %cst_43 {dimension_numbers = #tpu.dot_dimension_numbers<[1], [1], [0], [0], [0, 0, 1, 0], [], []>} : vector<48x128xf32>, vector<16x128xf32>, vector<48x16xf32> -> vector<48x16xf32>
    %cst_44 = arith.constant 1.000000e-30 : f32
    %126 = vector.broadcast %cst_44 : f32 to vector<48x16xf32>
    %127 = arith.addf %125, %126 : vector<48x16xf32>
    %128 = tpu.reciprocal %127 {approx = true} : vector<48x16xf32> -> vector<48x16xf32>
    %cst_45 = arith.constant dense<0.000000e+00> : vector<48x128xf32>
    %129 = tpu.matmul %128, %124, %cst_45 {dimension_numbers = #tpu.dot_dimension_numbers<[1], [0], [0], [1], [0, 0, 1, 1], [], []>} : vector<48x16xf32>, vector<16x128xf32>, vector<48x128xf32> -> vector<48x128xf32>
    %130 = arith.mulf %108, %129 : vector<48x128xf32>
    %cst_46 = arith.constant dense<0.000000e+00> : vector<48x32xf32>
    %131 = tpu.matmul %130, %89, %cst_46 {dimension_numbers = #tpu.dot_dimension_numbers<[1], [0], [0], [1], [0, 0, 1, 1], [], []>} : vector<48x128xf32>, vector<128x32xf32>, vector<48x32xf32> -> vector<48x32xf32>
    %cst_47 = arith.constant dense<0.000000e+00> : vector<48x32xf32>
    %132 = tpu.matmul %131, %42, %cst_47 {dimension_numbers = #tpu.dot_dimension_numbers<[1], [0], [0], [1], [0, 0, 1, 1], [], []>} : vector<48x32xf32>, vector<32x32xf32>, vector<48x32xf32> -> vector<48x32xf32>
    %133 = vector.broadcast %48 : vector<1x32xf32> to vector<48x32xf32>
    %134 = arith.addf %132, %133 : vector<48x32xf32>
    %135 = arith.addf %134, %37 : vector<48x32xf32>
    %cst_48 = arith.constant dense<0.000000e+00> : vector<48xf32>
    %136 = vector.multi_reduction <add>, %135, %cst_48 [1] : vector<48x32xf32> to vector<48xf32>
    %137 = vector.shape_cast %136 : vector<48xf32> to vector<48x1xf32>
    %cst_49 = arith.constant 3.200000e+01 : f32
    %138 = vector.broadcast %cst_49 : f32 to vector<48x1xf32>
    %139 = arith.divf %137, %138 : vector<48x1xf32>
    %140 = vector.broadcast %139 : vector<48x1xf32> to vector<48x32xf32>
    %141 = arith.subf %135, %140 : vector<48x32xf32>
    %142 = arith.mulf %141, %141 : vector<48x32xf32>
    %cst_50 = arith.constant dense<0.000000e+00> : vector<48xf32>
    %143 = vector.multi_reduction <add>, %142, %cst_50 [1] : vector<48x32xf32> to vector<48xf32>
    %144 = vector.shape_cast %143 : vector<48xf32> to vector<48x1xf32>
    %cst_51 = arith.constant 3.200000e+01 : f32
    %145 = vector.broadcast %cst_51 : f32 to vector<48x1xf32>
    %146 = arith.divf %144, %145 : vector<48x1xf32>
    %cst_52 = arith.constant 9.99999974E-6 : f32
    %147 = vector.broadcast %cst_52 : f32 to vector<48x1xf32>
    %148 = arith.addf %146, %147 : vector<48x1xf32>
    %149 = math.rsqrt %148 : vector<48x1xf32>
    %150 = vector.broadcast %149 : vector<48x1xf32> to vector<48x32xf32>
    %151 = arith.mulf %141, %150 : vector<48x32xf32>
    %152 = vector.broadcast %49 : vector<1x32xf32> to vector<48x32xf32>
    %153 = arith.mulf %151, %152 : vector<48x32xf32>
    %154 = vector.broadcast %50 : vector<1x32xf32> to vector<48x32xf32>
    %155 = arith.addf %153, %154 : vector<48x32xf32>
    %cst_53 = arith.constant dense<0.000000e+00> : vector<48x64xf32>
    %156 = tpu.matmul %155, %43, %cst_53 {dimension_numbers = #tpu.dot_dimension_numbers<[1], [0], [0], [1], [0, 0, 1, 1], [], []>} : vector<48x32xf32>, vector<32x64xf32>, vector<48x64xf32> -> vector<48x64xf32>
    %157 = vector.broadcast %51 : vector<1x64xf32> to vector<48x64xf32>
    %158 = arith.addf %156, %157 : vector<48x64xf32>
    %cst_54 = arith.constant 0.000000e+00 : f32
    %159 = vector.broadcast %cst_54 : f32 to vector<48x64xf32>
    %160 = arith.maximumf %158, %159 : vector<48x64xf32>
    %cst_55 = arith.constant dense<0.000000e+00> : vector<48x32xf32>
    %161 = tpu.matmul %160, %44, %cst_55 {dimension_numbers = #tpu.dot_dimension_numbers<[1], [0], [0], [1], [0, 0, 1, 1], [], []>} : vector<48x64xf32>, vector<64x32xf32>, vector<48x32xf32> -> vector<48x32xf32>
    %162 = vector.broadcast %52 : vector<1x32xf32> to vector<48x32xf32>
    %163 = arith.addf %161, %162 : vector<48x32xf32>
    %164 = arith.addf %163, %155 : vector<48x32xf32>
    %cst_56 = arith.constant dense<0.000000e+00> : vector<48xf32>
    %165 = vector.multi_reduction <add>, %164, %cst_56 [1] : vector<48x32xf32> to vector<48xf32>
    %166 = vector.shape_cast %165 : vector<48xf32> to vector<48x1xf32>
    %cst_57 = arith.constant 3.200000e+01 : f32
    %167 = vector.broadcast %cst_57 : f32 to vector<48x1xf32>
    %168 = arith.divf %166, %167 : vector<48x1xf32>
    %169 = vector.broadcast %168 : vector<48x1xf32> to vector<48x32xf32>
    %170 = arith.subf %164, %169 : vector<48x32xf32>
    %171 = arith.mulf %170, %170 : vector<48x32xf32>
    %cst_58 = arith.constant dense<0.000000e+00> : vector<48xf32>
    %172 = vector.multi_reduction <add>, %171, %cst_58 [1] : vector<48x32xf32> to vector<48xf32>
    %173 = vector.shape_cast %172 : vector<48xf32> to vector<48x1xf32>
    %cst_59 = arith.constant 3.200000e+01 : f32
    %174 = vector.broadcast %cst_59 : f32 to vector<48x1xf32>
    %175 = arith.divf %173, %174 : vector<48x1xf32>
    %cst_60 = arith.constant 9.99999974E-6 : f32
    %176 = vector.broadcast %cst_60 : f32 to vector<48x1xf32>
    %177 = arith.addf %175, %176 : vector<48x1xf32>
    %178 = math.rsqrt %177 : vector<48x1xf32>
    %179 = vector.broadcast %178 : vector<48x1xf32> to vector<48x32xf32>
    %180 = arith.mulf %170, %179 : vector<48x32xf32>
    %181 = vector.broadcast %53 : vector<1x32xf32> to vector<48x32xf32>
    %182 = arith.mulf %180, %181 : vector<48x32xf32>
    %183 = vector.broadcast %54 : vector<1x32xf32> to vector<48x32xf32>
    %184 = arith.addf %182, %183 : vector<48x32xf32>
    %185 = vector.extract_strided_slice %184 {offsets = [16, 0], sizes = [32, 32], strides = [1, 1]} : vector<48x32xf32> to vector<32x32xf32>
    %c224 = arith.constant 224 : index
    %c0_61 = arith.constant 0 : index
    %186 = vector.load %arg3[%c224, %c0_61] : memref<496x64xf32, #tpu.memory_space<vmem>>, vector<32x32xf32>
    %c256 = arith.constant 256 : index
    %c0_62 = arith.constant 0 : index
    %187 = vector.load %arg3[%c256, %c0_62] : memref<496x64xf32, #tpu.memory_space<vmem>>, vector<32x32xf32>
    %c288 = arith.constant 288 : index
    %c0_63 = arith.constant 0 : index
    %188 = vector.load %arg3[%c288, %c0_63] : memref<496x64xf32, #tpu.memory_space<vmem>>, vector<32x32xf32>
    %c320 = arith.constant 320 : index
    %c0_64 = arith.constant 0 : index
    %189 = vector.load %arg3[%c320, %c0_64] : memref<496x64xf32, #tpu.memory_space<vmem>>, vector<32x32xf32>
    %c352 = arith.constant 352 : index
    %c0_65 = arith.constant 0 : index
    %190 = vector.load %arg3[%c352, %c0_65] : memref<496x64xf32, #tpu.memory_space<vmem>>, vector<32x64xf32>
    %c384 = arith.constant 384 : index
    %c0_66 = arith.constant 0 : index
    %191 = vector.load %arg3[%c384, %c0_66] : memref<496x64xf32, #tpu.memory_space<vmem>>, vector<64x32xf32>
    %c11 = arith.constant 11 : index
    %c0_67 = arith.constant 0 : index
    %192 = vector.load %arg4[%c11, %c0_67] : memref<21x64xf32, #tpu.memory_space<vmem>>, vector<1x32xf32>
    %c12 = arith.constant 12 : index
    %c0_68 = arith.constant 0 : index
    %193 = vector.load %arg4[%c12, %c0_68] : memref<21x64xf32, #tpu.memory_space<vmem>>, vector<1x32xf32>
    %c13 = arith.constant 13 : index
    %c0_69 = arith.constant 0 : index
    %194 = vector.load %arg4[%c13, %c0_69] : memref<21x64xf32, #tpu.memory_space<vmem>>, vector<1x32xf32>
    %c14 = arith.constant 14 : index
    %c0_70 = arith.constant 0 : index
    %195 = vector.load %arg4[%c14, %c0_70] : memref<21x64xf32, #tpu.memory_space<vmem>>, vector<1x32xf32>
    %c15 = arith.constant 15 : index
    %c0_71 = arith.constant 0 : index
    %196 = vector.load %arg4[%c15, %c0_71] : memref<21x64xf32, #tpu.memory_space<vmem>>, vector<1x32xf32>
    %c16_72 = arith.constant 16 : index
    %c0_73 = arith.constant 0 : index
    %197 = vector.load %arg4[%c16_72, %c0_73] : memref<21x64xf32, #tpu.memory_space<vmem>>, vector<1x32xf32>
    %c17 = arith.constant 17 : index
    %c0_74 = arith.constant 0 : index
    %198 = vector.load %arg4[%c17, %c0_74] : memref<21x64xf32, #tpu.memory_space<vmem>>, vector<1x64xf32>
    %c18 = arith.constant 18 : index
    %c0_75 = arith.constant 0 : index
    %199 = vector.load %arg4[%c18, %c0_75] : memref<21x64xf32, #tpu.memory_space<vmem>>, vector<1x32xf32>
    %c19 = arith.constant 19 : index
    %c0_76 = arith.constant 0 : index
    %200 = vector.load %arg4[%c19, %c0_76] : memref<21x64xf32, #tpu.memory_space<vmem>>, vector<1x32xf32>
    %c20 = arith.constant 20 : index
    %c0_77 = arith.constant 0 : index
    %201 = vector.load %arg4[%c20, %c0_77] : memref<21x64xf32, #tpu.memory_space<vmem>>, vector<1x32xf32>
    %cst_78 = arith.constant dense<0.000000e+00> : vector<48x32xf32>
    %202 = tpu.matmul %184, %186, %cst_78 {dimension_numbers = #tpu.dot_dimension_numbers<[1], [0], [0], [1], [0, 0, 1, 1], [], []>} : vector<48x32xf32>, vector<32x32xf32>, vector<48x32xf32> -> vector<48x32xf32>
    %203 = vector.broadcast %192 : vector<1x32xf32> to vector<48x32xf32>
    %204 = arith.addf %202, %203 : vector<48x32xf32>
    %cst_79 = arith.constant dense<0.000000e+00> : vector<32x32xf32>
    %205 = tpu.matmul %185, %187, %cst_79 {dimension_numbers = #tpu.dot_dimension_numbers<[1], [0], [0], [1], [0, 0, 1, 1], [], []>} : vector<32x32xf32>, vector<32x32xf32>, vector<32x32xf32> -> vector<32x32xf32>
    %206 = vector.broadcast %193 : vector<1x32xf32> to vector<32x32xf32>
    %207 = arith.addf %205, %206 : vector<32x32xf32>
    %cst_80 = arith.constant dense<0.000000e+00> : vector<32x32xf32>
    %208 = tpu.matmul %185, %188, %cst_80 {dimension_numbers = #tpu.dot_dimension_numbers<[1], [0], [0], [1], [0, 0, 1, 1], [], []>} : vector<32x32xf32>, vector<32x32xf32>, vector<32x32xf32> -> vector<32x32xf32>
    %209 = vector.broadcast %194 : vector<1x32xf32> to vector<32x32xf32>
    %210 = arith.addf %208, %209 : vector<32x32xf32>
    %211 = vector.extract_strided_slice %207 {offsets = [0, 0], sizes = [16, 32], strides = [1, 1]} : vector<32x32xf32> to vector<16x32xf32>
    %212 = vector.shape_cast %211 : vector<16x32xf32> to vector<1x16x32xf32>
    %213 = vector.broadcast %212 : vector<1x16x32xf32> to vector<8x16x32xf32>
    %214 = vector.broadcast %13 : vector<8x1x32xf32> to vector<8x16x32xf32>
    %215 = arith.mulf %213, %214 : vector<8x16x32xf32>
    %216 = vector.shape_cast %215 : vector<8x16x32xf32> to vector<128x32xf32>
    %217 = vector.extract_strided_slice %207 {offsets = [16, 0], sizes = [16, 32], strides = [1, 1]} : vector<32x32xf32> to vector<16x32xf32>
    %218 = vector.shape_cast %217 : vector<16x32xf32> to vector<1x16x32xf32>
    %219 = vector.broadcast %218 : vector<1x16x32xf32> to vector<8x16x32xf32>
    %220 = vector.broadcast %13 : vector<8x1x32xf32> to vector<8x16x32xf32>
    %221 = arith.mulf %219, %220 : vector<8x16x32xf32>
    %222 = vector.shape_cast %221 : vector<8x16x32xf32> to vector<128x32xf32>
    %223 = tpu.concatenate %216, %222 in 0 : vector<128x32xf32>, vector<128x32xf32> -> vector<256x32xf32>
    %224 = vector.extract_strided_slice %210 {offsets = [0, 0], sizes = [16, 32], strides = [1, 1]} : vector<32x32xf32> to vector<16x32xf32>
    %225 = vector.shape_cast %224 : vector<16x32xf32> to vector<1x16x32xf32>
    %226 = vector.broadcast %225 : vector<1x16x32xf32> to vector<8x16x32xf32>
    %227 = vector.broadcast %13 : vector<8x1x32xf32> to vector<8x16x32xf32>
    %228 = arith.mulf %226, %227 : vector<8x16x32xf32>
    %229 = vector.shape_cast %228 : vector<8x16x32xf32> to vector<128x32xf32>
    %230 = vector.extract_strided_slice %210 {offsets = [16, 0], sizes = [16, 32], strides = [1, 1]} : vector<32x32xf32> to vector<16x32xf32>
    %231 = vector.shape_cast %230 : vector<16x32xf32> to vector<1x16x32xf32>
    %232 = vector.broadcast %231 : vector<1x16x32xf32> to vector<8x16x32xf32>
    %233 = vector.broadcast %13 : vector<8x1x32xf32> to vector<8x16x32xf32>
    %234 = arith.mulf %232, %233 : vector<8x16x32xf32>
    %235 = vector.shape_cast %234 : vector<8x16x32xf32> to vector<128x32xf32>
    %236 = tpu.concatenate %229, %235 in 0 : vector<128x32xf32>, vector<128x32xf32> -> vector<256x32xf32>
    %cst_81 = arith.constant dense<0.000000e+00> : vector<48x256xf32>
    %237 = tpu.matmul %204, %223, %cst_81 {dimension_numbers = #tpu.dot_dimension_numbers<[1], [1], [0], [0], [0, 0, 1, 0], [], []>} : vector<48x32xf32>, vector<256x32xf32>, vector<48x256xf32> -> vector<48x256xf32>
    %cst_82 = arith.constant 5.000000e-01 : f32
    %238 = vector.broadcast %cst_82 : f32 to vector<48x256xf32>
    %239 = arith.mulf %237, %238 : vector<48x256xf32>
    %240 = tpu.iota {dimensions = array<i32: 1>} : vector<1x256xi32>
    %c0_i32_83 = arith.constant 0 : i32
    %241 = vector.broadcast %c0_i32_83 : i32 to vector<1x256xi32>
    %c128_i32 = arith.constant 128 : i32
    %242 = vector.broadcast %c128_i32 : i32 to vector<1x256xi32>
    %243 = arith.cmpi sge, %240, %242 : vector<1x256xi32>
    %244 = arith.extui %243 : vector<1x256xi1> to vector<1x256xi32>
    %245 = arith.addi %241, %244 : vector<1x256xi32>
    %246 = vector.broadcast %27 : vector<48x1xi32> to vector<48x256xi32>
    %247 = vector.broadcast %245 : vector<1x256xi32> to vector<48x256xi32>
    %248 = arith.cmpi eq, %246, %247 : vector<48x256xi32>
    %cst_84 = arith.constant -1.000000e+30 : f32
    %249 = vector.broadcast %cst_84 : f32 to vector<48x256xf32>
    %250 = arith.select %248, %239, %249 : vector<48x256xi1>, vector<48x256xf32>
    %cst_85 = arith.constant dense<0xFF800000> : vector<48xf32>
    %251 = vector.multi_reduction <maximumf>, %250, %cst_85 [1] : vector<48x256xf32> to vector<48xf32>
    %252 = vector.shape_cast %251 : vector<48xf32> to vector<48x1xf32>
    %253 = vector.broadcast %252 : vector<48x1xf32> to vector<48x256xf32>
    %254 = arith.subf %250, %253 : vector<48x256xf32>
    %255 = math.exp %254 : vector<48x256xf32>
    %256 = tpu.iota {dimensions = array<i32: 0>} : vector<16x1xi32>
    %c16_i32_86 = arith.constant 16 : i32
    %257 = vector.broadcast %c16_i32_86 : i32 to vector<16x1xi32>
    %258 = arith.muli %256, %257 : vector<16x1xi32>
    %259 = vector.broadcast %240 : vector<1x256xi32> to vector<16x256xi32>
    %260 = vector.broadcast %258 : vector<16x1xi32> to vector<16x256xi32>
    %261 = arith.cmpi sge, %259, %260 : vector<16x256xi32>
    %c16_i32_87 = arith.constant 16 : i32
    %262 = vector.broadcast %c16_i32_87 : i32 to vector<16x1xi32>
    %263 = arith.muli %256, %262 : vector<16x1xi32>
    %c16_i32_88 = arith.constant 16 : i32
    %264 = vector.broadcast %c16_i32_88 : i32 to vector<16x1xi32>
    %265 = arith.addi %263, %264 : vector<16x1xi32>
    %266 = vector.broadcast %240 : vector<1x256xi32> to vector<16x256xi32>
    %267 = vector.broadcast %265 : vector<16x1xi32> to vector<16x256xi32>
    %268 = arith.cmpi slt, %266, %267 : vector<16x256xi32>
    %269 = arith.andi %261, %268 : vector<16x256xi1>
    %270 = arith.extui %269 : vector<16x256xi1> to vector<16x256xi32>
    %271 = arith.sitofp %270 : vector<16x256xi32> to vector<16x256xf32>
    %cst_89 = arith.constant dense<0.000000e+00> : vector<48x16xf32>
    %272 = tpu.matmul %255, %271, %cst_89 {dimension_numbers = #tpu.dot_dimension_numbers<[1], [1], [0], [0], [0, 0, 1, 0], [], []>} : vector<48x256xf32>, vector<16x256xf32>, vector<48x16xf32> -> vector<48x16xf32>
    %cst_90 = arith.constant 1.000000e-30 : f32
    %273 = vector.broadcast %cst_90 : f32 to vector<48x16xf32>
    %274 = arith.addf %272, %273 : vector<48x16xf32>
    %275 = tpu.reciprocal %274 {approx = true} : vector<48x16xf32> -> vector<48x16xf32>
    %cst_91 = arith.constant dense<0.000000e+00> : vector<48x256xf32>
    %276 = tpu.matmul %275, %271, %cst_91 {dimension_numbers = #tpu.dot_dimension_numbers<[1], [0], [0], [1], [0, 0, 1, 1], [], []>} : vector<48x16xf32>, vector<16x256xf32>, vector<48x256xf32> -> vector<48x256xf32>
    %277 = arith.mulf %255, %276 : vector<48x256xf32>
    %cst_92 = arith.constant dense<0.000000e+00> : vector<48x32xf32>
    %278 = tpu.matmul %277, %236, %cst_92 {dimension_numbers = #tpu.dot_dimension_numbers<[1], [0], [0], [1], [0, 0, 1, 1], [], []>} : vector<48x256xf32>, vector<256x32xf32>, vector<48x32xf32> -> vector<48x32xf32>
    %cst_93 = arith.constant dense<0.000000e+00> : vector<48x32xf32>
    %279 = tpu.matmul %278, %189, %cst_93 {dimension_numbers = #tpu.dot_dimension_numbers<[1], [0], [0], [1], [0, 0, 1, 1], [], []>} : vector<48x32xf32>, vector<32x32xf32>, vector<48x32xf32> -> vector<48x32xf32>
    %280 = vector.broadcast %195 : vector<1x32xf32> to vector<48x32xf32>
    %281 = arith.addf %279, %280 : vector<48x32xf32>
    %282 = tpu.iota {dimensions = array<i32: 0>} : vector<16x16xi32>
    %283 = tpu.iota {dimensions = array<i32: 1>} : vector<16x16xi32>
    %284 = arith.cmpi eq, %282, %283 : vector<16x16xi32>
    %285 = arith.extui %284 : vector<16x16xi1> to vector<16x16xi32>
    %286 = arith.sitofp %285 : vector<16x16xi32> to vector<16x16xf32>
    %287 = vector.shape_cast %286 : vector<16x16xf32> to vector<1x16x16xf32>
    %288 = vector.shape_cast %287 : vector<1x16x16xf32> to vector<1x16x16xf32>
    %289 = vector.broadcast %288 : vector<1x16x16xf32> to vector<16x16x16xf32>
    %290 = vector.shape_cast %289 : vector<16x16x16xf32> to vector<256x16xf32>
    %cst_94 = arith.constant dense<0.000000e+00> : vector<48x16xf32>
    %291 = tpu.matmul %277, %290, %cst_94 {dimension_numbers = #tpu.dot_dimension_numbers<[1], [0], [0], [1], [0, 0, 1, 1], [], []>} : vector<48x256xf32>, vector<256x16xf32>, vector<48x16xf32> -> vector<48x16xf32>
    %cst_95 = arith.constant 1.250000e-01 : f32
    %292 = vector.broadcast %cst_95 : f32 to vector<48x16xf32>
    %293 = arith.mulf %291, %292 : vector<48x16xf32>
    %294 = arith.addf %281, %184 : vector<48x32xf32>
    %cst_96 = arith.constant dense<0.000000e+00> : vector<48xf32>
    %295 = vector.multi_reduction <add>, %294, %cst_96 [1] : vector<48x32xf32> to vector<48xf32>
    %296 = vector.shape_cast %295 : vector<48xf32> to vector<48x1xf32>
    %cst_97 = arith.constant 3.200000e+01 : f32
    %297 = vector.broadcast %cst_97 : f32 to vector<48x1xf32>
    %298 = arith.divf %296, %297 : vector<48x1xf32>
    %299 = vector.broadcast %298 : vector<48x1xf32> to vector<48x32xf32>
    %300 = arith.subf %294, %299 : vector<48x32xf32>
    %301 = arith.mulf %300, %300 : vector<48x32xf32>
    %cst_98 = arith.constant dense<0.000000e+00> : vector<48xf32>
    %302 = vector.multi_reduction <add>, %301, %cst_98 [1] : vector<48x32xf32> to vector<48xf32>
    %303 = vector.shape_cast %302 : vector<48xf32> to vector<48x1xf32>
    %cst_99 = arith.constant 3.200000e+01 : f32
    %304 = vector.broadcast %cst_99 : f32 to vector<48x1xf32>
    %305 = arith.divf %303, %304 : vector<48x1xf32>
    %cst_100 = arith.constant 9.99999974E-6 : f32
    %306 = vector.broadcast %cst_100 : f32 to vector<48x1xf32>
    %307 = arith.addf %305, %306 : vector<48x1xf32>
    %308 = math.rsqrt %307 : vector<48x1xf32>
    %309 = vector.broadcast %308 : vector<48x1xf32> to vector<48x32xf32>
    %310 = arith.mulf %300, %309 : vector<48x32xf32>
    %311 = vector.broadcast %196 : vector<1x32xf32> to vector<48x32xf32>
    %312 = arith.mulf %310, %311 : vector<48x32xf32>
    %313 = vector.broadcast %197 : vector<1x32xf32> to vector<48x32xf32>
    %314 = arith.addf %312, %313 : vector<48x32xf32>
    %cst_101 = arith.constant dense<0.000000e+00> : vector<48x64xf32>
    %315 = tpu.matmul %314, %190, %cst_101 {dimension_numbers = #tpu.dot_dimension_numbers<[1], [0], [0], [1], [0, 0, 1, 1], [], []>} : vector<48x32xf32>, vector<32x64xf32>, vector<48x64xf32> -> vector<48x64xf32>
    %316 = vector.broadcast %198 : vector<1x64xf32> to vector<48x64xf32>
    %317 = arith.addf %315, %316 : vector<48x64xf32>
    %cst_102 = arith.constant 0.000000e+00 : f32
    %318 = vector.broadcast %cst_102 : f32 to vector<48x64xf32>
    %319 = arith.maximumf %317, %318 : vector<48x64xf32>
    %cst_103 = arith.constant dense<0.000000e+00> : vector<48x32xf32>
    %320 = tpu.matmul %319, %191, %cst_103 {dimension_numbers = #tpu.dot_dimension_numbers<[1], [0], [0], [1], [0, 0, 1, 1], [], []>} : vector<48x64xf32>, vector<64x32xf32>, vector<48x32xf32> -> vector<48x32xf32>
    %321 = vector.broadcast %199 : vector<1x32xf32> to vector<48x32xf32>
    %322 = arith.addf %320, %321 : vector<48x32xf32>
    %323 = arith.addf %322, %314 : vector<48x32xf32>
    %cst_104 = arith.constant dense<0.000000e+00> : vector<48xf32>
    %324 = vector.multi_reduction <add>, %323, %cst_104 [1] : vector<48x32xf32> to vector<48xf32>
    %325 = vector.shape_cast %324 : vector<48xf32> to vector<48x1xf32>
    %cst_105 = arith.constant 3.200000e+01 : f32
    %326 = vector.broadcast %cst_105 : f32 to vector<48x1xf32>
    %327 = arith.divf %325, %326 : vector<48x1xf32>
    %328 = vector.broadcast %327 : vector<48x1xf32> to vector<48x32xf32>
    %329 = arith.subf %323, %328 : vector<48x32xf32>
    %330 = arith.mulf %329, %329 : vector<48x32xf32>
    %cst_106 = arith.constant dense<0.000000e+00> : vector<48xf32>
    %331 = vector.multi_reduction <add>, %330, %cst_106 [1] : vector<48x32xf32> to vector<48xf32>
    %332 = vector.shape_cast %331 : vector<48xf32> to vector<48x1xf32>
    %cst_107 = arith.constant 3.200000e+01 : f32
    %333 = vector.broadcast %cst_107 : f32 to vector<48x1xf32>
    %334 = arith.divf %332, %333 : vector<48x1xf32>
    %cst_108 = arith.constant 9.99999974E-6 : f32
    %335 = vector.broadcast %cst_108 : f32 to vector<48x1xf32>
    %336 = arith.addf %334, %335 : vector<48x1xf32>
    %337 = math.rsqrt %336 : vector<48x1xf32>
    %338 = vector.broadcast %337 : vector<48x1xf32> to vector<48x32xf32>
    %339 = arith.mulf %329, %338 : vector<48x32xf32>
    %340 = vector.broadcast %200 : vector<1x32xf32> to vector<48x32xf32>
    %341 = arith.mulf %339, %340 : vector<48x32xf32>
    %342 = vector.broadcast %201 : vector<1x32xf32> to vector<48x32xf32>
    %343 = arith.addf %341, %342 : vector<48x32xf32>
    %c0_109 = arith.constant 0 : index
    %c0_110 = arith.constant 0 : index
    %344 = vector.load %arg5[%c0_109, %c0_110] : memref<48x32xf32, #tpu.memory_space<vmem>>, vector<48x32xf32>
    tpu.vector_store %arg5[%c0_109, %c0_110], %343 {strides = array<i32>} : memref<48x32xf32, #tpu.memory_space<vmem>>, vector<48x32xf32>,
    %c0_111 = arith.constant 0 : index
    %c0_112 = arith.constant 0 : index
    %345 = vector.load %arg6[%c0_111, %c0_112] : memref<48x16xf32, #tpu.memory_space<vmem>>, vector<48x16xf32>
    tpu.vector_store %arg6[%c0_111, %c0_112], %293 {strides = array<i32>} : memref<48x16xf32, #tpu.memory_space<vmem>>, vector<48x16xf32>,
    return
  }
}

</mosaic_0001>

<bundles_post_ra>
// kernel: qformer4_forward.1
= control target key start
LH: loop header
LB: loop body
LE: loop exit
PB: predicated region body
PF: predicated region fallthrough
CT: control target
= control target key end

     0   :  { %vm140_vm0 = vcmask 392192   ;;  %vm240_vm1 = vcmask 261120   ;;  %v22_v31 = vlaneseq  ;;  %v4827_v37 = vmov 1966171168   ;;  %s6222_s3 = inlined_call_operand.vmem [shape: f32[496,64], index: 3, kind: input, shape index: {}]   ;;  %s6223_s1 = inlined_call_operand.vmem [shape: f32[32,48], index: 1, kind: input, shape index: {}]   ;;  %s6224_s0 = inlined_call_operand.vmem [shape: f32[16,32], index: 0, kind: input, shape index: {}]   ;;  %s6225_s2 = inlined_call_operand.vmem [shape: f32[16,32], index: 2, kind: input, shape index: {}]   ;;  %s6226_s4 = inlined_call_operand.vmem [shape: f32[21,64], index: 4, kind: input, shape index: {}]   ;;  %s6227_s6 = inlined_call_operand.vmem [shape: f32[48,16], index: 6, kind: output, shape index: {1}]   ;;  %s6228_s5 = inlined_call_operand.vmem [shape: f32[48,32], index: 5, kind: output, shape index: {0}]  }
   0x1   :  { %v125_v0 = vld [vmem:[%s6222_s3 + $0x1c0] sm:$0xff]  ;;  %v126_v1 = vld [vmem:[%s6222_s3 + $0x1c8] sm:$0xff]  ;;  %v127_v2 = vld [vmem:[%s6222_s3 + $0x1d0] sm:$0xff]  ;;  %v37_v38 = vunpack.c.l.s4 %v4827_v37  ;;  %v6229_v41 = vmov 0.0   ;;  %vm972_vm14 = vcmask 130048   ;;  %vm1536_vm15 = vcmask 523264  }
   0x2   :  { %v4384_v3 = vpack.c.bf16 %v126_v1, %v125_v0  ;;  %v128_v4 = vld [vmem:[%s6222_s3 + $0x1d8] sm:$0xff]  ;;  %v129_v6 = vld [vmem:[%s6222_s3 + $0x1e0] sm:$0xff]  ;;  %v130_v7 = vld [vmem:[%s6222_s3 + $0x1e8] sm:$0xff]  ;;  %v4953_v32 = vshrl.u32 %v22_v31, 7  ;;  %v4956_v34 = vand.u32 127, %v22_v31 }
   0x3   :  { %v4388_v5 = vpack.c.bf16 %v128_v4, %v127_v2  ;;  %v132_v8 = vld [vmem:[%s6223_s1] sm:$0xff]  ;;  %v4392_v10 = vpack.c.bf16 %v130_v7, %v129_v6  ;;  %v260_v11 = vld [vmem:[%s6222_s3 + $0x28] sm:$0xff]  ;;  %v257_v15 = vld [vmem:[%s6222_s3 + $0x10] sm:$0xff]  ;;  %v38_v39 = vunpack.c.0.s8 %v37_v38 }
   0x4   :  { %4385 = vmatprep.subr.bf16.mxu0 %v4384_v3  ;;  %4068 = vmatprep.mubr.msk.f32.mxu0 %vm140_vm0, %v132_v8  ;;  %v259_v9 = vld [vmem:[%s6222_s3 + $0x20] sm:$0xff]  ;;  %v256_v13 = vld [vmem:[%s6222_s3 + $0x8] sm:$0xff]  ;;  %v258_v16 = vld [vmem:[%s6222_s3 + $0x18] sm:$0xff]  ;;  %v28_v33 = vadd.s32 1, %v4953_v32  ;;  %v26_v35 = vmul.u32 4, %v4953_v32  ;;  %v576_v58 = vsub.s32 0, %v4953_v32 }
   0x5   :  { %4387 = vmatpush3.bf16.msra.mxu0 %v4384_v3  ;;  %v255_v12 = vld [vmem:[%s6222_s3] sm:$0xff]  ;;  %v4400_v18 = vpack.c.bf16 %v258_v16, %v257_v15  ;;  %v239_v19 = vld [vmem:[%s6224_s0 + $0x8] sm:$0xff]  ;;  %v4404_v20 = vpack.c.bf16 %v260_v11, %v259_v9  ;;  %v261_v21 = vld [vmem:[%s6222_s3 + $0x30] sm:$0xff]  ;;  %v41_v40 = vsub.s32 %v38_v39, %v4953_v32  ;;  %vm813_vm6 = vcmp.ge.s32.totalorder %v4956_v34, 64 }
   0x6   :  { %4389 = vmatprep.subr.bf16.mxu0 %v4388_v5  ;;  %v4396_v14 = vpack.c.bf16 %v256_v13, %v255_v12  ;;  %v238_v17 = vld [vmem:[%s6224_s0] sm:$0xff]  ;;  %242 = vst.msk [vmem:[#allocation2 + $0x8] sm:$0xff] %vm240_vm1, %v239_v19  ;;  %v262_v22 = vld [vmem:[%s6222_s3 + $0x38] sm:$0xff]  ;;  %v133_v23 = vld [vmem:[%s6223_s1 + $0x8] sm:$0xff]  ;;  %v29_v36 = vmul.u32 4, %v28_v33  ;;  %vm27_vm2 = vcmp.ge.s32.totalorder %v4956_v34, %v26_v35 }
   0x7   :  { %241 = vst.msk [vmem:[#allocation2] sm:$0xff] %vm240_vm1, %v238_v17  ;;  %v134_v24 = vld [vmem:[%s6223_s1 + $0x10] sm:$0xff]  ;;  %v4408_v25 = vpack.c.bf16 %v262_v22, %v261_v21  ;;  %v135_v28 = vld [vmem:[%s6223_s1 + $0x18] sm:$0xff]  ;;  %v4939_v29 = vld [vmem:[%s6225_s2] sm:$0xff] }
   0x8   :  { %4397 = vmatprep.subr.bf16.mxu1 %v4396_v14  ;;  %v4947_v30 = vld [vmem:[%s6225_s2 + $0x8] sm:$0xff]  ;;  %vm30_vm3 = vcmp.lt.s32.totalorder %v4956_v34, %v29_v36  ;;  %v3505_v44 = vld [vmem:[%s6226_s4] ss:$0 sm:$0xff]  ;;  %v4969_v50 = vld [vmem:[%s6226_s4 + $0x1] ss:$0 sm:$0xff] }
   0x9   :  { %4391 = vmatpush3.bf16.msra.mxu0 %v4388_v5  ;;  %4399 = vmatpush3.bf16.msra.mxu1 %v4396_v14  ;;  %vm31_vm4 = vmand %vm27_vm2, %vm30_vm3  ;;  %v3517_v2 = vld [vmem:[%s6226_s4 + $0x2] ss:$0 sm:$0xff] }
   0xa   :  { %4393 = vmatprep.subr.bf16.mxu0 %v4392_v10  ;;  %4401 = vmatprep.subr.bf16.mxu1 %v4400_v18  ;;  %v3504_v42 = vsel %vm31_vm4, 1.0, %v6229_v41  ;;  %vm5005_vm5 = vmpackc.low %vm240_vm1, %vm240_vm1 }
   0xb   :  { %v42_v43 = vrot.slane %v3504_v42, %v41_v40  ;;  %v35_v46 = vcombine.high %v3504_v42, %v3504_v42 }
   0xd   :  { %4395 = vmatpush3.bf16.msra.mxu0 %v4392_v10  ;;  %4403 = vmatpush3.bf16.msra.mxu1 %v4400_v18  ;;  %v4930_v27 = vld [vmem:[#allocation2 + $0x8] sm:$0xff]  ;;  %v50_v45 = vcombine.high %v42_v43, %v42_v43  ;;  %v58_v52 = vrot.slane %v42_v43, %v41_v40  ;;  %v49_v54 = vrot.slane %v35_v46, %v41_v40 }
   0xe   :  { %4405 = vmatprep.subr.bf16.mxu0 %v4404_v20  ;;  %v4925_v26 = vld [vmem:[#allocation2] sm:$0xff] }
   0xf   :  { %4082 = vmatprep.mubr.msk.f32.mxu1 %vm240_vm1, %v4925_v26  ;;  %v72_v53 = vrot.slane %v50_v45, %v41_v40  ;;  %v80_v59 = vcombine.high %v58_v52, %v58_v52  ;;  %v51_v1 = vcombine.high %v49_v54, %v49_v54  ;;  %v4983_v4 = vrot.slane %v58_v52, %v576_v58 }
  0x10   :  { %4069 = vmatmul.mubr.msk.f32.vlgmr.msra.gmra.mrb[0].mxu0 %vm140_vm0, %v133_v23  ;;  %4083 = vmatmul.mubr.msk.f32.vlgmr.msra.gmra.mrb[0].mxu1 %vm240_vm1, %v4930_v27  ;;  %v65_v10 = vrot.slane %v49_v54, %v41_v40 }
  0x11   :  { %4407 = vmatpush3.bf16.msra.mxu0 %v4404_v20  ;;  %4071 = vmatprep.mubr.msk.f32.mxu0 %vm140_vm0, %v134_v24  ;;  %v82_v60 = vcombine.high %v72_v53, %v72_v53  ;;  %v4985_v5 = vrot.slane %v72_v53, %v576_v58  ;;  %v4987_v6 = vrot.slane %v80_v59, %v576_v58 }
  0x12   :  { %4409 = vmatprep.subr.bf16.mxu0 %v4408_v25  ;;  %v79_v11 = vrot.slane %v51_v1, %v41_v40  ;;  %v5011_v22 = vrot.slane %v65_v10, %v576_v58 }
  0x13   :  { %v4989_v7 = vrot.slane %v82_v60, %v576_v58 }
  0x14   :  { %4072 = vmatmul.mubr.msk.f32.gmra.mrb[2].mxu0 %vm140_vm0, %v135_v28  ;;  %v5013_v23 = vrot.slane %v79_v11, %v576_v58  ;;  %v83_v33 = vcombine.high %v79_v11, %v79_v11 }
  0x15   :  { %4411 = vmatpush3.bf16.msra.mxu0 %v4408_v25  ;;  %4099 = vmatprep.mubr.msk.f32.mxu0 %vm240_vm1, %v4939_v29  ;;  %v81_v25 = vcombine.high %v65_v10, %v65_v10 }
  0x16   :  { %v5033_v37 = vrot.slane %v83_v33, %v576_v58  ;;  %v6231_v33 = vmov 1.0|1.0  }
  0x17   :  { %v5031_v36 = vrot.slane %v81_v25, %v576_v58  ;;  %v264_v58 = vld [vmem:[%s6222_s3 + $0x48] sm:$0xff] }
  0x18   :  { %4100 = vmatmul.mubr.msk.f32.vlgmr.msra.gmra.mrb[4].mxu0 %vm240_vm1, %v4947_v30 }
  0xe3   :  { %v4070_v47 = vpop.f32.mrb[0].mxu0  ;;  %v4971_v55 = vpop.f32.mrb[0].mxu1 }
  0xe4   :  { %v225_v48 = vadd.f32 %v4070_v47, %v3505_v44  ;;  %v219_v49 = vpop.f32.mrb[1].mxu0  ;;  %v381_v56 = vpop.f32.mrb[1].mxu1 }
  0xe5   :  { %v220_v51 = vadd.f32 %v3505_v44, %v219_v49  ;;  %v382_v61 = vadd.f32 %v4969_v50, %v381_v56  ;;  %v387_v56 = vadd.f32 %v4971_v55, %v4969_v50 }
  0xe6   :  { %244 = vst.msk [vmem:[#allocation2 + $0x18] sm:$0xff] %vm240_vm1, %v225_v48 }
  0xe7   :  { %243 = vst.msk [vmem:[#allocation2 + $0x10] sm:$0xff] %vm240_vm1, %v220_v51  ;;  %v4073_v57 = vpop.f32.mrb[2].mxu0  ;;  %4145 = vmatprep.mubr.msk.f32.mxu0 %vm240_vm1, %v382_v61 }
  0xe8   :  { %v235_v62 = vadd.f32 %v4073_v57, %v3505_v44  ;;  %v229_v63 = vpop.f32.mrb[3].mxu0  ;;  %v263_v57 = vld [vmem:[%s6222_s3 + $0x40] sm:$0xff] }
  0xe9   :  { %v230_v0 = vadd.f32 %v3505_v44, %v229_v63  ;;  %v4412_v59 = vpack.c.bf16 %v264_v58, %v263_v57 }
  0xea   :  { %246 = vst.msk [vmem:[#allocation2 + $0x28] sm:$0xff] %vm240_vm1, %v235_v62 }
  0xeb   :  { %245 = vst.msk [vmem:[#allocation2 + $0x20] sm:$0xff] %vm240_vm1, %v230_v0  ;;  %v4101_v3 = vpop.f32.mrb[4].mxu0  ;;  %4413 = vmatprep.subr.bf16.mxu1 %v4412_v59 }
  0xec   :  { %v486_v8 = vpop.f32.mrb[5].mxu0  ;;  %v492_v40 = vadd.f32 %v4101_v3, %v3517_v2  ;;  %4415 = vmatpush3.bf16.msra.mxu1 %v4412_v59  ;;  %v3520_v59 = vld [vmem:[%s6226_s4 + $0x3] ss:$0 sm:$0xff] }
  0xed   :  { %v487_v9 = vadd.f32 %v3517_v2, %v486_v8  ;;  %v4995_v13 = vld [vmem:[#allocation2 + $0x18] sm:$0xff] }
  0xee   :  { %v4991_v12 = vld [vmem:[#allocation2 + $0x10] sm:$0xff]  ;;  %v623_v43 = vmul.f32 %v4985_v5, %v492_v40  ;;  %v624_v45 = vmul.f32 %v4987_v6, %v492_v40  ;;  %v625_v46 = vmul.f32 %v4989_v7, %v492_v40  ;;  %v626_v48 = vmul.f32 %v5011_v22, %v492_v40 }
  0xef   :  { %4085 = vmatprep.mubr.msk.f32.mxu1 %vm240_vm1, %v4991_v12  ;;  %v614_v14 = vmul.f32 %v4983_v4, %v487_v9  ;;  %v615_v15 = vmul.f32 %v4985_v5, %v487_v9  ;;  %v616_v16 = vmul.f32 %v4987_v6, %v487_v9  ;;  %v617_v17 = vmul.f32 %v4989_v7, %v487_v9 }
  0xf0   :  { %4086 = vmatmul.mubr.msk.f32.gmra.mrb[2].mxu1 %vm240_vm1, %v4995_v13  ;;  %v618_v28 = vmul.f32 %v5011_v22, %v487_v9  ;;  %v619_v31 = vmul.f32 %v5013_v23, %v487_v9  ;;  %v620_v38 = vmul.f32 %v5031_v36, %v487_v9  ;;  %v621_v39 = vmul.f32 %v5033_v37, %v487_v9 }
  0xf1   :  { %v4420_v19 = vpack.c.bf16 %v615_v15, %v614_v14  ;;  %v5009_v20 = vld [vmem:[#allocation2 + $0x28] sm:$0xff]  ;;  %v4426_v21 = vpack.c.bf16 %v617_v17, %v616_v16  ;;  %v4450_v47 = vpack.c.bf16 %v625_v46, %v624_v45  ;;  %v627_v49 = vmul.f32 %v5013_v23, %v492_v40  ;;  %v266_v15 = vld [vmem:[%s6222_s3 + $0x58] sm:$0xff] }
  0xf2   :  { %v5015_v24 = vld [vmem:[#allocation2 + $0x20] sm:$0xff]  ;;  %v4432_v35 = vpack.c.bf16 %v619_v31, %v618_v28  ;;  %v4438_v42 = vpack.c.bf16 %v621_v39, %v620_v38  ;;  %v628_v52 = vmul.f32 %v5031_v36, %v492_v40  ;;  %v629_v53 = vmul.f32 %v5033_v37, %v492_v40 }
  0xf3   :  { %4088 = vmatprep.mubr.msk.f32.mxu1 %vm240_vm1, %v5015_v24  ;;  %4422 = vmatprep.subr.msk.bf16.mxu0 %vm5005_vm5, %v4420_v19  ;;  %v4456_v51 = vpack.c.bf16 %v627_v49, %v626_v48  ;;  %v5100_v17 = vadd.s32 8, %v4953_v32 }
  0xf4   :  { %4089 = vmatmul.mubr.msk.f32.gmra.mrb[4].mxu1 %vm240_vm1, %v5009_v20  ;;  %4425 = vmatpush3.bf16.xpose.msk.msra.mxu0 %vm5005_vm5, %v4420_v19  ;;  %v4462_v54 = vpack.c.bf16 %v629_v53, %v628_v52  ;;  %v857_v19 = vmul.u32 8, %v4953_v32 }
  0xf5   :  { %4428 = vmatprep.subr.msk.bf16.mxu0 %vm5005_vm5, %v4426_v21  ;;  %4110 = vmatprep.mubr.msk.f32.mxu1 %vm240_vm1, %v4939_v29  ;;  %v622_v29 = vmul.f32 %v4983_v4, %v492_v40 }
  0xf6   :  { %v861_v25 = vadd.s32 8, %v857_v19  ;;  %vm859_vm7 = vcmp.ge.s32.totalorder %v4956_v34, %v857_v19 }
  0xf7   :  { %v4444_v44 = vpack.c.bf16 %v623_v43, %v622_v29 }
  0xf8   :  { %vm863_vm9 = vcmp.lt.s32.totalorder %v4956_v34, %v861_v25 }
  0xf9   :  { %vm865_vm11 = vmand %vm859_vm7, %vm863_vm9 }
  0xfc   :  { %4431 = vmatpush3.bf16.xpose.msk.msra.mxu0 %vm5005_vm5, %v4426_v21  ;;  %v858_v21 = vmul.u32 8, %v5100_v17 }
  0xfd   :  { %4434 = vmatprep.subr.msk.bf16.mxu0 %vm5005_vm5, %v4432_v35 }
  0xfe   :  { %v862_v28 = vadd.s32 8, %v858_v21  ;;  %vm860_vm8 = vcmp.ge.s32.totalorder %v4956_v34, %v858_v21 }
 0x100   :  { %vm864_vm10 = vcmp.lt.s32.totalorder %v4956_v34, %v862_v28 }
 0x101   :  { %vm866_vm12 = vmand %vm860_vm8, %vm864_vm10 }
 0x102   :  { %vm5110_vm13 = vmpackc.low %vm866_vm12, %vm865_vm11 }
 0x104   :  { %4437 = vmatpush3.bf16.xpose.msk.msra.mxu0 %vm5005_vm5, %v4432_v35 }
 0x105   :  { %4440 = vmatprep.subr.msk.bf16.mxu0 %vm5005_vm5, %v4438_v42 }
 0x10c   :  { %4443 = vmatpush3.bf16.xpose.msk.msra.mxu0 %vm5005_vm5, %v4438_v42 }
 0x10d   :  { %4446 = vmatprep.subr.msk.bf16.mxu0 %vm5005_vm5, %v4444_v44 }
 0x114   :  { %4449 = vmatpush3.bf16.xpose.msk.msra.mxu0 %vm5005_vm5, %v4444_v44 }
 0x115   :  { %4452 = vmatprep.subr.msk.bf16.mxu0 %vm5005_vm5, %v4450_v47 }
 0x11c   :  { %4455 = vmatpush3.bf16.xpose.msk.msra.mxu0 %vm5005_vm5, %v4450_v47 }
 0x11d   :  { %4458 = vmatprep.subr.msk.bf16.mxu0 %vm5005_vm5, %v4456_v51 }
 0x124   :  { %4461 = vmatpush3.bf16.xpose.msk.msra.mxu0 %vm5005_vm5, %v4456_v51 }
 0x125   :  { %4464 = vmatprep.subr.msk.bf16.mxu0 %vm5005_vm5, %v4462_v54 }
 0x12c   :  { %4467 = vmatpush3.bf16.xpose.msk.msra.mxu0 %vm5005_vm5, %v4462_v54 }
 0x133   :  { %4146 = vmatmul.mubr.msk.f32.vlgmr.msra.gmra.mrb[6].mxu0 %vm240_vm1, %v387_v56 }
 0x1c3   :  { %v4087_v60 = vpop.f32.mrb[2].mxu1 }
 0x1c4   :  { %v391_v61 = vpop.f32.mrb[3].mxu1  ;;  %v397_v63 = vadd.f32 %v4087_v60, %v4969_v50 }
 0x1c5   :  { %v392_v62 = vadd.f32 %v4969_v50, %v391_v61 }
 0x1c7   :  { %v4090_v55 = vpop.f32.mrb[4].mxu1  ;;  %4148 = vmatprep.mubr.msk.f32.mxu0 %vm240_vm1, %v392_v62 }
 0x1c8   :  { %v407_v0 = vadd.f32 %v4090_v55, %v4969_v50  ;;  %v401_v1 = vpop.f32.mrb[5].mxu1  ;;  %4149 = vmatmul.mubr.msk.f32.gmra.mrb[8].mxu0 %vm240_vm1, %v397_v63 }
 0x1c9   :  { %v402_v2 = vadd.f32 %v4969_v50, %v401_v1  ;;  %v265_v50 = vld [vmem:[%s6222_s3 + $0x50] sm:$0xff] }
 0x1ca   :  { %v4416_v16 = vpack.c.bf16 %v266_v15, %v265_v50 }
 0x1cb   :  { %4151 = vmatprep.mubr.msk.f32.mxu0 %vm240_vm1, %v402_v2 }
 0x1cc   :  { %4152 = vmatmul.mubr.msk.f32.gmra.mrb[10].mxu0 %vm240_vm1, %v407_v0  ;;  %4417 = vmatprep.subr.bf16.mxu1 %v4416_v16 }
 0x1cd   :  { %4419 = vmatpush3.bf16.msra.mxu1 %v4416_v16 }
 0x1ce   :  { %4469 = vmatprep.subr.msk.bf16.mxu1 %vm5110_vm13, %v6231_v33 }
 0x1d0   :  { %4111 = vmatmul.mubr.msk.f32.vlgmr.msra.gmra.mrb[6].mxu1 %vm240_vm1, %v4947_v30 }
 0x1d6   :  { %4471 = vmatpush3.bf16.xpose.msk.msra.mxu1 %vm5110_vm13, %v6231_v33 }
 0x1d7   :  { %4473 = vmatprep.subr.msk.bf16.mxu1 %vm5110_vm13, %v6231_v33 }
 0x206   :  { %v4147_v3 = vpop.f32.mrb[6].mxu0 }
 0x207   :  { %v778_v8 = vpop.f32.mrb[7].mxu0  ;;  %v808_v9 = vmul.f32 0.5, %v4147_v3 }
 0x208   :  { %v807_v10 = vmul.f32 0.5, %v778_v8 }
 0x209   :  { %v822_v14 = vsel %vm813_vm6, %v808_v9, -1e+30 }
 0x20a   :  { %v3723_v11 = vsel %vm813_vm6, -1e+30, %v807_v10 }
 0x20b   :  { %827 = vmax.xlane.f32.xlu0 %v3723_v11 }
 0x20f   :  { %829 = vmax.xlane.f32.xlu0 %v822_v14 }
 0x298   :  { %v828_v30 = vpop.xlane.xlu0 %827 }
 0x299   :  { %v839_v35 = vsub.f32 %v3723_v11, %v828_v30 }
 0x29b   :  { %v845_v38 = vmul.f32 1.442695, %v839_v35  ;;  %v4150_v39 = vpop.f32.mrb[8].mxu0 }
 0x29c   :  { %v830_v40 = vpop.xlane.xlu0 %829  ;;  %v788_v42 = vpop.f32.mrb[9].mxu0  ;;  %v810_v44 = vmul.f32 0.5, %v4150_v39 }
 0x29d   :  { %4719 = vpow2.f32 %v845_v38  ;;  %v840_v29 = vsub.f32 %v822_v14, %v830_v40  ;;  %v809_v43 = vmul.f32 0.5, %v788_v42 }
 0x29e   :  { %v3725_v52 = vsel %vm813_vm6, -1e+30, %v810_v44 }
 0x29f   :  { %v847_v45 = vmul.f32 1.442695, %v840_v29  ;;  %v4153_v46 = vpop.f32.mrb[10].mxu0  ;;  %v3724_v47 = vsel %vm813_vm6, -1e+30, %v809_v43 }
 0x2a0   :  { %831 = vmax.xlane.f32.xlu1 %v3724_v47  ;;  %v798_v48 = vpop.f32.mrb[11].mxu0  ;;  %v812_v51 = vmul.f32 0.5, %v4153_v46 }
 0x2a1   :  { %4721 = vpow2.f32 %v847_v45  ;;  %v811_v49 = vmul.f32 0.5, %v798_v48 }
 0x2a2   :  { %v826_v56 = vsel %vm813_vm6, %v812_v51, -1e+30 }
 0x2a3   :  { %v825_v53 = vsel %vm813_vm6, %v811_v49, -1e+30  ;;  %v4112_v58 = vpop.f32.mrb[6].mxu1 }
 0x2a4   :  { %833 = vmax.xlane.f32.xlu1 %v3725_v52  ;;  %835 = vmax.xlane.f32.xlu0 %v825_v53  ;;  %v5143_v60 = vadd.f32 %v4112_v58, %v3520_v59  ;;  %v565_v61 = vpop.f32.mrb[7].mxu1 }
 0x2a5   :  { %v566_v62 = vadd.f32 %v3520_v59, %v565_v61 }
 0x2a6   :  { %v640_v58 = vmul.f32 %v4987_v6, %v5143_v60  ;;  %v641_v59 = vmul.f32 %v4989_v7, %v5143_v60 }
 0x2a7   :  { %v5129_v54 = vpop.eup %4719  ;;  %v630_v63 = vmul.f32 %v4983_v4, %v566_v62  ;;  %v631_v55 = vmul.f32 %v4985_v5, %v566_v62  ;;  %v632_v40 = vmul.f32 %v4987_v6, %v566_v62  ;;  %v633_v42 = vmul.f32 %v4989_v7, %v566_v62 }
 0x2a8   :  { %4158 = vmatprep.mubr.f32.mxu1 %v5129_v54  ;;  %837 = vmax.xlane.f32.xlu1 %v826_v56  ;;  %v634_v44 = vmul.f32 %v5011_v22, %v566_v62  ;;  %v635_v45 = vmul.f32 %v5013_v23, %v566_v62  ;;  %v636_v48 = vmul.f32 %v5031_v36, %v566_v62 }
 0x2a9   :  { %v4476_v0 = vpack.c.bf16 %v631_v55, %v630_v63  ;;  %v4480_v43 = vpack.c.bf16 %v633_v42, %v632_v40  ;;  %v637_v49 = vmul.f32 %v5033_v37, %v566_v62  ;;  %v4496_v61 = vpack.c.bf16 %v641_v59, %v640_v58  ;;  %v267_v42 = vld [vmem:[%s6222_s3 + $0x60] sm:$0xff] }
 0x2aa   :  { %v642_v62 = vmul.f32 %v5011_v22, %v5143_v60  ;;  %v643_v63 = vmul.f32 %v5013_v23, %v5143_v60 }
 0x2ab   :  { %v5134_v57 = vpop.eup %4721  ;;  %v4488_v51 = vpack.c.bf16 %v637_v49, %v636_v48 }
 0x2ac   :  { %4159 = vmatmul.mubr.f32.vlgmr.msra.gmra.mrb[8].mxu1 %v5134_v57  ;;  %v4500_v55 = vpack.c.bf16 %v643_v63, %v642_v62 }
 0x2ad   :  { %4475 = vmatpush3.bf16.msk.msra.mxu1 %vm5110_vm13, %v6231_v33 }
 0x2ae   :  { %4477 = vmatprep.subr.bf16.mxu1 %v4476_v0 }
 0x32d   :  { %v832_v1 = vpop.xlane.xlu1 %831 }
 0x32e   :  { %v841_v2 = vsub.f32 %v3724_v47, %v832_v1  ;;  %v4484_v47 = vpack.c.bf16 %v635_v45, %v634_v44  ;;  %v645_v1 = vmul.f32 %v5033_v37, %v5143_v60 }
 0x330   :  { %v849_v3 = vmul.f32 1.442695, %v841_v2 }
 0x331   :  { %v834_v8 = vpop.xlane.xlu1 %833  ;;  %v836_v9 = vpop.xlane.xlu0 %835 }
 0x332   :  { %4723 = vpow2.f32 %v849_v3  ;;  %v842_v10 = vsub.f32 %v3725_v52, %v834_v8  ;;  %v843_v11 = vsub.f32 %v825_v53, %v836_v9  ;;  %v638_v52 = vmul.f32 %v4983_v4, %v5143_v60 }
 0x333   :  { %v639_v53 = vmul.f32 %v4985_v5, %v5143_v60 }
 0x334   :  { %v851_v14 = vmul.f32 1.442695, %v842_v10  ;;  %v853_v50 = vmul.f32 1.442695, %v843_v11 }
 0x335   :  { %v838_v15 = vpop.xlane.xlu1 %837 }
 0x336   :  { %4725 = vpow2.f32 %v851_v14  ;;  %v844_v16 = vsub.f32 %v826_v56, %v838_v15  ;;  %v4492_v56 = vpack.c.bf16 %v639_v53, %v638_v52 }
 0x337   :  { %4727 = vpow2.f32 %v853_v50 }
 0x338   :  { %v855_v19 = vmul.f32 1.442695, %v844_v16 }
 0x33a   :  { %4729 = vpow2.f32 %v855_v19 }
 0x33c   :  { %v5147_v21 = vpop.eup %4723 }
 0x33d   :  { %4161 = vmatprep.mubr.f32.mxu1 %v5147_v21 }
 0x340   :  { %v5150_v25 = vpop.eup %4725 }
 0x341   :  { %v5152_v28 = vpop.eup %4727  ;;  %4162 = vmatmul.mubr.f32.gmra.mrb[10].mxu1 %v5150_v25 }
 0x342   :  { %4164 = vmatprep.mubr.f32.mxu1 %v5152_v28 }
 0x344   :  { %v5156_v31 = vpop.eup %4729 }
 0x345   :  { %4165 = vmatmul.mubr.f32.gmra.mrb[12].mxu1 %v5156_v31 }
 0x37f   :  { %v4160_v30 = vpop.f32.mrb[8].mxu1 }
 0x380   :  { %v943_v35 = vadd.f32 1e-30, %v4160_v30  ;;  %v937_v38 = vpop.f32.mrb[9].mxu1 }
 0x381   :  { %v938_v39 = vadd.f32 1e-30, %v937_v38 }
 0x383   :  { %4731 = vrcp.f32 %v938_v39 }
 0x384   :  { %4733 = vrcp.f32 %v943_v35 }
 0x38d   :  { %v4732_v29 = vpop.eup %4731 }
 0x38e   :  { %v4734_v46 = vpop.eup %4733  ;;  %4171 = vmatprep.mubr.msk.f32.mxu1 %vm972_vm14, %v4732_v29  ;;  %v268_v29 = vld [vmem:[%s6222_s3 + $0x68] sm:$0xff] }
 0x38f   :  { %4172 = vmatmul.mubr.msk.f32.vlgmr.msra.gmra.mrb[14].mxu1 %vm972_vm14, %v4734_v46  ;;  %v4508_v44 = vpack.c.bf16 %v268_v29, %v267_v42 }
 0x390   :  { %4479 = vmatpush3.bf16.msra.mxu1 %v4476_v0  ;;  %v644_v0 = vmul.f32 %v5031_v36, %v5143_v60 }
 0x391   :  { %4481 = vmatprep.subr.bf16.mxu1 %v4480_v43 }
 0x392   :  { %v4504_v2 = vpack.c.bf16 %v645_v1, %v644_v0 }
 0x394   :  { %4483 = vmatpush3.bf16.msra.mxu1 %v4480_v43  ;;  %v269_v43 = vld [vmem:[%s6222_s3 + $0x70] sm:$0xff] }
 0x395   :  { %4485 = vmatprep.subr.bf16.mxu1 %v4484_v47 }
 0x398   :  { %4487 = vmatpush3.bf16.msra.mxu1 %v4484_v47 }
 0x399   :  { %4489 = vmatprep.subr.bf16.mxu1 %v4488_v51 }
 0x39c   :  { %4491 = vmatpush3.bf16.msra.mxu1 %v4488_v51 }
 0x39d   :  { %4493 = vmatprep.subr.bf16.mxu1 %v4492_v56 }
 0x3a0   :  { %4495 = vmatpush3.bf16.msra.mxu1 %v4492_v56 }
 0x3a1   :  { %4497 = vmatprep.subr.bf16.mxu1 %v4496_v61 }
 0x3a4   :  { %4499 = vmatpush3.bf16.msra.mxu1 %v4496_v61 }
 0x3a5   :  { %4501 = vmatprep.subr.bf16.mxu1 %v4500_v55 }
 0x3a8   :  { %4503 = vmatpush3.bf16.msra.mxu1 %v4500_v55 }
 0x3a9   :  { %4505 = vmatprep.subr.bf16.mxu1 %v4504_v2 }
 0x3ac   :  { %4507 = vmatpush3.bf16.msra.mxu1 %v4504_v2 }
 0x3ad   :  { %4509 = vmatprep.subr.bf16.mxu1 %v4508_v44 }
 0x414   :  { %v4163_v3 = vpop.f32.mrb[10].mxu1 }
 0x415   :  { %v953_v8 = vadd.f32 1e-30, %v4163_v3  ;;  %v947_v9 = vpop.f32.mrb[11].mxu1 }
 0x416   :  { %v948_v10 = vadd.f32 1e-30, %v947_v9 }
 0x418   :  { %4735 = vrcp.f32 %v948_v10  ;;  %v4166_v11 = vpop.f32.mrb[12].mxu1 }
 0x419   :  { %4737 = vrcp.f32 %v953_v8  ;;  %v963_v14 = vadd.f32 1e-30, %v4166_v11  ;;  %v957_v50 = vpop.f32.mrb[13].mxu1 }
 0x41a   :  { %v958_v15 = vadd.f32 1e-30, %v957_v50 }
 0x41c   :  { %4739 = vrcp.f32 %v958_v15 }
 0x41d   :  { %4741 = vrcp.f32 %v963_v14 }
 0x422   :  { %v4736_v16 = vpop.eup %4735 }
 0x423   :  { %v4738_v60 = vpop.eup %4737  ;;  %4174 = vmatprep.mubr.msk.f32.mxu1 %vm972_vm14, %v4736_v16 }
 0x424   :  { %4175 = vmatmul.mubr.msk.f32.gmra.mrb[16].mxu1 %vm972_vm14, %v4738_v60 }
 0x426   :  { %v4740_v19 = vpop.eup %4739 }
 0x427   :  { %v4742_v30 = vpop.eup %4741  ;;  %4177 = vmatprep.mubr.msk.f32.mxu1 %vm972_vm14, %v4740_v19 }
 0x428   :  { %4178 = vmatmul.mubr.msk.f32.gmra.mrb[18].mxu1 %vm972_vm14, %v4742_v30 }
 0x462   :  { %v4173_v35 = vpop.f32.mrb[14].mxu1 }
 0x463   :  { %v1057_v38 = vpop.f32.mrb[15].mxu1  ;;  %v1087_v40 = vmul.f32 %v5134_v57, %v4173_v35 }
 0x464   :  { %v1086_v39 = vmul.f32 %v5129_v54, %v1057_v38  ;;  %v270_v54 = vld [vmem:[%s6222_s3 + $0x78] sm:$0xff] }
 0x465   :  { %v4512_v57 = vpack.c.bf16 %v270_v54, %v269_v43 }
 0x466   :  { %4212 = vmatprep.mubr.f32.mxu1 %v1086_v39 }
 0x467   :  { %4213 = vmatmul.mubr.f32.vlgmr.msra.gmra.mrb[20].mxu1 %v1087_v40 }
 0x468   :  { %4511 = vmatpush3.bf16.msra.mxu1 %v4508_v44 }
 0x469   :  { %4513 = vmatprep.subr.bf16.mxu1 %v4512_v57 }
 0x46c   :  { %4515 = vmatpush3.bf16.msra.mxu1 %v4512_v57 }
 0x4f7   :  { %v4176_v45 = vpop.f32.mrb[16].mxu1 }
 0x4f8   :  { %v1067_v46 = vpop.f32.mrb[17].mxu1  ;;  %v1089_v48 = vmul.f32 %v5150_v25, %v4176_v45 }
 0x4f9   :  { %v1088_v47 = vmul.f32 %v5147_v21, %v1067_v46 }
 0x4fb   :  { %v4179_v49 = vpop.f32.mrb[18].mxu1  ;;  %4215 = vmatprep.mubr.f32.mxu1 %v1088_v47  ;;  %v273_v47 = vld [vmem:[%s6222_s3 + $0x90] sm:$0xff] }
 0x4fc   :  { %v1077_v51 = vpop.f32.mrb[19].mxu1  ;;  %4216 = vmatmul.mubr.f32.gmra.mrb[22].mxu1 %v1089_v48  ;;  %v1091_v53 = vmul.f32 %v5156_v31, %v4179_v49  ;;  %v274_v48 = vld [vmem:[%s6222_s3 + $0x98] sm:$0xff] }
 0x4fd   :  { %v1090_v52 = vmul.f32 %v5152_v28, %v1077_v51  ;;  %v3563_v28 = vld [vmem:[%s6226_s4 + $0x4] ss:$0 sm:$0xff]  ;;  %v4520_v49 = vpack.c.bf16 %v274_v48, %v273_v47 }
 0x4ff   :  { %4218 = vmatprep.mubr.f32.mxu1 %v1090_v52 }
 0x500   :  { %4219 = vmatmul.mubr.f32.gmra.mrb[24].mxu1 %v1091_v53 }
 0x53a   :  { %v4214_v56 = vpop.f32.mrb[20].mxu1 }
 0x53b   :  { %v1158_v58 = vpop.f32.mrb[21].mxu1 }
 0x53c   :  { %4229 = vmatprep.mubr.msk.f32.mxu1 %vm240_vm1, %v1158_v58 }
 0x53d   :  { %4230 = vmatmul.mubr.msk.f32.vlgmr.msra.gmra.mrb[26].mxu1 %vm240_vm1, %v4214_v56 }
 0x5cf   :  { %v4217_v59 = vpop.f32.mrb[22].mxu1 }
 0x5d0   :  { %v1168_v21 = vpop.f32.mrb[23].mxu1 }
 0x5d1   :  { %4232 = vmatprep.mubr.msk.f32.mxu1 %vm240_vm1, %v1168_v21 }
 0x5d2   :  { %4233 = vmatmul.mubr.msk.f32.gmra.mrb[28].mxu1 %vm240_vm1, %v4217_v59 }
 0x5d3   :  { %v4220_v25 = vpop.f32.mrb[24].mxu1 }
 0x5d4   :  { %v1178_v61 = vpop.f32.mrb[25].mxu1 }
 0x5d5   :  { %4235 = vmatprep.mubr.msk.f32.mxu1 %vm240_vm1, %v1178_v61 }
 0x5d6   :  { %4236 = vmatmul.mubr.msk.f32.gmra.mrb[30].mxu1 %vm240_vm1, %v4220_v25 }
 0x610   :  { %v4231_v31 = vpop.f32.mrb[26].mxu1 }
 0x611   :  { %v1281_v62 = vadd.f32 %v4231_v31, %v3563_v28  ;;  %v1275_v63 = vpop.f32.mrb[27].mxu1 }
 0x612   :  { %v1276_v55 = vadd.f32 %v3563_v28, %v1275_v63 }
 0x613   :  { %v1305_v0 = vadd.f32 %v1281_v62, %v4930_v27 }
 0x614   :  { %v1304_v1 = vadd.f32 %v1276_v55, %v4925_v26 }
 0x615   :  { %v1313_v2 = vsel %vm240_vm1, %v1305_v0, 0.0 }
 0x616   :  { %1314 = vadd.xlane.f32.xlu1 %v1313_v2  ;;  %v1310_v3 = vsel %vm240_vm1, %v1304_v1, 0.0 }
 0x617   :  { %1311 = vadd.xlane.f32.xlu0 %v1310_v3 }
 0x6a3   :  { %v1315_v8 = vpop.xlane.xlu1 %1314 }
 0x6a4   :  { %v1312_v9 = vpop.xlane.xlu0 %1311  ;;  %v1330_v11 = vmul.f32 0.03125, %v1315_v8 }
 0x6a5   :  { %v4234_v10 = vpop.f32.mrb[28].mxu1  ;;  %v1329_v15 = vmul.f32 0.03125, %v1312_v9 }
 0x6a6   :  { %v1291_v14 = vadd.f32 %v4234_v10, %v3563_v28  ;;  %v1285_v50 = vpop.f32.mrb[29].mxu1  ;;  %v5220_v26 = vsub.f32 %v1305_v0, %v1330_v11 }
 0x6a7   :  { %v1286_v16 = vadd.f32 %v3563_v28, %v1285_v50  ;;  %v5223_v39 = vsub.f32 %v1304_v1, %v1329_v15 }
 0x6a8   :  { %v1307_v60 = vadd.f32 %v1291_v14, %v4995_v13 }
 0x6a9   :  { %v4237_v19 = vpop.f32.mrb[30].mxu1  ;;  %v1306_v27 = vadd.f32 %v1286_v16, %v4991_v12  ;;  %v1342_v12 = vmul.f32 %v5220_v26, %v5220_v26  ;;  %v1341_v54 = vmul.f32 %v5223_v39, %v5223_v39 }
 0x6aa   :  { %v1301_v30 = vadd.f32 %v4237_v19, %v3563_v28  ;;  %v1295_v35 = vpop.f32.mrb[31].mxu1  ;;  %v1319_v38 = vsel %vm240_vm1, %v1307_v60, 0.0  ;;  %v3570_v19 = vld [vmem:[%s6226_s4 + $0x5] ss:$0 sm:$0xff] }
 0x6ab   :  { %v1296_v40 = vadd.f32 %v3563_v28, %v1295_v35  ;;  %1320 = vadd.xlane.f32.xlu1 %v1319_v38  ;;  %v1316_v42 = vsel %vm240_vm1, %v1306_v27, 0.0  ;;  %v1350_v57 = vsel %vm240_vm1, %v1342_v12, 0.0  ;;  %v1347_v45 = vsel %vm240_vm1, %v1341_v54, 0.0  ;;  %v3571_v38 = vld [vmem:[%s6226_s4 + $0x6] ss:$0 sm:$0xff] }
 0x6ac   :  { %1317 = vadd.xlane.f32.xlu0 %v1316_v42  ;;  %v1309_v29 = vadd.f32 %v1301_v30, %v5009_v20  ;;  %v271_v20 = vld [vmem:[%s6222_s3 + $0x80] sm:$0xff] }
 0x6ad   :  { %v1308_v13 = vadd.f32 %v1296_v40, %v5015_v24  ;;  %v272_v24 = vld [vmem:[%s6222_s3 + $0x88] sm:$0xff] }
 0x6ae   :  { %v1325_v43 = vsel %vm240_vm1, %v1309_v29, 0.0  ;;  %v4516_v46 = vpack.c.bf16 %v272_v24, %v271_v20  ;;  %v281_v24 = vld [vmem:[%s6222_s3 + $0xd0] sm:$0xff] }
 0x6af   :  { %1326 = vadd.xlane.f32.xlu1 %v1325_v43  ;;  %v1322_v44 = vsel %vm240_vm1, %v1308_v13, 0.0  ;;  %v277_v43 = vld [vmem:[%s6222_s3 + $0xb0] sm:$0xff] }
 0x6b0   :  { %1323 = vadd.xlane.f32.xlu0 %v1322_v44  ;;  %4517 = vmatprep.subr.bf16.mxu0 %v4516_v46  ;;  %v278_v44 = vld [vmem:[%s6222_s3 + $0xb8] sm:$0xff] }
 0x6b1   :  { %4519 = vmatpush3.bf16.msra.mxu0 %v4516_v46  ;;  %v4528_v54 = vpack.c.bf16 %v278_v44, %v277_v43  ;;  %v282_v46 = vld [vmem:[%s6222_s3 + $0xd8] sm:$0xff] }
 0x6b2   :  { %4521 = vmatprep.subr.bf16.mxu0 %v4520_v49  ;;  %v4536_v47 = vpack.c.bf16 %v282_v46, %v281_v24 }
 0x6b3   :  { %1351 = vadd.xlane.f32.xlu1 %v1350_v57  ;;  %v279_v57 = vld [vmem:[%s6222_s3 + $0xc0] sm:$0xff] }
 0x6b4   :  { %1348 = vadd.xlane.f32.xlu0 %v1347_v45  ;;  %v280_v45 = vld [vmem:[%s6222_s3 + $0xc8] sm:$0xff] }
 0x6b5   :  { %4523 = vmatpush3.bf16.msra.mxu0 %v4520_v49  ;;  %v4532_v20 = vpack.c.bf16 %v280_v45, %v279_v57 }
 0x738   :  { %v1321_v51 = vpop.xlane.xlu1 %1320 }
 0x739   :  { %v1332_v52 = vmul.f32 0.03125, %v1321_v51  ;;  %v1318_v53 = vpop.xlane.xlu0 %1317 }
 0x73a   :  { %v1331_v56 = vmul.f32 0.03125, %v1318_v53 }
 0x73b   :  { %v5248_v58 = vsub.f32 %v1307_v60, %v1332_v52 }
 0x73c   :  { %v5250_v59 = vsub.f32 %v1306_v27, %v1331_v56  ;;  %v1327_v21 = vpop.xlane.xlu1 %1326 }
 0x73d   :  { %v1334_v25 = vmul.f32 0.03125, %v1327_v21  ;;  %v1324_v61 = vpop.xlane.xlu0 %1323  ;;  %v1344_v28 = vmul.f32 %v5248_v58, %v5248_v58 }
 0x73e   :  { %v1333_v31 = vmul.f32 0.03125, %v1324_v61  ;;  %v1343_v62 = vmul.f32 %v5250_v59, %v5250_v59 }
 0x73f   :  { %v5256_v63 = vsub.f32 %v1309_v29, %v1334_v25  ;;  %v1356_v55 = vsel %vm240_vm1, %v1344_v28, 0.0 }
 0x740   :  { %v5259_v0 = vsub.f32 %v1308_v13, %v1333_v31  ;;  %1357 = vadd.xlane.f32.xlu1 %v1356_v55  ;;  %v1352_v1 = vpop.xlane.xlu1 %1351  ;;  %v1353_v2 = vsel %vm240_vm1, %v1343_v62, 0.0 }
 0x741   :  { %v1366_v3 = vmul.f32 0.03125, %v1352_v1  ;;  %1354 = vadd.xlane.f32.xlu0 %v1353_v2  ;;  %v1349_v8 = vpop.xlane.xlu0 %1348  ;;  %v1346_v9 = vmul.f32 %v5256_v63, %v5256_v63 }
 0x742   :  { %v1365_v10 = vmul.f32 0.03125, %v1349_v8  ;;  %v1345_v11 = vmul.f32 %v5259_v0, %v5259_v0 }
 0x743   :  { %v1372_v14 = vadd.f32 1e-05, %v1366_v3  ;;  %v1362_v50 = vsel %vm240_vm1, %v1346_v9, 0.0 }
 0x744   :  { %v1371_v15 = vadd.f32 1e-05, %v1365_v10  ;;  %1363 = vadd.xlane.f32.xlu1 %v1362_v50  ;;  %v1359_v16 = vsel %vm240_vm1, %v1345_v11, 0.0 }
 0x745   :  { %4743 = vrsqrt.f32 %v1372_v14  ;;  %1360 = vadd.xlane.f32.xlu0 %v1359_v16 }
 0x746   :  { %4745 = vrsqrt.f32 %v1371_v15 }
 0x74f   :  { %v4744_v60 = vpop.eup %4743 }
 0x750   :  { %v4746_v27 = vpop.eup %4745  ;;  %v1384_v30 = vmul.f32 %v4744_v60, %v5220_v26  ;;  %v275_v26 = vld [vmem:[%s6222_s3 + $0xa0] sm:$0xff] }
 0x751   :  { %v1383_v35 = vmul.f32 %v4746_v27, %v5223_v39  ;;  %v276_v39 = vld [vmem:[%s6222_s3 + $0xa8] sm:$0xff] }
 0x752   :  { %v1394_v40 = vmul.f32 %v3570_v19, %v1384_v30  ;;  %v4524_v12 = vpack.c.bf16 %v276_v39, %v275_v26 }
 0x753   :  { %v1393_v42 = vmul.f32 %v3570_v19, %v1383_v35 }
 0x754   :  { %v5278_v13 = vadd.f32 %v3571_v38, %v1394_v40  ;;  %4525 = vmatprep.subr.bf16.mxu1 %v4524_v12 }
 0x755   :  { %v5276_v29 = vadd.f32 %v3571_v38, %v1393_v42  ;;  %4527 = vmatpush3.bf16.msra.mxu1 %v4524_v12 }
 0x756   :  { %4529 = vmatprep.subr.bf16.mxu1 %v4528_v54 }
 0x757   :  { %4246 = vmatprep.mubr.msk.f32.mxu0 %vm240_vm1, %v5276_v29 }
 0x758   :  { %4247 = vmatmul.mubr.msk.f32.vlgmr.msra.gmra.mrb[12].mxu0 %vm240_vm1, %v5278_v13 }
 0x759   :  { %4531 = vmatpush3.bf16.msra.mxu1 %v4528_v54 }
 0x75a   :  { %4533 = vmatprep.subr.bf16.mxu1 %v4532_v20 }
 0x75d   :  { %4535 = vmatpush3.bf16.msra.mxu1 %v4532_v20 }
 0x75e   :  { %4537 = vmatprep.subr.bf16.mxu1 %v4536_v47 }
 0x761   :  { %4539 = vmatpush3.bf16.msra.mxu1 %v4536_v47 }
 0x7cd   :  { %v1358_v48 = vpop.xlane.xlu1 %1357 }
 0x7ce   :  { %v1368_v49 = vmul.f32 0.03125, %v1358_v48  ;;  %v1355_v51 = vpop.xlane.xlu0 %1354 }
 0x7cf   :  { %v1367_v52 = vmul.f32 0.03125, %v1355_v51 }
 0x7d0   :  { %v1374_v53 = vadd.f32 1e-05, %v1368_v49  ;;  %v3579_v49 = vld [vmem:[%s6226_s4 + $0x8] ss:$0 sm:$0xff] }
 0x7d1   :  { %v1373_v56 = vadd.f32 1e-05, %v1367_v52  ;;  %v1364_v21 = vpop.xlane.xlu1 %1363 }
 0x7d2   :  { %4747 = vrsqrt.f32 %v1374_v53  ;;  %v1370_v25 = vmul.f32 0.03125, %v1364_v21  ;;  %v1361_v61 = vpop.xlane.xlu0 %1360 }
 0x7d3   :  { %4749 = vrsqrt.f32 %v1373_v56  ;;  %v1369_v28 = vmul.f32 0.03125, %v1361_v61 }
 0x7d4   :  { %v1376_v31 = vadd.f32 1e-05, %v1370_v25 }
 0x7d5   :  { %v1375_v62 = vadd.f32 1e-05, %v1369_v28 }
 0x7d6   :  { %4751 = vrsqrt.f32 %v1376_v31 }
 0x7d7   :  { %4753 = vrsqrt.f32 %v1375_v62 }
 0x7dc   :  { %v4748_v55 = vpop.eup %4747 }
 0x7dd   :  { %v4750_v1 = vpop.eup %4749  ;;  %v1386_v2 = vmul.f32 %v4748_v55, %v5248_v58 }
 0x7de   :  { %v1385_v3 = vmul.f32 %v4750_v1, %v5250_v59  ;;  %v3572_v59 = vld [vmem:[%s6226_s4 + $0x7] ss:$0 sm:$0xff] }
 0x7df   :  { %v1396_v8 = vmul.f32 %v3570_v19, %v1386_v2 }
 0x7e0   :  { %v4752_v9 = vpop.eup %4751  ;;  %v1395_v10 = vmul.f32 %v3570_v19, %v1385_v3 }
 0x7e1   :  { %v4754_v11 = vpop.eup %4753  ;;  %v1388_v14 = vmul.f32 %v4752_v9, %v5256_v63  ;;  %v1406_v16 = vadd.f32 %v3571_v38, %v1396_v8 }
 0x7e2   :  { %v1405_v50 = vadd.f32 %v3571_v38, %v1395_v10  ;;  %v1387_v15 = vmul.f32 %v4754_v11, %v5259_v0 }
 0x7e3   :  { %v1398_v60 = vmul.f32 %v3570_v19, %v1388_v14 }
 0x7e4   :  { %4249 = vmatprep.mubr.msk.f32.mxu0 %vm240_vm1, %v1405_v50  ;;  %v1397_v27 = vmul.f32 %v3570_v19, %v1387_v15 }
 0x7e5   :  { %4250 = vmatmul.mubr.msk.f32.gmra.mrb[14].mxu0 %vm240_vm1, %v1406_v16  ;;  %v1408_v58 = vadd.f32 %v3571_v38, %v1398_v60 }
 0x7e6   :  { %v1407_v30 = vadd.f32 %v3571_v38, %v1397_v27 }
 0x7e8   :  { %4252 = vmatprep.mubr.msk.f32.mxu0 %vm240_vm1, %v1407_v30 }
 0x7e9   :  { %4253 = vmatmul.mubr.msk.f32.gmra.mrb[16].mxu0 %vm240_vm1, %v1408_v58 }
 0x82b   :  { %v4248_v63 = vpop.f32.mrb[12].mxu0 }
 0x82c   :  { %v1503_v35 = vadd.f32 %v4248_v63, %v3572_v59  ;;  %v1497_v0 = vpop.f32.mrb[13].mxu0 }
 0x82d   :  { %v1498_v40 = vadd.f32 %v3572_v59, %v1497_v0 }
 0x82e   :  { %v1527_v26 = vmax.f32 %v1503_v35, 0.0 }
 0x82f   :  { %v1526_v42 = vmax.f32 %v1498_v40, 0.0 }
 0x831   :  { %4271 = vmatprep.mubr.msk.f32.mxu1 %vm1536_vm15, %v1526_v42 }
 0x832   :  { %4272 = vmatmul.mubr.msk.f32.vlgmr.msra.gmra.mrb[32].mxu1 %vm1536_vm15, %v1527_v26 }
 0x8b8   :  { %v4251_v19 = vpop.f32.mrb[14].mxu0 }
 0x8b9   :  { %v1513_v38 = vadd.f32 %v4251_v19, %v3572_v59  ;;  %v1507_v39 = vpop.f32.mrb[15].mxu0 }
 0x8ba   :  { %v1508_v43 = vadd.f32 %v3572_v59, %v1507_v39 }
 0x8bb   :  { %v1529_v54 = vmax.f32 %v1513_v38, 0.0 }
 0x8bc   :  { %v1528_v12 = vmax.f32 %v1508_v43, 0.0  ;;  %v4254_v44 = vpop.f32.mrb[16].mxu0 }
 0x8bd   :  { %v1523_v57 = vadd.f32 %v4254_v44, %v3572_v59  ;;  %v1517_v45 = vpop.f32.mrb[17].mxu0 }
 0x8be   :  { %v1518_v20 = vadd.f32 %v3572_v59, %v1517_v45  ;;  %4274 = vmatprep.mubr.msk.f32.mxu1 %vm1536_vm15, %v1528_v12 }
 0x8bf   :  { %4275 = vmatmul.mubr.msk.f32.gmra.mrb[34].mxu1 %vm1536_vm15, %v1529_v54  ;;  %v1531_v46 = vmax.f32 %v1523_v57, 0.0 }
 0x8c0   :  { %v1530_v24 = vmax.f32 %v1518_v20, 0.0 }
 0x8c2   :  { %4277 = vmatprep.mubr.msk.f32.mxu1 %vm1536_vm15, %v1530_v24 }
 0x8c3   :  { %4278 = vmatmul.mubr.msk.f32.gmra.mrb[36].mxu1 %vm1536_vm15, %v1531_v46 }
 0x905   :  { %v4273_v47 = vpop.f32.mrb[32].mxu1 }
 0x906   :  { %v1621_v48 = vpop.f32.mrb[33].mxu1  ;;  %v1627_v28 = vadd.f32 %v4273_v47, %v3579_v49 }
 0x907   :  { %v1622_v1 = vadd.f32 %v3579_v49, %v1621_v48 }
 0x908   :  { %v1651_v11 = vadd.f32 %v1627_v28, %v5278_v13 }
 0x90a   :  { %v1659_v15 = vsel %vm240_vm1, %v1651_v11, 0.0 }
 0x992   :  { %v4276_v51 = vpop.f32.mrb[34].mxu1 }
 0x993   :  { %v1637_v52 = vadd.f32 %v4276_v51, %v3579_v49  ;;  %v1631_v53 = vpop.f32.mrb[35].mxu1 }
 0x994   :  { %v1632_v56 = vadd.f32 %v3579_v49, %v1631_v53  ;;  %v1758_v53 = vld [vmem:[%s6222_s3 + $0x100] sm:$0xff] }
 0x995   :  { %v1653_v21 = vadd.f32 %v1637_v52, %v1406_v16 }
 0x996   :  { %v4279_v25 = vpop.f32.mrb[36].mxu1  ;;  %v1652_v61 = vadd.f32 %v1632_v56, %v1405_v50  ;;  %v1650_v50 = vadd.f32 %v1622_v1, %v5276_v29  ;;  %v1759_v56 = vld [vmem:[%s6222_s3 + $0x108] sm:$0xff]  ;;  %v1756_v1 = vld [vmem:[%s6222_s3 + $0xf0] sm:$0xff] }
 0x997   :  { %v1647_v31 = vadd.f32 %v4279_v25, %v3579_v49  ;;  %v1641_v62 = vpop.f32.mrb[37].mxu1  ;;  %v1665_v55 = vsel %vm240_vm1, %v1653_v21, 0.0  ;;  %v1760_v25 = vld [vmem:[%s6222_s3 + $0x110] sm:$0xff] }
 0x998   :  { %v1642_v2 = vadd.f32 %v3579_v49, %v1641_v62  ;;  %1666 = vadd.xlane.f32.xlu1 %v1665_v55  ;;  %v1662_v3 = vsel %vm240_vm1, %v1652_v61, 0.0  ;;  %v1656_v16 = vsel %vm240_vm1, %v1650_v50, 0.0  ;;  %v1755_v62 = vld [vmem:[%s6222_s3 + $0xe8] sm:$0xff] }
 0x999   :  { %1663 = vadd.xlane.f32.xlu0 %v1662_v3  ;;  %v1655_v8 = vadd.f32 %v1647_v31, %v1408_v58  ;;  %v1754_v31 = vld [vmem:[%s6222_s3 + $0xe0] sm:$0xff] }
 0x99a   :  { %v1654_v9 = vadd.f32 %v1642_v2, %v1407_v30  ;;  %v4540_v55 = vpack.c.bf16 %v1755_v62, %v1754_v31  ;;  %v1757_v2 = vld [vmem:[%s6222_s3 + $0xf8] sm:$0xff] }
 0x99b   :  { %v1671_v10 = vsel %vm240_vm1, %v1655_v8, 0.0  ;;  %v4544_v3 = vpack.c.bf16 %v1757_v2, %v1756_v1  ;;  %v1764_v1 = vld [vmem:[%s6222_s3 + $0x130] sm:$0xff] }
 0x99c   :  { %1672 = vadd.xlane.f32.xlu1 %v1671_v10  ;;  %v1668_v14 = vsel %vm240_vm1, %v1654_v9, 0.0  ;;  %4541 = vmatprep.subr.bf16.mxu0 %v4540_v55 }
 0x99d   :  { %1669 = vadd.xlane.f32.xlu0 %v1668_v14  ;;  %4543 = vmatpush3.bf16.msra.mxu0 %v4540_v55 }
 0x99e   :  { %4545 = vmatprep.subr.bf16.mxu0 %v4544_v3 }
 0x9a0   :  { %1660 = vadd.xlane.f32.xlu1 %v1659_v15 }
 0x9a1   :  { %1657 = vadd.xlane.f32.xlu0 %v1656_v16  ;;  %4547 = vmatpush3.bf16.msra.mxu0 %v4544_v3 }
 0xa25   :  { %v1667_v60 = vpop.xlane.xlu1 %1666 }
 0xa26   :  { %v1677_v27 = vmul.f32 0.03125, %v1667_v60  ;;  %v1664_v58 = vpop.xlane.xlu0 %1663 }
 0xa27   :  { %v1676_v30 = vmul.f32 0.03125, %v1664_v58 }
 0xa28   :  { %v5336_v59 = vsub.f32 %v1653_v21, %v1677_v27  ;;  %v4548_v21 = vpack.c.bf16 %v1759_v56, %v1758_v53 }
 0xa29   :  { %v5338_v63 = vsub.f32 %v1652_v61, %v1676_v30  ;;  %v1673_v13 = vpop.xlane.xlu1 %1672  ;;  %v1761_v61 = vld [vmem:[%s6222_s3 + $0x118] sm:$0xff] }
 0xa2a   :  { %v1679_v35 = vmul.f32 0.03125, %v1673_v13  ;;  %v1670_v0 = vpop.xlane.xlu0 %1669  ;;  %v1689_v29 = vmul.f32 %v5336_v59, %v5336_v59  ;;  %4549 = vmatprep.subr.bf16.mxu1 %v4548_v21  ;;  %v4552_v28 = vpack.c.bf16 %v1761_v61, %v1760_v25 }
 0xa2b   :  { %v1678_v40 = vmul.f32 0.03125, %v1670_v0  ;;  %v1688_v42 = vmul.f32 %v5338_v63, %v5338_v63  ;;  %4551 = vmatpush3.bf16.msra.mxu1 %v4548_v21 }
 0xa2c   :  { %v5344_v26 = vsub.f32 %v1655_v8, %v1679_v35  ;;  %v1701_v19 = vsel %vm240_vm1, %v1689_v29, 0.0  ;;  %4553 = vmatprep.subr.bf16.mxu1 %v4552_v28  ;;  %v1762_v8 = vld [vmem:[%s6222_s3 + $0x120] sm:$0xff] }
 0xa2d   :  { %v5347_v38 = vsub.f32 %v1654_v9, %v1678_v40  ;;  %1702 = vadd.xlane.f32.xlu1 %v1701_v19  ;;  %v1661_v39 = vpop.xlane.xlu1 %1660  ;;  %v1698_v43 = vsel %vm240_vm1, %v1688_v42, 0.0  ;;  %v1763_v9 = vld [vmem:[%s6222_s3 + $0x128] sm:$0xff] }
 0xa2e   :  { %v1675_v12 = vmul.f32 0.03125, %v1661_v39  ;;  %1699 = vadd.xlane.f32.xlu0 %v1698_v43  ;;  %v1658_v44 = vpop.xlane.xlu0 %1657  ;;  %v1691_v54 = vmul.f32 %v5344_v26, %v5344_v26  ;;  %v4556_v10 = vpack.c.bf16 %v1763_v9, %v1762_v8  ;;  %v3595_v8 = vld [vmem:[%s6226_s4 + $0xc] ss:$0 sm:$0xff] }
 0xa2f   :  { %v1674_v57 = vmul.f32 0.03125, %v1658_v44  ;;  %v1690_v45 = vmul.f32 %v5347_v38, %v5347_v38  ;;  %4555 = vmatpush3.bf16.msra.mxu1 %v4552_v28  ;;  %v3586_v44 = vld [vmem:[%s6226_s4 + $0x9] ss:$0 sm:$0xff] }
 0xa30   :  { %v5354_v20 = vsub.f32 %v1651_v11, %v1675_v12  ;;  %v1707_v24 = vsel %vm240_vm1, %v1691_v54, 0.0  ;;  %4557 = vmatprep.subr.bf16.mxu0 %v4556_v10 }
 0xa31   :  { %v5357_v46 = vsub.f32 %v1650_v50, %v1674_v57  ;;  %1708 = vadd.xlane.f32.xlu1 %v1707_v24  ;;  %v1704_v47 = vsel %vm240_vm1, %v1690_v45, 0.0  ;;  %v3587_v24 = vld [vmem:[%s6226_s4 + $0xa] ss:$0 sm:$0xff] }
 0xa32   :  { %1705 = vadd.xlane.f32.xlu0 %v1704_v47  ;;  %v1687_v48 = vmul.f32 %v5354_v20, %v5354_v20 }
 0xa33   :  { %v1686_v49 = vmul.f32 %v5357_v46, %v5357_v46 }
 0xa34   :  { %v1695_v51 = vsel %vm240_vm1, %v1687_v48, 0.0 }
 0xa35   :  { %1696 = vadd.xlane.f32.xlu1 %v1695_v51  ;;  %v1692_v52 = vsel %vm240_vm1, %v1686_v49, 0.0 }
 0xa36   :  { %1693 = vadd.xlane.f32.xlu0 %v1692_v52 }
 0xaba   :  { %v1703_v11 = vpop.xlane.xlu1 %1702 }
 0xabb   :  { %v1713_v14 = vmul.f32 0.03125, %v1703_v11  ;;  %v1700_v50 = vpop.xlane.xlu0 %1699 }
 0xabc   :  { %v1712_v15 = vmul.f32 0.03125, %v1700_v50 }
 0xabd   :  { %v1719_v16 = vadd.f32 1e-05, %v1713_v14 }
 0xabe   :  { %v1718_v60 = vadd.f32 1e-05, %v1712_v15  ;;  %v1709_v27 = vpop.xlane.xlu1 %1708 }
 0xabf   :  { %4755 = vrsqrt.f32 %v1719_v16  ;;  %v1715_v58 = vmul.f32 0.03125, %v1709_v27  ;;  %v1706_v30 = vpop.xlane.xlu0 %1705 }
 0xac0   :  { %4757 = vrsqrt.f32 %v1718_v60  ;;  %v1714_v13 = vmul.f32 0.03125, %v1706_v30 }
 0xac1   :  { %v1721_v35 = vadd.f32 1e-05, %v1715_v58 }
 0xac2   :  { %v1720_v0 = vadd.f32 1e-05, %v1714_v13  ;;  %v1697_v29 = vpop.xlane.xlu1 %1696 }
 0xac3   :  { %4759 = vrsqrt.f32 %v1721_v35  ;;  %v1711_v40 = vmul.f32 0.03125, %v1697_v29  ;;  %v1694_v42 = vpop.xlane.xlu0 %1693 }
 0xac4   :  { %4761 = vrsqrt.f32 %v1720_v0  ;;  %v1710_v19 = vmul.f32 0.03125, %v1694_v42 }
 0xac5   :  { %v1717_v39 = vadd.f32 1e-05, %v1711_v40 }
 0xac6   :  { %v1716_v43 = vadd.f32 1e-05, %v1710_v19 }
 0xac7   :  { %4763 = vrsqrt.f32 %v1717_v39 }
 0xac8   :  { %4765 = vrsqrt.f32 %v1716_v43  ;;  %v3588_v43 = vld [vmem:[%s6226_s4 + $0xb] ss:$0 sm:$0xff] }
 0xac9   :  { %v4756_v12 = vpop.eup %4755 }
 0xaca   :  { %v4758_v54 = vpop.eup %4757  ;;  %v1731_v57 = vmul.f32 %v4756_v12, %v5336_v59 }
 0xacb   :  { %v1730_v45 = vmul.f32 %v4758_v54, %v5338_v63 }
 0xacc   :  { %v1741_v47 = vmul.f32 %v3586_v44, %v1731_v57 }
 0xacd   :  { %v4760_v48 = vpop.eup %4759  ;;  %v1740_v49 = vmul.f32 %v3586_v44, %v1730_v45 }
 0xace   :  { %v4762_v51 = vpop.eup %4761  ;;  %v1733_v52 = vmul.f32 %v4760_v48, %v5344_v26  ;;  %v5408_v21 = vadd.f32 %v3587_v24, %v1741_v47 }
 0xacf   :  { %v5405_v53 = vadd.f32 %v3587_v24, %v1740_v49  ;;  %v1732_v56 = vmul.f32 %v4762_v51, %v5347_v38 }
 0xad0   :  { %6248 = vst [vmem:[#allocation4_spill] sm:$0xff] %v5408_v21  ;;  %v1743_v25 = vmul.f32 %v3586_v44, %v1733_v52 }
 0xad1   :  { %6247 = vst [vmem:[#allocation3_spill] sm:$0xff] %v5405_v53  ;;  %v4764_v59 = vpop.eup %4763  ;;  %4305 = vmatprep.mubr.msk.f32.mxu1 %vm240_vm1, %v5405_v53  ;;  %v1742_v63 = vmul.f32 %v3586_v44, %v1732_v56 }
 0xad2   :  { %v4766_v61 = vpop.eup %4765  ;;  %v1729_v28 = vmul.f32 %v4764_v59, %v5354_v20  ;;  %4306 = vmatmul.mubr.msk.f32.vlgmr.msra.gmra.mrb[38].mxu1 %vm240_vm1, %v5408_v21  ;;  %v5418_v38 = vadd.f32 %v3587_v24, %v1743_v25  ;;  %v1765_v20 = vld [vmem:[%s6222_s3 + $0x138] sm:$0xff] }
 0xad3   :  { %v5415_v31 = vadd.f32 %v3587_v24, %v1742_v63  ;;  %v1728_v26 = vmul.f32 %v4766_v61, %v5357_v46  ;;  %v4560_v3 = vpack.c.bf16 %v1765_v20, %v1764_v1 }
 0xad4   :  { %v1739_v62 = vmul.f32 %v3586_v44, %v1729_v28  ;;  %6250 = vst [vmem:[#allocation6_spill] sm:$0xff] %v5418_v38 }
 0xad5   :  { %6249 = vst [vmem:[#allocation5_spill] sm:$0xff] %v5415_v31  ;;  %4308 = vmatprep.mubr.msk.f32.mxu1 %vm240_vm1, %v5415_v31  ;;  %v1738_v55 = vmul.f32 %v3586_v44, %v1728_v26 }
 0xad6   :  { %4309 = vmatmul.mubr.msk.f32.gmra.mrb[40].mxu1 %vm240_vm1, %v5418_v38  ;;  %v5432_v46 = vadd.f32 %v3587_v24, %v1739_v62 }
 0xad7   :  { %v5430_v2 = vadd.f32 %v3587_v24, %v1738_v55 }
 0xad8   :  { %6252 = vst [vmem:[#allocation8_spill] sm:$0xff] %v5432_v46 }
 0xad9   :  { %6251 = vst [vmem:[#allocation7_spill] sm:$0xff] %v5430_v2  ;;  %4288 = vmatprep.mubr.msk.f32.mxu0 %vm240_vm1, %v5430_v2 }
 0xada   :  { %4289 = vmatmul.mubr.msk.f32.vlgmr.msra.gmra.mrb[18].mxu0 %vm240_vm1, %v5432_v46 }
 0xadb   :  { %4291 = vmatprep.mubr.msk.f32.mxu0 %vm240_vm1, %v5405_v53  ;;  %4559 = vmatpush3.bf16.msra.mxu0 %v4556_v10 }
 0xadc   :  { %4561 = vmatprep.subr.bf16.mxu0 %v4560_v3 }
 0xade   :  { %4292 = vmatmul.mubr.msk.f32.gmra.mrb[20].mxu0 %vm240_vm1, %v5408_v21 }
 0xadf   :  { %4294 = vmatprep.mubr.msk.f32.mxu0 %vm240_vm1, %v5415_v31  ;;  %4563 = vmatpush3.bf16.msra.mxu0 %v4560_v3 }
 0xae2   :  { %4295 = vmatmul.mubr.msk.f32.gmra.mrb[22].mxu0 %vm240_vm1, %v5418_v38 }
 0xae3   :  { %4319 = vmatprep.mubr.msk.f32.mxu0 %vm240_vm1, %v5405_v53 }
 0xae6   :  { %4320 = vmatmul.mubr.msk.f32.vlgmr.msra.gmra.mrb[24].mxu0 %vm240_vm1, %v5408_v21 }
 0xae7   :  { %4322 = vmatprep.mubr.msk.f32.mxu0 %vm240_vm1, %v5415_v31 }
 0xaea   :  { %4323 = vmatmul.mubr.msk.f32.gmra.mrb[26].mxu0 %vm240_vm1, %v5418_v38 }
 0xba5   :  { %v4307_v9 = vpop.f32.mrb[38].mxu1 }
 0xba6   :  { %v5457_v10 = vadd.f32 %v4307_v9, %v3595_v8  ;;  %v1979_v11 = vpop.f32.mrb[39].mxu1 }
 0xba7   :  { %v1980_v14 = vadd.f32 %v3595_v8, %v1979_v11 }
 0xba8   :  { %v2088_v50 = vmul.f32 %v5457_v10, %v4983_v4  ;;  %v5463_v15 = vmul.f32 %v5457_v10, %v4985_v5  ;;  %v5467_v16 = vmul.f32 %v5457_v10, %v4987_v6  ;;  %v5471_v60 = vmul.f32 %v5457_v10, %v4989_v7 }
 0xba9   :  { %v4310_v27 = vpop.f32.mrb[40].mxu1  ;;  %v2087_v58 = vmul.f32 %v1980_v14, %v4983_v4  ;;  %v5475_v30 = vmul.f32 %v1980_v14, %v4985_v5  ;;  %v5478_v13 = vmul.f32 %v1980_v14, %v4987_v6  ;;  %v5481_v35 = vmul.f32 %v1980_v14, %v4989_v7 }
 0xbaa   :  { %v1995_v0 = vadd.f32 %v4310_v27, %v3595_v8  ;;  %v1989_v29 = vpop.f32.mrb[41].mxu1  ;;  %v5484_v40 = vmul.f32 %v1980_v14, %v5011_v22  ;;  %v5488_v42 = vmul.f32 %v5457_v10, %v5011_v22  ;;  %v5491_v19 = vmul.f32 %v1980_v14, %v5013_v23 }
 0xbab   :  { %v1990_v39 = vadd.f32 %v3595_v8, %v1989_v29  ;;  %v4567_v12 = vpack.c.bf16 %v2088_v50, %v2087_v58  ;;  %v4573_v44 = vpack.c.bf16 %v5463_v15, %v5475_v30  ;;  %v5542_v15 = vmul.f32 %v5457_v10, %v5013_v23 }
 0xbac   :  { %v2104_v57 = vmul.f32 %v1995_v0, %v4983_v4  ;;  %v2106_v45 = vmul.f32 %v1995_v0, %v4985_v5  ;;  %v2108_v24 = vmul.f32 %v1995_v0, %v4987_v6  ;;  %v5504_v47 = vmul.f32 %v1995_v0, %v4989_v7 }
 0xbad   :  { %v4290_v48 = vpop.f32.mrb[18].mxu0  ;;  %v2103_v49 = vmul.f32 %v1990_v39, %v4983_v4  ;;  %v2105_v51 = vmul.f32 %v1990_v39, %v4985_v5  ;;  %v2107_v52 = vmul.f32 %v1990_v39, %v4987_v6  ;;  %v5510_v56 = vmul.f32 %v1990_v39, %v4989_v7 }
 0xbae   :  { %v5512_v25 = vadd.f32 %v4290_v48, %v3588_v43  ;;  %v1880_v59 = vpop.f32.mrb[19].mxu0  ;;  %v5517_v61 = vmul.f32 %v1990_v39, %v5011_v22  ;;  %v5520_v28 = vmul.f32 %v1995_v0, %v5011_v22  ;;  %v5531_v9 = vmul.f32 %v1990_v39, %v5013_v23 }
 0xbaf   :  { %v5522_v26 = vadd.f32 %v3588_v43, %v1880_v59  ;;  %v4564_v62 = vpack.c.bf16 %v2104_v57, %v2103_v49  ;;  %v4570_v55 = vpack.c.bf16 %v2106_v45, %v2105_v51  ;;  %v4576_v1 = vpack.c.bf16 %v2108_v24, %v2107_v52 }
 0xbb0   :  { %v5538_v50 = vmul.f32 %v1995_v0, %v5013_v23  ;;  %v5545_v27 = vmul.f32 %v1990_v39, %v5031_v36  ;;  %v5552_v29 = vmul.f32 %v1995_v0, %v5031_v36  ;;  %v5555_v57 = vmul.f32 %v1980_v14, %v5031_v36 }
 0xbb1   :  { %v4293_v11 = vpop.f32.mrb[20].mxu0  ;;  %4566 = vmatprep.subr.msk.bf16.mxu1 %vm5005_vm5, %v4564_v62  ;;  %3910 = vmatprep.mubr.msk.f32.mxu1 %vm240_vm1, %v5522_v26  ;;  %v5559_v45 = vmul.f32 %v5457_v10, %v5031_v36  ;;  %v5570_v49 = vmul.f32 %v1990_v39, %v5033_v37  ;;  %v5577_v59 = vmul.f32 %v1995_v0, %v5033_v37  ;;  %v3600_v0 = vld [vmem:[%s6226_s4 + $0xd] ss:$0 sm:$0xff] }
 0xbb2   :  { %v5547_v58 = vadd.f32 %v4293_v11, %v3588_v43  ;;  %v1890_v30 = vpop.f32.mrb[21].mxu0  ;;  %4569 = vmatpush3.bf16.xpose.msk.msra.mxu1 %vm5005_vm5, %v4567_v12  ;;  %v5580_v62 = vmul.f32 %v1980_v14, %v5033_v37  ;;  %v5584_v11 = vmul.f32 %v5457_v10, %v5033_v37  ;;  %v6256_v46 = vpack.c.bf16 %v5467_v16, %v5478_v13 }
 0xbb3   :  { %v5561_v24 = vadd.f32 %v3588_v43, %v1890_v30  ;;  %4572 = vmatprep.subr.msk.bf16.mxu1 %vm5005_vm5, %v4570_v55 }
 0xbb5   :  { %v4296_v55 = vpop.f32.mrb[22].mxu0 }
 0xbb6   :  { %v5586_v30 = vadd.f32 %v4296_v55, %v3588_v43  ;;  %v1900_v39 = vpop.f32.mrb[23].mxu0 }
 0xbb7   :  { %v5590_v33 = vadd.f32 %v3588_v43, %v1900_v39 }
 0xbb9   :  { %v4321_v52 = vpop.f32.mrb[24].mxu0 }
 0xbba   :  { %v2074_v51 = vadd.f32 %v4321_v52, %v3600_v0  ;;  %v2068_v12 = vpop.f32.mrb[25].mxu0  ;;  %4575 = vmatpush3.bf16.xpose.msk.msra.mxu1 %vm5005_vm5, %v4573_v44 }
 0xbbb   :  { %v2069_v10 = vadd.f32 %v3600_v0, %v2068_v12  ;;  %4578 = vmatprep.subr.msk.bf16.mxu1 %vm5005_vm5, %v4576_v1 }
 0xbbc   :  { %v5602_v43 = vmul.f32 %v2074_v51, %v4983_v4  ;;  %v5605_v55 = vmul.f32 %v2074_v51, %v4985_v5  ;;  %v5608_v39 = vmul.f32 %v2074_v51, %v4987_v6  ;;  %v5611_v14 = vmul.f32 %v2074_v51, %v4989_v7 }
 0xbbd   :  { %v4324_v52 = vpop.f32.mrb[26].mxu0  ;;  %v5614_v41 = vmul.f32 %v2069_v10, %v4983_v4  ;;  %v5617_v44 = vmul.f32 %v2069_v10, %v4985_v5  ;;  %v5620_v1 = vmul.f32 %v2069_v10, %v4987_v6  ;;  %v5623_v12 = vmul.f32 %v2069_v10, %v4989_v7 }
 0xbbe   :  { %v2084_v48 = vadd.f32 %v4324_v52, %v3600_v0  ;;  %v2078_v8 = vpop.f32.mrb[27].mxu0  ;;  %v5626_v3 = vmul.f32 %v2069_v10, %v5011_v22  ;;  %v5629_v63 = vmul.f32 %v2074_v51, %v5011_v22  ;;  %v5632_v20 = vmul.f32 %v2069_v10, %v5013_v23 }
 0xbbf   :  { %6253 = vst [vmem:[#allocation9_spill] sm:$0xff] %v5620_v1  ;;  %v2079_v54 = vadd.f32 %v3600_v0, %v2078_v8  ;;  %v5733_v16 = vmul.f32 %v2074_v51, %v5033_v37 }
 0xbc0   :  { %6254 = vst [vmem:[#allocation10_spill] sm:$0xff] %v5626_v3  ;;  %6255 = vst [vmem:[#allocation11_spill] sm:$0xff] %v5629_v63  ;;  %v5641_v53 = vmul.f32 %v2084_v48, %v4983_v4  ;;  %v5644_v21 = vmul.f32 %v2084_v48, %v4985_v5  ;;  %v5647_v2 = vmul.f32 %v2084_v48, %v4987_v6 }
 0xbc1   :  { %v5650_v8 = vmul.f32 %v2084_v48, %v4989_v7  ;;  %v5653_v0 = vmul.f32 %v2079_v54, %v4983_v4  ;;  %v5656_v38 = vmul.f32 %v2079_v54, %v4985_v5  ;;  %v5659_v52 = vmul.f32 %v2079_v54, %v4987_v6 }
 0xbc2   :  { %v5662_v31 = vmul.f32 %v2079_v54, %v4989_v7  ;;  %4581 = vmatpush3.bf16.xpose.msk.msra.mxu1 %vm5005_vm5, %v6256_v46  ;;  %v5672_v4 = vmul.f32 %v2079_v54, %v5011_v22  ;;  %v5675_v5 = vmul.f32 %v2084_v48, %v5011_v22  ;;  %v6258_v7 = vpack.c.bf16 %v5504_v47, %v5510_v56 }
 0xbc3   :  { %v5695_v47 = vmul.f32 %v2079_v54, %v5013_v23  ;;  %v5698_v56 = vmul.f32 %v2084_v48, %v5013_v23  ;;  %v5704_v1 = vmul.f32 %v2079_v54, %v5031_v36  ;;  %v5707_v13 = vmul.f32 %v2084_v48, %v5031_v36 }
 0xbc4   :  { %6257 = vst [vmem:[#allocation12_spill] sm:$0xff] %v5672_v4  ;;  %4584 = vmatprep.subr.msk.bf16.mxu1 %vm5005_vm5, %v6258_v7  ;;  %v5701_v7 = vmul.f32 %v2074_v51, %v5013_v23  ;;  %v5710_v22 = vmul.f32 %v2069_v10, %v5031_v36  ;;  %v5713_v6 = vmul.f32 %v2074_v51, %v5031_v36 }
 0xbc5   :  { %v5720_v23 = vmul.f32 %v2079_v54, %v5033_v37  ;;  %v5723_v3 = vmul.f32 %v2084_v48, %v5033_v37  ;;  %v4644_v63 = vpack.c.bf16 %v5707_v13, %v5704_v1  ;;  %v5730_v36 = vmul.f32 %v2069_v10, %v5033_v37 }
 0xbc6   :  { %v6259_v48 = vpack.c.bf16 %v5471_v60, %v5481_v35  ;;  %v6260_v4 = vpack.c.bf16 %v5520_v28, %v5517_v61  ;;  %v6261_v37 = vpack.c.bf16 %v5488_v42, %v5484_v40  ;;  %v6262_v51 = vpack.c.bf16 %v5538_v50, %v5531_v9 }
 0xbc7   :  { %v4648_v46 = vpack.c.bf16 %v5723_v3, %v5720_v23  ;;  %v4650_v54 = vpack.c.bf16 %v5733_v16, %v5730_v36  ;;  %v6263_v60 = vpack.c.bf16 %v5542_v15, %v5491_v19  ;;  %v6264_v35 = vpack.c.bf16 %v5552_v29, %v5545_v27 }
 0xbc8   :  { %v6265_v40 = vpack.c.bf16 %v5559_v45, %v5555_v57  ;;  %v6266_v42 = vpack.c.bf16 %v5577_v59, %v5570_v49  ;;  %v6267_v19 = vpack.c.bf16 %v5584_v11, %v5580_v62 }
 0xbca   :  { %4587 = vmatpush3.bf16.xpose.msk.msra.mxu1 %vm5005_vm5, %v6259_v48 }
 0xbcb   :  { %4590 = vmatprep.subr.msk.bf16.mxu1 %vm5005_vm5, %v6260_v4 }
 0xbd2   :  { %4593 = vmatpush3.bf16.xpose.msk.msra.mxu1 %vm5005_vm5, %v6261_v37 }
 0xbd3   :  { %4596 = vmatprep.subr.msk.bf16.mxu1 %vm5005_vm5, %v6262_v51  ;;  %v2378_v51 = vadd.s32 128, %v4956_v34 }
 0xbda   :  { %4599 = vmatpush3.bf16.xpose.msk.msra.mxu1 %vm5005_vm5, %v6263_v60  ;;  %v2461_v60 = vmul.u32 16, %v4953_v32 }
 0xbdb   :  { %4602 = vmatprep.subr.msk.bf16.mxu1 %vm5005_vm5, %v6264_v35  ;;  %v2462_v35 = vmul.u32 16, %v5100_v17 }
 0xbdc   :  { %vm2464_vm0 = vcmp.ge.s32.totalorder %v2378_v51, %v2461_v60  ;;  %vm2463_vm6 = vcmp.ge.s32.totalorder %v4956_v34, %v2461_v60 }
 0xbdd   :  { %vm2466_vm2 = vcmp.ge.s32.totalorder %v2378_v51, %v2462_v35  ;;  %vm2465_vm9 = vcmp.ge.s32.totalorder %v4956_v34, %v2462_v35 }
 0xbe2   :  { %4605 = vmatpush3.bf16.xpose.msk.msra.mxu1 %vm5005_vm5, %v6265_v40  ;;  %v2467_v40 = vadd.s32 16, %v2461_v60 }
 0xbe3   :  { %4608 = vmatprep.subr.msk.bf16.mxu1 %vm5005_vm5, %v6266_v42  ;;  %v2468_v42 = vadd.s32 16, %v2462_v35 }
 0xbe4   :  { %vm2470_vm3 = vcmp.lt.s32.totalorder %v2378_v51, %v2467_v40  ;;  %vm2469_vm7 = vcmp.lt.s32.totalorder %v4956_v34, %v2467_v40 }
 0xbe5   :  { %vm2472_vm4 = vcmp.lt.s32.totalorder %v2378_v51, %v2468_v42  ;;  %vm2471_vm10 = vcmp.lt.s32.totalorder %v4956_v34, %v2468_v42  ;;  %vm5823_vm12 = vmand %vm2463_vm6, %vm2469_vm7 }
 0xbe6   :  { %vm2476_vm8 = vmand %vm2466_vm2, %vm2472_vm4  ;;  %vm2929_vm2 = vcmp.eq.s32.totalorder %v4953_v32, %v4956_v34  ;;  %v1766_v32 = vld [vmem:[%s6222_s3 + $0x140] sm:$0xff] }
 0xbe7   :  { %vm5827_vm13 = vmand %vm2465_vm9, %vm2471_vm10 }
 0xbea   :  { %4611 = vmatpush3.bf16.xpose.msk.msra.mxu1 %vm5005_vm5, %v6267_v19  ;;  %vm2474_vm5 = vmand %vm2464_vm0, %vm2470_vm3  ;;  %v6268_v19 = vmov 1.0|1.0   ;;  %vm2930_vm3 = vcmp.eq.s32.totalorder %v5100_v17, %v4956_v34  ;;  %v1767_v34 = vld [vmem:[%s6222_s3 + $0x148] sm:$0xff] }
 0xbeb   :  { %vm4612_vm11 = vmpackc.low %vm2476_vm8, %vm2474_vm5  ;;  %v4652_v17 = vpack.c.bf16 %v1767_v34, %v1766_v32 }
 0xbec   :  { %4613 = vmatprep.subr.msk.bf16.mxu0 %vm4612_vm11, %v6268_v19  ;;  %vm4614_vm0 = vmpackc.low %vm5827_vm13, %vm5823_vm12 }
 0xbed   :  { %4615 = vmatpush1.bf16.xpose.msk.msra.mxu0 %vm4614_vm0, %v6268_v19  ;;  %vm5948_vm4 = vmpackc.low %vm2930_vm3, %vm2929_vm2  ;;  %4653 = vmatprep.subr.bf16.mxu1 %v4652_v17 }
 0xbee   :  { %4617 = vmatprep.subr.msk.bf16.mxu0 %vm4612_vm11, %v6268_v19 }
 0xbf1   :  { %3911 = vmatmul.mubr.msk.f32.vlgmr.msra.gmra.mrb[42].mxu1 %vm240_vm1, %v5522_v26 }
 0xbf2   :  { %3912 = vmatprep.mubr.msk.f32.mxu1 %vm240_vm1, %v5512_v25  ;;  %4655 = vmatpush3.bf16.msra.mxu1 %v4652_v17 }
 0xbf5   :  { %3913 = vmatmul.mubr.msk.f32.gmra.mrb[44].mxu1 %vm240_vm1, %v5512_v25 }
 0xbf6   :  { %3914 = vmatprep.mubr.msk.f32.mxu1 %vm240_vm1, %v5561_v24 }
 0xbf9   :  { %3915 = vmatmul.mubr.msk.f32.gmra.mrb[46].mxu1 %vm240_vm1, %v5561_v24 }
 0xbfa   :  { %3916 = vmatprep.mubr.msk.f32.mxu1 %vm240_vm1, %v5547_v58 }
 0xbfd   :  { %3917 = vmatmul.mubr.msk.f32.gmra.mrb[48].mxu1 %vm240_vm1, %v5547_v58 }
 0xbfe   :  { %3918 = vmatprep.mubr.msk.f32.mxu1 %vm240_vm1, %v5590_v33 }
 0xc01   :  { %3919 = vmatmul.mubr.msk.f32.gmra.mrb[50].mxu1 %vm240_vm1, %v5590_v33 }
 0xc02   :  { %3920 = vmatprep.mubr.msk.f32.mxu1 %vm240_vm1, %v5586_v30 }
 0xc05   :  { %3921 = vmatmul.mubr.msk.f32.gmra.mrb[52].mxu1 %vm240_vm1, %v5586_v30 }
 0xcc4   :  { %v2331_v18 = vpop.f32.mrb[42].mxu1 }
 0xcc5   :  { %v2366_v25 = vmul.f32 0.5, %v2331_v18  ;;  %v2333_v61 = vpop.f32.mrb[43].mxu1 }
 0xcc7   :  { %v2407_v28 = vmax.f32 %v2366_v25, -1e+30 }
 0xcc8   :  { %v2337_v26 = vpop.f32.mrb[44].mxu1 }
 0xcc9   :  { %2408 = vmax.xlane.f32.xlu0 %v2407_v28  ;;  %v2339_v9 = vpop.f32.mrb[45].mxu1 }
 0xcca   :  { %v2369_v50 = vmul.f32 0.5, %v2339_v9 }
 0xccc   :  { %v2343_v15 = vpop.f32.mrb[46].mxu1  ;;  %v2410_v27 = vmax.f32 %v2369_v50, -1e+30 }
 0xccd   :  { %v2370_v58 = vmul.f32 0.5, %v2343_v15  ;;  %v2345_v29 = vpop.f32.mrb[47].mxu1 }
 0xcce   :  { %2411 = vmax.xlane.f32.xlu1 %v2410_v27 }
 0xccf   :  { %v2413_v33 = vmax.f32 %v2370_v58, -1e+30 }
 0xcd0   :  { %v2349_v57 = vpop.f32.mrb[48].mxu1 }
 0xcd1   :  { %v5806_v45 = vmul.f32 0.5, %v2349_v57  ;;  %2414 = vmax.xlane.f32.xlu0 %v2413_v33  ;;  %v2351_v24 = vpop.f32.mrb[49].mxu1 }
 0xcd3   :  { %v2416_v49 = vmax.f32 %v5806_v45, -1e+30 }
 0xcd4   :  { %v2355_v59 = vpop.f32.mrb[50].mxu1 }
 0xcd5   :  { %2417 = vmax.xlane.f32.xlu1 %v2416_v49  ;;  %v2357_v62 = vpop.f32.mrb[51].mxu1 }
 0xcd6   :  { %v5809_v11 = vmul.f32 0.5, %v2357_v62 }
 0xcd8   :  { %v2361_v30 = vpop.f32.mrb[52].mxu1  ;;  %v2419_v10 = vmax.f32 %v5809_v11, -1e+30 }
 0xcd9   :  { %v2363_v4 = vpop.f32.mrb[53].mxu1 }
 0xcda   :  { %v5812_v48 = vmul.f32 0.5, %v2363_v4  ;;  %2420 = vmax.xlane.f32.xlu0 %v2419_v10 }
 0xcdc   :  { %v2422_v37 = vmax.f32 %v5812_v48, -1e+30 }
 0xcde   :  { %2423 = vmax.xlane.f32.xlu1 %v2422_v37 }
 0xd56   :  { %v2409_v28 = vpop.xlane.xlu0 %2408 }
 0xd57   :  { %v2425_v26 = vsub.f32 %v2366_v25, %v2409_v28  ;;  %v2426_v9 = vsub.f32 -1e+30, %v2409_v28 }
 0xd59   :  { %v2437_v15 = vmul.f32 1.442695, %v2425_v26  ;;  %v2439_v27 = vmul.f32 1.442695, %v2426_v9 }
 0xd5b   :  { %4767 = vpow2.f32 %v2437_v15  ;;  %v2412_v29 = vpop.xlane.xlu1 %2411  ;;  %v6273_v15 = vpack.c.bf16 %v5641_v53, %v5653_v0 }
 0xd5c   :  { %4769 = vpow2.f32 %v2439_v27  ;;  %v2427_v33 = vsub.f32 -1e+30, %v2412_v29  ;;  %v2428_v57 = vsub.f32 %v2369_v50, %v2412_v29 }
 0xd5e   :  { %v2441_v24 = vmul.f32 1.442695, %v2427_v33  ;;  %v2443_v49 = vmul.f32 1.442695, %v2428_v57  ;;  %v2415_v59 = vpop.xlane.xlu0 %2414 }
 0xd5f   :  { %v2429_v62 = vsub.f32 %v2370_v58, %v2415_v59  ;;  %v2430_v30 = vsub.f32 -1e+30, %v2415_v59 }
 0xd60   :  { %4771 = vpow2.f32 %v2441_v24 }
 0xd61   :  { %4773 = vpow2.f32 %v2443_v49  ;;  %v2447_v10 = vmul.f32 1.442695, %v2430_v30  ;;  %v2445_v4 = vmul.f32 1.442695, %v2429_v62  ;;  %v6274_v30 = vmov 0.0  }
 0xd62   :  { %v2418_v37 = vpop.xlane.xlu1 %2417 }
 0xd63   :  { %v2431_v25 = vsub.f32 %v5806_v45, %v2418_v37  ;;  %v2432_v51 = vsub.f32 -1e+30, %v2418_v37  ;;  %4775 = vpow2.f32 %v2447_v10 }
 0xd64   :  { %4777 = vpow2.f32 %v2445_v4 }
 0xd65   :  { %v5843_v60 = vpop.eup %4767  ;;  %v2451_v35 = vmul.f32 1.442695, %v2432_v51  ;;  %v2449_v50 = vmul.f32 1.442695, %v2431_v25 }
 0xd66   :  { %v5845_v40 = vpop.eup %4769 }
 0xd67   :  { %2549 = vmatprep.mubr.f32.mxu0 %v5845_v40  ;;  %v2421_v58 = vpop.xlane.xlu0 %2420  ;;  %4779 = vpow2.f32 %v2451_v35 }
 0xd68   :  { %2550 = vmatmul.mubr.f32.vlgmr.msra.gmra.mrb[28].mxu0 %v5843_v60  ;;  %v2433_v42 = vsub.f32 -1e+30, %v2421_v58  ;;  %v2434_v28 = vsub.f32 %v5809_v11, %v2421_v58  ;;  %4781 = vpow2.f32 %v2449_v50 }
 0xd69   :  { %4619 = vmatpush1.bf16.msk.msra.mxu0 %vm4614_vm0, %v6268_v19 }
 0xd6a   :  { %v5856_v45 = vpop.eup %4771  ;;  %v2453_v26 = vmul.f32 1.442695, %v2433_v42  ;;  %v2455_v9 = vmul.f32 1.442695, %v2434_v28  ;;  %4621 = vmatprep.subr.bf16.mxu0 %v6273_v15 }
 0xd6b   :  { %v5861_v27 = vpop.eup %4773  ;;  %v2424_v29 = vpop.xlane.xlu1 %2423 }
 0xd6c   :  { %4783 = vpow2.f32 %v2453_v26  ;;  %2554 = vmatprep.mubr.f32.mxu0 %v5861_v27  ;;  %v2435_v11 = vsub.f32 -1e+30, %v2424_v29  ;;  %v2436_v18 = vsub.f32 %v5812_v48, %v2424_v29  ;;  %v6275_v29 = vpack.c.bf16 %v5602_v43, %v5614_v41 }
 0xd6d   :  { %4785 = vpow2.f32 %v2455_v9  ;;  %2555 = vmatmul.mubr.f32.gmra.mrb[30].mxu0 %v5856_v45  ;;  %v5866_v61 = vpop.eup %4775  ;;  %v6278_v41 = vpack.c.bf16 %v5647_v2, %v5659_v52  ;;  %v6283_v52 = vld [vmem:[#allocation12_spill] sm:$0xff] }
 0xd6e   :  { %v2457_v33 = vmul.f32 1.442695, %v2435_v11  ;;  %v2459_v57 = vmul.f32 1.442695, %v2436_v18  ;;  %2559 = vmatprep.mubr.f32.mxu0 %v5866_v61  ;;  %v5869_v53 = vpop.eup %4777  ;;  %v6276_v11 = vpack.c.bf16 %v5644_v21, %v5656_v38 }
 0xd70   :  { %4787 = vpow2.f32 %v2457_v33 }
 0xd71   :  { %4789 = vpow2.f32 %v2459_v57  ;;  %2560 = vmatmul.mubr.f32.gmra.mrb[32].mxu0 %v5869_v53  ;;  %v5872_v0 = vpop.eup %4779 }
 0xd72   :  { %2564 = vmatprep.mubr.f32.mxu0 %v5872_v0  ;;  %v5875_v48 = vpop.eup %4781 }
 0xd75   :  { %2565 = vmatmul.mubr.f32.gmra.mrb[34].mxu0 %v5875_v48 }
 0xd76   :  { %v5878_v24 = vpop.eup %4783 }
 0xd77   :  { %v5880_v49 = vpop.eup %4785 }
 0xd78   :  { %2569 = vmatprep.mubr.f32.mxu0 %v5880_v49 }
 0xd79   :  { %2570 = vmatmul.mubr.f32.gmra.mrb[36].mxu0 %v5878_v24 }
 0xd7a   :  { %v5884_v59 = vpop.eup %4787 }
 0xd7b   :  { %v5886_v62 = vpop.eup %4789 }
 0xd7c   :  { %2574 = vmatprep.mubr.f32.mxu0 %v5886_v62 }
 0xd7d   :  { %2575 = vmatmul.mubr.f32.gmra.mrb[38].mxu0 %v5884_v59 }
 0xd7e   :  { %2668 = vmatprep.mubr.f32.mxu0 %v6274_v30 }
 0xe3b   :  { %v2551_v10 = vpop.f32.mrb[28].mxu0 }
 0xe3c   :  { %v2552_v4 = vadd.f32 1e-30, %v2551_v10  ;;  %v2553_v37 = vpop.f32.mrb[29].mxu0 }
 0xe3e   :  { %4791 = vrcp.f32 %v2552_v4  ;;  %v6277_v4 = vpack.c.bf16 %v5605_v55, %v5617_v44  ;;  %v6281_v55 = vpack.c.bf16 %v5650_v8, %v5662_v31  ;;  %v6282_v44 = vpack.c.bf16 %v5611_v14, %v5623_v12 }
 0xe3f   :  { %v6288_v8 = vpack.c.bf16 %v5698_v56, %v5695_v47  ;;  %v6289_v12 = vpack.c.bf16 %v5701_v7, %v5632_v20 }
 0xe40   :  { %v2556_v25 = vpop.f32.mrb[30].mxu0 }
 0xe41   :  { %v2557_v51 = vadd.f32 1e-30, %v2556_v25  ;;  %v2558_v35 = vpop.f32.mrb[31].mxu0  ;;  %v6279_v25 = vld [vmem:[#allocation9_spill] sm:$0xff] }
 0xe43   :  { %4793 = vrcp.f32 %v2557_v51  ;;  %v6280_v51 = vpack.c.bf16 %v5608_v39, %v6279_v25  ;;  %v6284_v39 = vpack.c.bf16 %v5675_v5, %v6283_v52  ;;  %v6290_v5 = vpack.c.bf16 %v5713_v6, %v5710_v22 }
 0xe44   :  { %v2561_v50 = vpop.f32.mrb[32].mxu0 }
 0xe45   :  { %v2562_v58 = vadd.f32 1e-30, %v2561_v50  ;;  %v2563_v42 = vpop.f32.mrb[33].mxu0  ;;  %v6285_v50 = vld [vmem:[#allocation11_spill] sm:$0xff] }
 0xe47   :  { %4795 = vrcp.f32 %v2562_v58  ;;  %v6286_v58 = vld [vmem:[#allocation10_spill] sm:$0xff] }
 0xe48   :  { %v4792_v28 = vpop.eup %4791  ;;  %v2566_v26 = vpop.f32.mrb[34].mxu0  ;;  %v6287_v31 = vpack.c.bf16 %v6285_v50, %v6286_v58 }
 0xe49   :  { %v2567_v9 = vadd.f32 1e-30, %v2566_v26  ;;  %v2568_v15 = vpop.f32.mrb[35].mxu0  ;;  %3655 = vmatmul.mubr.msk.f32.vlgmr.msra.gmra.mrb[40].mxu0 %vm972_vm14, %v4792_v28 }
 0xe4a   :  { %4623 = vmatpush3.bf16.msra.mxu0 %v6275_v29  ;;  %2674 = vmatprep.mubr.f32.mxu0 %v6274_v30 }
 0xe4b   :  { %4797 = vrcp.f32 %v2567_v9  ;;  %4625 = vmatprep.subr.bf16.mxu0 %v6276_v11 }
 0xe4c   :  { %v2571_v18 = vpop.f32.mrb[36].mxu0 }
 0xe4d   :  { %v4794_v33 = vpop.eup %4793  ;;  %v2572_v57 = vadd.f32 1e-30, %v2571_v18  ;;  %v2573_v10 = vpop.f32.mrb[37].mxu0 }
 0xe4e   :  { %4627 = vmatpush3.bf16.msra.mxu0 %v6277_v4 }
 0xe4f   :  { %4799 = vrcp.f32 %v2572_v57  ;;  %3656 = vmatmul.mubr.msk.f32.gmra.mrb[42].mxu0 %vm972_vm14, %v4794_v33  ;;  %4629 = vmatprep.subr.bf16.mxu0 %v6278_v41 }
 0xe50   :  { %v2576_v43 = vpop.f32.mrb[38].mxu0  ;;  %2680 = vmatprep.mubr.f32.mxu0 %v6274_v30 }
 0xe51   :  { %v4796_v21 = vpop.eup %4795  ;;  %v2577_v38 = vadd.f32 1e-30, %v2576_v43  ;;  %v2578_v37 = vpop.f32.mrb[39].mxu0 }
 0xe52   :  { %4631 = vmatpush3.bf16.msra.mxu0 %v6280_v51 }
 0xe53   :  { %4801 = vrcp.f32 %v2577_v38  ;;  %3657 = vmatmul.mubr.msk.f32.gmra.mrb[44].mxu0 %vm972_vm14, %v4796_v21  ;;  %4633 = vmatprep.subr.bf16.mxu0 %v6281_v55 }
 0xe54   :  { %2686 = vmatprep.mubr.f32.mxu0 %v6274_v30 }
 0xe55   :  { %v4798_v2 = vpop.eup %4797 }
 0xe56   :  { %4635 = vmatpush3.bf16.msra.mxu0 %v6282_v44 }
 0xe57   :  { %3658 = vmatmul.mubr.msk.f32.gmra.mrb[46].mxu0 %vm972_vm14, %v4798_v2  ;;  %4637 = vmatprep.subr.bf16.mxu0 %v6284_v39 }
 0xe58   :  { %2692 = vmatprep.mubr.f32.mxu0 %v6274_v30 }
 0xe59   :  { %v4800_v35 = vpop.eup %4799 }
 0xe5a   :  { %4639 = vmatpush3.bf16.msra.mxu0 %v6287_v31 }
 0xe5b   :  { %3659 = vmatmul.mubr.msk.f32.gmra.mrb[48].mxu0 %vm972_vm14, %v4800_v35  ;;  %4641 = vmatprep.subr.bf16.mxu0 %v6288_v8 }
 0xe5c   :  { %2698 = vmatprep.mubr.f32.mxu0 %v6274_v30 }
 0xe5d   :  { %v4802_v14 = vpop.eup %4801 }
 0xe5e   :  { %4643 = vmatpush3.bf16.msra.mxu0 %v6289_v12 }
 0xe5f   :  { %3660 = vmatmul.mubr.msk.f32.gmra.mrb[50].mxu0 %vm972_vm14, %v4802_v14  ;;  %4645 = vmatprep.subr.bf16.mxu0 %v4644_v63 }
 0xe62   :  { %4647 = vmatpush3.bf16.msra.mxu0 %v6290_v5 }
 0xe63   :  { %4649 = vmatprep.subr.bf16.mxu0 %v4648_v46 }
 0xe66   :  { %4651 = vmatpush3.bf16.msra.mxu0 %v4650_v54 }
 0xe67   :  { %4661 = vmatprep.subr.msk.bf16.mxu0 %vm5948_vm4, %v6268_v19 }
 0xf1c   :  { %v2670_v63 = vpop.f32.mrb[40].mxu0 }
 0xf1d   :  { %v2672_v3 = vpop.f32.mrb[41].mxu0  ;;  %v2705_v6 = vmul.f32 %v5843_v60, %v2670_v63 }
 0xf1e   :  { %v2706_v1 = vmul.f32 %v5845_v40, %v2672_v3 }
 0xf20   :  { %2781 = vmatprep.mubr.f32.mxu0 %v2706_v1 }
 0xf21   :  { %2782 = vmatmul.mubr.f32.vlgmr.msra.gmra.mrb[52].mxu0 %v2705_v6 }
 0xf22   :  { %v2676_v46 = vpop.f32.mrb[42].mxu0  ;;  %4663 = vmatpush3.bf16.msk.msra.mxu0 %vm5948_vm4, %v6268_v19 }
 0xf23   :  { %v2678_v16 = vpop.f32.mrb[43].mxu0  ;;  %4665 = vmatprep.subr.msk.bf16.mxu0 %vm5948_vm4, %v6268_v19  ;;  %v2707_v22 = vmul.f32 %v5856_v45, %v2676_v46 }
 0xf24   :  { %v2708_v13 = vmul.f32 %v5861_v27, %v2678_v16  ;;  %v3661_v16 = vld [vmem:[%s6226_s4 + $0xe] ss:$0 sm:$0xff] }
 0xf26   :  { %v2682_v47 = vpop.f32.mrb[44].mxu0  ;;  %2786 = vmatprep.mubr.f32.mxu0 %v2708_v13  ;;  %4667 = vmatpush3.bf16.msk.msra.mxu0 %vm5948_vm4, %v6268_v19 }
 0xf27   :  { %v2684_v56 = vpop.f32.mrb[45].mxu0  ;;  %2787 = vmatmul.mubr.f32.gmra.mrb[54].mxu0 %v2707_v22  ;;  %4669 = vmatprep.subr.msk.bf16.mxu0 %vm5948_vm4, %v6268_v19  ;;  %v2709_v23 = vmul.f32 %v5869_v53, %v2682_v47 }
 0xf28   :  { %v2710_v7 = vmul.f32 %v5866_v61, %v2684_v56 }
 0xf2a   :  { %v2688_v36 = vpop.f32.mrb[46].mxu0  ;;  %2791 = vmatprep.mubr.f32.mxu0 %v2710_v7  ;;  %4671 = vmatpush3.bf16.msk.msra.mxu0 %vm5948_vm4, %v6268_v19 }
 0xf2b   :  { %v2690_v54 = vpop.f32.mrb[47].mxu0  ;;  %2792 = vmatmul.mubr.f32.gmra.mrb[56].mxu0 %v2709_v23  ;;  %4673 = vmatprep.subr.msk.bf16.mxu0 %vm5948_vm4, %v6268_v19  ;;  %v2711_v40 = vmul.f32 %v5875_v48, %v2688_v36  ;;  %v6294_v36 = vld [vmem:[#allocation7_spill] sm:$0xff] }
 0xf2c   :  { %v2712_v60 = vmul.f32 %v5872_v0, %v2690_v54 }
 0xf2e   :  { %v2694_v45 = vpop.f32.mrb[48].mxu0  ;;  %2796 = vmatprep.mubr.f32.mxu0 %v2712_v60  ;;  %4675 = vmatpush3.bf16.msk.msra.mxu0 %vm5948_vm4, %v6268_v19 }
 0xf2f   :  { %v2696_v27 = vpop.f32.mrb[49].mxu0  ;;  %2797 = vmatmul.mubr.f32.gmra.mrb[58].mxu0 %v2711_v40  ;;  %4677 = vmatprep.subr.msk.bf16.mxu0 %vm5948_vm4, %v6268_v19  ;;  %v2713_v53 = vmul.f32 %v5878_v24, %v2694_v45  ;;  %v1768_v24 = vld [vmem:[%s6222_s3 + $0x150] sm:$0xff] }
 0xf30   :  { %v2714_v61 = vmul.f32 %v5880_v49, %v2696_v27  ;;  %v1769_v49 = vld [vmem:[%s6222_s3 + $0x158] sm:$0xff] }
 0xf32   :  { %v2700_v30 = vpop.f32.mrb[50].mxu0  ;;  %2801 = vmatprep.mubr.f32.mxu0 %v2714_v61  ;;  %4679 = vmatpush3.bf16.msk.msra.mxu0 %vm5948_vm4, %v6268_v19 }
 0xf33   :  { %v2702_v0 = vpop.f32.mrb[51].mxu0  ;;  %2802 = vmatmul.mubr.f32.gmra.mrb[60].mxu0 %v2713_v53  ;;  %4681 = vmatprep.subr.msk.bf16.mxu0 %vm5948_vm4, %v6268_v19  ;;  %v2715_v42 = vmul.f32 %v5884_v59, %v2700_v30  ;;  %v6295_v30 = vld [vmem:[#allocation4_spill] sm:$0xff] }
 0xf34   :  { %v2716_v48 = vmul.f32 %v5886_v62, %v2702_v0 }
 0xf36   :  { %2806 = vmatprep.mubr.f32.mxu0 %v2716_v48  ;;  %4683 = vmatpush3.bf16.msk.msra.mxu0 %vm5948_vm4, %v6268_v19 }
 0xf37   :  { %2807 = vmatmul.mubr.f32.gmra.mrb[62].mxu0 %v2715_v42  ;;  %4685 = vmatprep.subr.msk.bf16.mxu0 %vm5948_vm4, %v6268_v19 }
 0xf38   :  { %2999 = vmatprep.mubr.f32.mxu0 %v2706_v1 }
 0xf3a   :  { %4687 = vmatpush3.bf16.msk.msra.mxu0 %vm5948_vm4, %v6268_v19 }
 0xf3b   :  { %4689 = vmatprep.subr.msk.bf16.mxu0 %vm5948_vm4, %v6268_v19 }
 0xf3e   :  { %4691 = vmatpush3.bf16.msk.msra.mxu0 %vm5948_vm4, %v6268_v19  ;;  %v4656_v19 = vpack.c.bf16 %v1769_v49, %v1768_v24 }
 0xf40   :  { %4657 = vmatprep.subr.bf16.mxu1 %v4656_v19 }
 0xf41   :  { %3000 = vmatmul.mubr.f32.vlgmr.msra.gmra.mrb[64].mxu0 %v2705_v6  ;;  %4659 = vmatpush3.bf16.msra.mxu1 %v4656_v19 }
 0xf42   :  { %3004 = vmatprep.mubr.f32.mxu0 %v2708_v13 }
 0xf45   :  { %3005 = vmatmul.mubr.f32.gmra.mrb[66].mxu0 %v2707_v22 }
 0xf46   :  { %3009 = vmatprep.mubr.f32.mxu0 %v2710_v7  ;;  %v6293_v7 = vld [vmem:[#allocation8_spill] sm:$0xff] }
 0xf49   :  { %3010 = vmatmul.mubr.f32.gmra.mrb[68].mxu0 %v2709_v23 }
 0xf4a   :  { %3014 = vmatprep.mubr.f32.mxu0 %v2712_v60 }
 0xf4d   :  { %3015 = vmatmul.mubr.f32.gmra.mrb[70].mxu0 %v2711_v40 }
 0xf4e   :  { %3019 = vmatprep.mubr.f32.mxu0 %v2714_v61 }
 0xf51   :  { %3020 = vmatmul.mubr.f32.gmra.mrb[72].mxu0 %v2713_v53 }
 0xf52   :  { %3024 = vmatprep.mubr.f32.mxu0 %v2716_v48  ;;  %v6296_v48 = vld [vmem:[#allocation3_spill] sm:$0xff] }
 0xf55   :  { %3025 = vmatmul.mubr.f32.gmra.mrb[74].mxu0 %v2715_v42 }
 0xff4   :  { %v3954_v59 = vpop.f32.mrb[52].mxu0 }
 0xff5   :  { %v3955_v62 = vpop.f32.mrb[53].mxu0 }
 0xff6   :  { %v3956_v28 = vadd.f32 %v3955_v62, %v3954_v59 }
 0xff8   :  { %4333 = vmatprep.mubr.msk.f32.mxu1 %vm240_vm1, %v3956_v28 }
 0xffa   :  { %v3957_v26 = vpop.f32.mrb[54].mxu0 }
 0xffb   :  { %v3958_v9 = vpop.f32.mrb[55].mxu0 }
 0xffc   :  { %v3959_v15 = vadd.f32 %v3958_v9, %v3957_v26  ;;  %v6297_v26 = vld [vmem:[#allocation6_spill] sm:$0xff] }
 0xffe   :  { %v3960_v29 = vpop.f32.mrb[56].mxu0  ;;  %4334 = vmatmul.mubr.msk.f32.vlgmr.msra.gmra.mrb[54].mxu1 %vm240_vm1, %v3959_v15  ;;  %v6298_v15 = vld [vmem:[#allocation5_spill] sm:$0xff] }
 0xfff   :  { %v3961_v11 = vpop.f32.mrb[57].mxu0 }
0x1000   :  { %v3962_v18 = vadd.f32 %v3961_v11, %v3960_v29 }
0x1002   :  { %v3963_v33 = vpop.f32.mrb[58].mxu0  ;;  %4336 = vmatprep.mubr.msk.f32.mxu1 %vm240_vm1, %v3962_v18 }
0x1003   :  { %v3964_v57 = vpop.f32.mrb[59].mxu0 }
0x1004   :  { %v3965_v10 = vadd.f32 %v3964_v57, %v3963_v33 }
0x1006   :  { %v3966_v4 = vpop.f32.mrb[60].mxu0  ;;  %4337 = vmatmul.mubr.msk.f32.gmra.mrb[56].mxu1 %vm240_vm1, %v3965_v10 }
0x1007   :  { %v3967_v41 = vpop.f32.mrb[61].mxu0 }
0x1008   :  { %v3968_v43 = vadd.f32 %v3967_v41, %v3966_v4 }
0x100a   :  { %v3969_v21 = vpop.f32.mrb[62].mxu0  ;;  %4339 = vmatprep.mubr.msk.f32.mxu1 %vm240_vm1, %v3968_v43 }
0x100b   :  { %v3970_v38 = vpop.f32.mrb[63].mxu0 }
0x100c   :  { %v3971_v37 = vadd.f32 %v3970_v38, %v3969_v21 }
0x100e   :  { %4340 = vmatmul.mubr.msk.f32.gmra.mrb[58].mxu1 %vm240_vm1, %v3971_v37 }
0x1014   :  { %v4014_v25 = vpop.f32.mrb[64].mxu0 }
0x1015   :  { %v4015_v51 = vpop.f32.mrb[65].mxu0 }
0x1016   :  { %v4016_v55 = vadd.f32 %v4015_v51, %v4014_v25 }
0x1018   :  { %v3030_v2 = vmul.f32 0.125, %v4016_v55  ;;  %v4017_v44 = vpop.f32.mrb[66].mxu0 }
0x1019   :  { %v4018_v52 = vpop.f32.mrb[67].mxu0 }
0x101a   :  { %3490 = vst.msk [vmem:[%s6227_s6] sm:$0xff] %vm972_vm14, %v3030_v2  ;;  %v4019_v39 = vadd.f32 %v4018_v52, %v4017_v44 }
0x101c   :  { %v3031_v35 = vmul.f32 0.125, %v4019_v39  ;;  %v4020_v50 = vpop.f32.mrb[68].mxu0 }
0x101d   :  { %v4021_v58 = vpop.f32.mrb[69].mxu0 }
0x101e   :  { %3491 = vst.msk [vmem:[%s6227_s6 + $0x8] sm:$0xff] %vm972_vm14, %v3031_v35  ;;  %v4022_v31 = vadd.f32 %v4021_v58, %v4020_v50 }
0x1020   :  { %v3032_v8 = vmul.f32 0.125, %v4022_v31  ;;  %v4023_v14 = vpop.f32.mrb[70].mxu0 }
0x1021   :  { %v4024_v12 = vpop.f32.mrb[71].mxu0 }
0x1022   :  { %3492 = vst.msk [vmem:[%s6227_s6 + $0x10] sm:$0xff] %vm972_vm14, %v3032_v8  ;;  %v4025_v5 = vadd.f32 %v4024_v12, %v4023_v14 }
0x1024   :  { %v3033_v20 = vmul.f32 0.125, %v4025_v5  ;;  %v4026_v32 = vpop.f32.mrb[72].mxu0 }
0x1025   :  { %v4027_v34 = vpop.f32.mrb[73].mxu0 }
0x1026   :  { %3493 = vst.msk [vmem:[%s6227_s6 + $0x18] sm:$0xff] %vm972_vm14, %v3033_v20  ;;  %v4028_v17 = vadd.f32 %v4027_v34, %v4026_v32 }
0x1028   :  { %v3034_v63 = vmul.f32 0.125, %v4028_v17  ;;  %v4029_v3 = vpop.f32.mrb[74].mxu0 }
0x1029   :  { %v4030_v1 = vpop.f32.mrb[75].mxu0 }
0x102a   :  { %3494 = vst.msk [vmem:[%s6227_s6 + $0x20] sm:$0xff] %vm972_vm14, %v3034_v63  ;;  %v4031_v6 = vadd.f32 %v4030_v1, %v4029_v3  ;;  %v1770_v1 = vld [vmem:[%s6222_s3 + $0x160] sm:$0xff] }
0x102c   :  { %v3035_v46 = vmul.f32 0.125, %v4031_v6  ;;  %v1771_v6 = vld [vmem:[%s6222_s3 + $0x168] sm:$0xff] }
0x102e   :  { %3495 = vst.msk [vmem:[%s6227_s6 + $0x28] sm:$0xff] %vm972_vm14, %v3035_v46  ;;  %v4692_v46 = vpack.c.bf16 %v1771_v6, %v1770_v1 }
0x1030   :  { %4693 = vmatprep.subr.bf16.mxu1 %v4692_v46 }
0x1031   :  { %4695 = vmatpush3.bf16.msra.mxu1 %v4692_v46 }
0x10d1   :  { %v4335_v13 = vpop.f32.mrb[54].mxu1 }
0x10d2   :  { %v2906_v22 = vadd.f32 %v4335_v13, %v3661_v16  ;;  %v2900_v47 = vpop.f32.mrb[55].mxu1  ;;  %v1773_v13 = vld [vmem:[%s6222_s3 + $0x178] sm:$0xff] }
0x10d3   :  { %v2901_v56 = vadd.f32 %v3661_v16, %v2900_v47  ;;  %v1774_v47 = vld [vmem:[%s6222_s3 + $0x180] sm:$0xff] }
0x10d4   :  { %v3037_v23 = vadd.f32 %v2906_v22, %v6293_v7 }
0x10d5   :  { %v3036_v54 = vadd.f32 %v2901_v56, %v6294_v36  ;;  %v1775_v56 = vld [vmem:[%s6222_s3 + $0x188] sm:$0xff] }
0x10d6   :  { %v3045_v60 = vsel %vm240_vm1, %v3037_v23, 0.0  ;;  %v4700_v7 = vpack.c.bf16 %v1775_v56, %v1774_v47 }
0x10d7   :  { %3046 = vadd.xlane.f32.xlu1 %v3045_v60  ;;  %v3042_v40 = vsel %vm240_vm1, %v3036_v54, 0.0 }
0x10d8   :  { %3043 = vadd.xlane.f32.xlu0 %v3042_v40 }
0x10d9   :  { %v4338_v45 = vpop.f32.mrb[56].mxu1 }
0x10da   :  { %v2916_v27 = vadd.f32 %v4338_v45, %v3661_v16  ;;  %v2910_v61 = vpop.f32.mrb[57].mxu1 }
0x10db   :  { %v2911_v53 = vadd.f32 %v3661_v16, %v2910_v61 }
0x10dc   :  { %v3039_v0 = vadd.f32 %v2916_v27, %v6295_v30 }
0x10dd   :  { %v3038_v42 = vadd.f32 %v2911_v53, %v6296_v48 }
0x10de   :  { %v3051_v24 = vsel %vm240_vm1, %v3039_v0, 0.0 }
0x10df   :  { %3052 = vadd.xlane.f32.xlu1 %v3051_v24  ;;  %v3048_v49 = vsel %vm240_vm1, %v3038_v42, 0.0  ;;  %v3702_v24 = vld [vmem:[%s6226_s4 + $0xf] ss:$0 sm:$0xff] }
0x10e0   :  { %3049 = vadd.xlane.f32.xlu0 %v3048_v49 }
0x10e1   :  { %v4341_v19 = vpop.f32.mrb[58].mxu1 }
0x10e2   :  { %v2926_v59 = vadd.f32 %v4341_v19, %v3661_v16  ;;  %v2920_v62 = vpop.f32.mrb[59].mxu1 }
0x10e3   :  { %v2921_v28 = vadd.f32 %v3661_v16, %v2920_v62  ;;  %v1772_v16 = vld [vmem:[%s6222_s3 + $0x170] sm:$0xff] }
0x10e4   :  { %v3041_v9 = vadd.f32 %v2926_v59, %v6297_v26  ;;  %v4696_v22 = vpack.c.bf16 %v1773_v13, %v1772_v16 }
0x10e5   :  { %v3040_v29 = vadd.f32 %v2921_v28, %v6298_v15 }
0x10e6   :  { %v3057_v11 = vsel %vm240_vm1, %v3041_v9, 0.0  ;;  %4697 = vmatprep.subr.bf16.mxu1 %v4696_v22 }
0x10e7   :  { %3058 = vadd.xlane.f32.xlu1 %v3057_v11  ;;  %v3054_v18 = vsel %vm240_vm1, %v3040_v29, 0.0  ;;  %4699 = vmatpush3.bf16.msra.mxu1 %v4696_v22 }
0x10e8   :  { %3055 = vadd.xlane.f32.xlu0 %v3054_v18  ;;  %4701 = vmatprep.subr.bf16.mxu1 %v4700_v7 }
0x1164   :  { %v3047_v33 = vpop.xlane.xlu1 %3046 }
0x1165   :  { %v3061_v57 = vmul.f32 0.03125, %v3047_v33  ;;  %v3044_v10 = vpop.xlane.xlu0 %3043  ;;  %v1776_v33 = vld [vmem:[%s6222_s3 + $0x190] sm:$0xff] }
0x1166   :  { %v3060_v4 = vmul.f32 0.03125, %v3044_v10 }
0x1167   :  { %v6072_v41 = vsub.f32 %v3037_v23, %v3061_v57  ;;  %v1777_v57 = vld [vmem:[%s6222_s3 + $0x198] sm:$0xff] }
0x1168   :  { %v6074_v43 = vsub.f32 %v3036_v54, %v3060_v4 }
0x1169   :  { %v3073_v21 = vmul.f32 %v6072_v41, %v6072_v41 }
0x116a   :  { %v3072_v38 = vmul.f32 %v6074_v43, %v6074_v43 }
0x116b   :  { %v3081_v37 = vsel %vm240_vm1, %v3073_v21, 0.0 }
0x116c   :  { %v3053_v25 = vpop.xlane.xlu1 %3052  ;;  %3082 = vadd.xlane.f32.xlu1 %v3081_v37  ;;  %v3078_v51 = vsel %vm240_vm1, %v3072_v38, 0.0  ;;  %v1778_v38 = vld [vmem:[%s6222_s3 + $0x1a0] sm:$0xff]  ;;  %v1779_v37 = vld [vmem:[%s6222_s3 + $0x1a8] sm:$0xff] }
0x116d   :  { %v3063_v55 = vmul.f32 0.03125, %v3053_v25  ;;  %v3050_v2 = vpop.xlane.xlu0 %3049  ;;  %3079 = vadd.xlane.f32.xlu0 %v3078_v51 }
0x116e   :  { %v3062_v44 = vmul.f32 0.03125, %v3050_v2 }
0x116f   :  { %v6082_v52 = vsub.f32 %v3039_v0, %v3063_v55 }
0x1170   :  { %v6084_v39 = vsub.f32 %v3038_v42, %v3062_v44  ;;  %v4708_v44 = vpack.c.bf16 %v1779_v37, %v1778_v38 }
0x1171   :  { %v3075_v35 = vmul.f32 %v6082_v52, %v6082_v52 }
0x1172   :  { %v3074_v50 = vmul.f32 %v6084_v39, %v6084_v39 }
0x1173   :  { %v3087_v58 = vsel %vm240_vm1, %v3075_v35, 0.0 }
0x1174   :  { %3088 = vadd.xlane.f32.xlu1 %v3087_v58  ;;  %v3059_v31 = vpop.xlane.xlu1 %3058  ;;  %v3084_v8 = vsel %vm240_vm1, %v3074_v50, 0.0 }
0x1175   :  { %v3065_v14 = vmul.f32 0.03125, %v3059_v31  ;;  %3085 = vadd.xlane.f32.xlu0 %v3084_v8  ;;  %v3056_v12 = vpop.xlane.xlu0 %3055 }
0x1176   :  { %v3064_v5 = vmul.f32 0.03125, %v3056_v12 }
0x1177   :  { %v6092_v20 = vsub.f32 %v3041_v9, %v3065_v14  ;;  %v3703_v9 = vld [vmem:[%s6226_s4 + $0x10] ss:$0 sm:$0xff] }
0x1178   :  { %v6094_v32 = vsub.f32 %v3040_v29, %v3064_v5 }
0x1179   :  { %v3077_v34 = vmul.f32 %v6092_v20, %v6092_v20 }
0x117a   :  { %v3076_v17 = vmul.f32 %v6094_v32, %v6094_v32 }
0x117b   :  { %v3093_v63 = vsel %vm240_vm1, %v3077_v34, 0.0 }
0x117c   :  { %3094 = vadd.xlane.f32.xlu1 %v3093_v63  ;;  %v3090_v3 = vsel %vm240_vm1, %v3076_v17, 0.0  ;;  %v1780_v17 = vld [vmem:[%s6222_s3 + $0x1b0] sm:$0xff]  ;;  %v1781_v63 = vld [vmem:[%s6222_s3 + $0x1b8] sm:$0xff] }
0x117d   :  { %3091 = vadd.xlane.f32.xlu0 %v3090_v3 }
0x11f9   :  { %v3083_v23 = vpop.xlane.xlu1 %3082 }
0x11fa   :  { %v3097_v36 = vmul.f32 0.03125, %v3083_v23  ;;  %v3080_v54 = vpop.xlane.xlu0 %3079 }
0x11fb   :  { %v3096_v60 = vmul.f32 0.03125, %v3080_v54 }
0x11fc   :  { %v3103_v40 = vadd.f32 1e-05, %v3097_v36 }
0x11fd   :  { %v3102_v45 = vadd.f32 1e-05, %v3096_v60 }
0x11fe   :  { %4803 = vrsqrt.f32 %v3103_v40 }
0x11ff   :  { %4805 = vrsqrt.f32 %v3102_v45 }
0x1201   :  { %v3089_v27 = vpop.xlane.xlu1 %3088 }
0x1202   :  { %v3099_v61 = vmul.f32 0.03125, %v3089_v27  ;;  %v3086_v53 = vpop.xlane.xlu0 %3085 }
0x1203   :  { %v3098_v30 = vmul.f32 0.03125, %v3086_v53  ;;  %v3711_v53 = vld [vmem:[%s6226_s4 + $0x12] ss:$0 sm:$0xff] }
0x1204   :  { %v3105_v0 = vadd.f32 1e-05, %v3099_v61 }
0x1205   :  { %v3104_v48 = vadd.f32 1e-05, %v3098_v30 }
0x1206   :  { %4807 = vrsqrt.f32 %v3105_v0 }
0x1207   :  { %4809 = vrsqrt.f32 %v3104_v48 }
0x1208   :  { %v4804_v42 = vpop.eup %4803 }
0x1209   :  { %v4806_v49 = vpop.eup %4805  ;;  %v3115_v19 = vmul.f32 %v4804_v42, %v6072_v41  ;;  %v3095_v59 = vpop.xlane.xlu1 %3094 }
0x120a   :  { %v3101_v62 = vmul.f32 0.03125, %v3095_v59  ;;  %v3092_v28 = vpop.xlane.xlu0 %3091  ;;  %v3114_v26 = vmul.f32 %v4806_v49, %v6074_v43  ;;  %v4704_v43 = vpack.c.bf16 %v1777_v57, %v1776_v33 }
0x120b   :  { %v3125_v15 = vmul.f32 %v3702_v24, %v3115_v19  ;;  %v3100_v29 = vmul.f32 0.03125, %v3092_v28 }
0x120c   :  { %v3107_v11 = vadd.f32 1e-05, %v3101_v62  ;;  %v3124_v18 = vmul.f32 %v3702_v24, %v3114_v26 }
0x120d   :  { %v3106_v10 = vadd.f32 1e-05, %v3100_v29  ;;  %v6136_v41 = vadd.f32 %v3703_v9, %v3125_v15 }
0x120e   :  { %4811 = vrsqrt.f32 %v3107_v11  ;;  %v6134_v4 = vadd.f32 %v3703_v9, %v3124_v18 }
0x120f   :  { %4813 = vrsqrt.f32 %v3106_v10 }
0x1210   :  { %v4808_v21 = vpop.eup %4807  ;;  %4350 = vmatprep.mubr.msk.f32.mxu1 %vm240_vm1, %v6134_v4 }
0x1211   :  { %v4810_v25 = vpop.eup %4809  ;;  %4351 = vmatmul.mubr.msk.f32.vlgmr.msra.gmra.mrb[60].mxu1 %vm240_vm1, %v6136_v41  ;;  %v3117_v51 = vmul.f32 %v4808_v21, %v6082_v52 }
0x1212   :  { %v3116_v55 = vmul.f32 %v4810_v25, %v6084_v39  ;;  %4703 = vmatpush3.bf16.msra.mxu1 %v4700_v7 }
0x1213   :  { %v3127_v2 = vmul.f32 %v3702_v24, %v3117_v51  ;;  %4705 = vmatprep.subr.bf16.mxu1 %v4704_v43 }
0x1214   :  { %v3126_v35 = vmul.f32 %v3702_v24, %v3116_v55 }
0x1215   :  { %v3137_v58 = vadd.f32 %v3703_v9, %v3127_v2 }
0x1216   :  { %v6150_v50 = vadd.f32 %v3703_v9, %v3126_v35  ;;  %4707 = vmatpush3.bf16.msra.mxu1 %v4704_v43 }
0x1217   :  { %4709 = vmatprep.subr.bf16.mxu1 %v4708_v44 }
0x1218   :  { %v4812_v31 = vpop.eup %4811  ;;  %4353 = vmatprep.mubr.msk.f32.mxu1 %vm240_vm1, %v6150_v50 }
0x1219   :  { %v4814_v8 = vpop.eup %4813  ;;  %4354 = vmatmul.mubr.msk.f32.gmra.mrb[62].mxu1 %vm240_vm1, %v3137_v58  ;;  %v3119_v52 = vmul.f32 %v4812_v31, %v6092_v20  ;;  %v4712_v20 = vpack.c.bf16 %v1781_v63, %v1780_v17 }
0x121a   :  { %v3118_v39 = vmul.f32 %v4814_v8, %v6094_v32  ;;  %4711 = vmatpush3.bf16.msra.mxu1 %v4708_v44  ;;  %v3704_v32 = vld [vmem:[%s6226_s4 + $0x11] ss:$0 sm:$0xff] }
0x121b   :  { %v3129_v14 = vmul.f32 %v3702_v24, %v3119_v52  ;;  %4713 = vmatprep.subr.bf16.mxu1 %v4712_v20 }
0x121c   :  { %v3128_v12 = vmul.f32 %v3702_v24, %v3118_v39 }
0x121d   :  { %v3139_v34 = vadd.f32 %v3703_v9, %v3129_v14 }
0x121e   :  { %v3138_v5 = vadd.f32 %v3703_v9, %v3128_v12  ;;  %4715 = vmatpush3.bf16.msra.mxu1 %v4712_v20 }
0x1220   :  { %4356 = vmatprep.mubr.msk.f32.mxu1 %vm240_vm1, %v3138_v5 }
0x1221   :  { %4357 = vmatmul.mubr.msk.f32.gmra.mrb[64].mxu1 %vm240_vm1, %v3139_v34 }
0x12e4   :  { %v4352_v3 = vpop.f32.mrb[60].mxu1 }
0x12e5   :  { %v3234_v1 = vadd.f32 %v4352_v3, %v3704_v32  ;;  %v3228_v6 = vpop.f32.mrb[61].mxu1 }
0x12e6   :  { %v3229_v46 = vadd.f32 %v3704_v32, %v3228_v6 }
0x12e7   :  { %v3258_v13 = vmax.f32 %v3234_v1, 0.0 }
0x12e8   :  { %v3257_v16 = vmax.f32 %v3229_v46, 0.0 }
0x12ea   :  { %4375 = vmatprep.mubr.msk.f32.mxu1 %vm1536_vm15, %v3257_v16 }
0x12eb   :  { %4376 = vmatmul.mubr.msk.f32.vlgmr.msra.gmra.mrb[66].mxu1 %vm1536_vm15, %v3258_v13 }
0x12ec   :  { %v4355_v22 = vpop.f32.mrb[62].mxu1 }
0x12ed   :  { %v3244_v47 = vadd.f32 %v4355_v22, %v3704_v32  ;;  %v3238_v56 = vpop.f32.mrb[63].mxu1 }
0x12ee   :  { %v3239_v7 = vadd.f32 %v3704_v32, %v3238_v56 }
0x12ef   :  { %v3260_v36 = vmax.f32 %v3244_v47, 0.0 }
0x12f0   :  { %v3259_v23 = vmax.f32 %v3239_v7, 0.0 }
0x12f2   :  { %4378 = vmatprep.mubr.msk.f32.mxu1 %vm1536_vm15, %v3259_v23 }
0x12f3   :  { %4379 = vmatmul.mubr.msk.f32.gmra.mrb[68].mxu1 %vm1536_vm15, %v3260_v36 }
0x12f4   :  { %v4358_v54 = vpop.f32.mrb[64].mxu1 }
0x12f5   :  { %v3254_v60 = vadd.f32 %v4358_v54, %v3704_v32  ;;  %v3248_v40 = vpop.f32.mrb[65].mxu1 }
0x12f6   :  { %v3249_v45 = vadd.f32 %v3704_v32, %v3248_v40 }
0x12f7   :  { %v3262_v61 = vmax.f32 %v3254_v60, 0.0 }
0x12f8   :  { %v3261_v27 = vmax.f32 %v3249_v45, 0.0 }
0x12fa   :  { %4381 = vmatprep.mubr.msk.f32.mxu1 %vm1536_vm15, %v3261_v27 }
0x12fb   :  { %4382 = vmatmul.mubr.msk.f32.gmra.mrb[70].mxu1 %vm1536_vm15, %v3262_v61 }
0x13be   :  { %v4377_v30 = vpop.f32.mrb[66].mxu1 }
0x13bf   :  { %v3357_v0 = vadd.f32 %v4377_v30, %v3711_v53  ;;  %v3351_v48 = vpop.f32.mrb[67].mxu1 }
0x13c0   :  { %v3352_v42 = vadd.f32 %v3711_v53, %v3351_v48 }
0x13c1   :  { %v3381_v24 = vadd.f32 %v3357_v0, %v6136_v41 }
0x13c2   :  { %v3380_v49 = vadd.f32 %v3352_v42, %v6134_v4  ;;  %v3718_v42 = vld [vmem:[%s6226_s4 + $0x13] ss:$0 sm:$0xff] }
0x13c3   :  { %v3389_v19 = vsel %vm240_vm1, %v3381_v24, 0.0 }
0x13c4   :  { %3390 = vadd.xlane.f32.xlu1 %v3389_v19  ;;  %v3386_v59 = vsel %vm240_vm1, %v3380_v49, 0.0 }
0x13c5   :  { %3387 = vadd.xlane.f32.xlu0 %v3386_v59  ;;  %v3719_v59 = vld [vmem:[%s6226_s4 + $0x14] ss:$0 sm:$0xff] }
0x13c6   :  { %v4380_v62 = vpop.f32.mrb[68].mxu1 }
0x13c7   :  { %v3367_v28 = vadd.f32 %v4380_v62, %v3711_v53  ;;  %v3361_v26 = vpop.f32.mrb[69].mxu1 }
0x13c8   :  { %v3362_v9 = vadd.f32 %v3711_v53, %v3361_v26 }
0x13c9   :  { %v3383_v15 = vadd.f32 %v3367_v28, %v3137_v58 }
0x13ca   :  { %v3382_v29 = vadd.f32 %v3362_v9, %v6150_v50 }
0x13cb   :  { %v3395_v11 = vsel %vm240_vm1, %v3383_v15, 0.0 }
0x13cc   :  { %3396 = vadd.xlane.f32.xlu1 %v3395_v11  ;;  %v3392_v18 = vsel %vm240_vm1, %v3382_v29, 0.0 }
0x13cd   :  { %3393 = vadd.xlane.f32.xlu0 %v3392_v18 }
0x13ce   :  { %v4383_v33 = vpop.f32.mrb[70].mxu1 }
0x13cf   :  { %v3377_v57 = vadd.f32 %v4383_v33, %v3711_v53  ;;  %v3371_v10 = vpop.f32.mrb[71].mxu1 }
0x13d0   :  { %v3372_v4 = vadd.f32 %v3711_v53, %v3371_v10 }
0x13d1   :  { %v3385_v41 = vadd.f32 %v3377_v57, %v3139_v34 }
0x13d2   :  { %v3384_v43 = vadd.f32 %v3372_v4, %v3138_v5 }
0x13d3   :  { %v3401_v21 = vsel %vm240_vm1, %v3385_v41, 0.0 }
0x13d4   :  { %3402 = vadd.xlane.f32.xlu1 %v3401_v21  ;;  %v3398_v38 = vsel %vm240_vm1, %v3384_v43, 0.0 }
0x13d5   :  { %3399 = vadd.xlane.f32.xlu0 %v3398_v38 }
0x1451   :  { %v3391_v37 = vpop.xlane.xlu1 %3390 }
0x1452   :  { %v3405_v25 = vmul.f32 0.03125, %v3391_v37  ;;  %v3388_v51 = vpop.xlane.xlu0 %3387 }
0x1453   :  { %v3404_v55 = vmul.f32 0.03125, %v3388_v51 }
0x1454   :  { %v3411_v2 = vsub.f32 %v3381_v24, %v3405_v25 }
0x1455   :  { %v3410_v44 = vsub.f32 %v3380_v49, %v3404_v55 }
0x1456   :  { %v3417_v35 = vmul.f32 %v3411_v2, %v3411_v2 }
0x1457   :  { %v3416_v50 = vmul.f32 %v3410_v44, %v3410_v44 }
0x1458   :  { %v3425_v58 = vsel %vm240_vm1, %v3417_v35, 0.0 }
0x1459   :  { %v3397_v31 = vpop.xlane.xlu1 %3396  ;;  %3426 = vadd.xlane.f32.xlu1 %v3425_v58  ;;  %v3422_v8 = vsel %vm240_vm1, %v3416_v50, 0.0 }
0x145a   :  { %v3407_v52 = vmul.f32 0.03125, %v3397_v31  ;;  %v3394_v39 = vpop.xlane.xlu0 %3393  ;;  %3423 = vadd.xlane.f32.xlu0 %v3422_v8 }
0x145b   :  { %v3406_v14 = vmul.f32 0.03125, %v3394_v39 }
0x145c   :  { %v3413_v12 = vsub.f32 %v3383_v15, %v3407_v52 }
0x145d   :  { %v3412_v5 = vsub.f32 %v3382_v29, %v3406_v14 }
0x145e   :  { %v3419_v34 = vmul.f32 %v3413_v12, %v3413_v12 }
0x145f   :  { %v3418_v17 = vmul.f32 %v3412_v5, %v3412_v5 }
0x1460   :  { %v3431_v63 = vsel %vm240_vm1, %v3419_v34, 0.0 }
0x1461   :  { %3432 = vadd.xlane.f32.xlu1 %v3431_v63  ;;  %v3403_v20 = vpop.xlane.xlu1 %3402  ;;  %v3428_v32 = vsel %vm240_vm1, %v3418_v17, 0.0 }
0x1462   :  { %v3409_v3 = vmul.f32 0.03125, %v3403_v20  ;;  %3429 = vadd.xlane.f32.xlu0 %v3428_v32  ;;  %v3400_v1 = vpop.xlane.xlu0 %3399 }
0x1463   :  { %v3408_v6 = vmul.f32 0.03125, %v3400_v1 }
0x1464   :  { %v3415_v46 = vsub.f32 %v3385_v41, %v3409_v3 }
0x1465   :  { %v3414_v16 = vsub.f32 %v3384_v43, %v3408_v6 }
0x1466   :  { %v3421_v13 = vmul.f32 %v3415_v46, %v3415_v46 }
0x1467   :  { %v3420_v22 = vmul.f32 %v3414_v16, %v3414_v16 }
0x1468   :  { %v3437_v47 = vsel %vm240_vm1, %v3421_v13, 0.0 }
0x1469   :  { %3438 = vadd.xlane.f32.xlu1 %v3437_v47  ;;  %v3434_v56 = vsel %vm240_vm1, %v3420_v22, 0.0 }
0x146a   :  { %3435 = vadd.xlane.f32.xlu0 %v3434_v56 }
0x14e6   :  { %v3427_v7 = vpop.xlane.xlu1 %3426 }
0x14e7   :  { %v3441_v23 = vmul.f32 0.03125, %v3427_v7  ;;  %v3424_v36 = vpop.xlane.xlu0 %3423 }
0x14e8   :  { %v3440_v54 = vmul.f32 0.03125, %v3424_v36 }
0x14e9   :  { %v3447_v60 = vadd.f32 1e-05, %v3441_v23 }
0x14ea   :  { %v3446_v40 = vadd.f32 1e-05, %v3440_v54 }
0x14eb   :  { %4815 = vrsqrt.f32 %v3447_v60 }
0x14ec   :  { %4817 = vrsqrt.f32 %v3446_v40 }
0x14ee   :  { %v3433_v45 = vpop.xlane.xlu1 %3432 }
0x14ef   :  { %v3443_v27 = vmul.f32 0.03125, %v3433_v45  ;;  %v3430_v61 = vpop.xlane.xlu0 %3429 }
0x14f0   :  { %v3442_v53 = vmul.f32 0.03125, %v3430_v61 }
0x14f1   :  { %v3449_v30 = vadd.f32 1e-05, %v3443_v27 }
0x14f2   :  { %v3448_v0 = vadd.f32 1e-05, %v3442_v53 }
0x14f3   :  { %4819 = vrsqrt.f32 %v3449_v30 }
0x14f4   :  { %4821 = vrsqrt.f32 %v3448_v0 }
0x14f5   :  { %v4816_v48 = vpop.eup %4815 }
0x14f6   :  { %v4818_v24 = vpop.eup %4817  ;;  %v3459_v49 = vmul.f32 %v4816_v48, %v3411_v2  ;;  %v3439_v19 = vpop.xlane.xlu1 %3438 }
0x14f7   :  { %v3458_v62 = vmul.f32 %v4818_v24, %v3410_v44  ;;  %v3445_v28 = vmul.f32 0.03125, %v3439_v19  ;;  %v3436_v26 = vpop.xlane.xlu0 %3435 }
0x14f8   :  { %v3469_v9 = vmul.f32 %v3718_v42, %v3459_v49  ;;  %v3444_v15 = vmul.f32 0.03125, %v3436_v26 }
0x14f9   :  { %v3468_v29 = vmul.f32 %v3718_v42, %v3458_v62  ;;  %v3451_v11 = vadd.f32 1e-05, %v3445_v28 }
0x14fa   :  { %v3479_v18 = vadd.f32 %v3719_v59, %v3469_v9  ;;  %v3450_v33 = vadd.f32 1e-05, %v3444_v15 }
0x14fb   :  { %v3478_v57 = vadd.f32 %v3719_v59, %v3468_v29  ;;  %4823 = vrsqrt.f32 %v3451_v11 }
0x14fc   :  { %3485 = vst.msk [vmem:[%s6228_s5 + $0x8] sm:$0xff] %vm240_vm1, %v3479_v18  ;;  %4825 = vrsqrt.f32 %v3450_v33 }
0x14fd   :  { %v4820_v10 = vpop.eup %4819  ;;  %3484 = vst.msk [vmem:[%s6228_s5] sm:$0xff] %vm240_vm1, %v3478_v57 }
0x14fe   :  { %v4822_v4 = vpop.eup %4821  ;;  %v3461_v41 = vmul.f32 %v4820_v10, %v3413_v12 }
0x14ff   :  { %v3460_v43 = vmul.f32 %v4822_v4, %v3412_v5 }
0x1500   :  { %v3471_v21 = vmul.f32 %v3718_v42, %v3461_v41 }
0x1501   :  { %v3470_v38 = vmul.f32 %v3718_v42, %v3460_v43 }
0x1502   :  { %v3481_v37 = vadd.f32 %v3719_v59, %v3471_v21 }
0x1503   :  { %v3480_v25 = vadd.f32 %v3719_v59, %v3470_v38 }
0x1504   :  { %3487 = vst.msk [vmem:[%s6228_s5 + $0x18] sm:$0xff] %vm240_vm1, %v3481_v37 }
0x1505   :  { %v4824_v51 = vpop.eup %4823  ;;  %3486 = vst.msk [vmem:[%s6228_s5 + $0x10] sm:$0xff] %vm240_vm1, %v3480_v25 }
0x1506   :  { %v4826_v55 = vpop.eup %4825  ;;  %v3463_v2 = vmul.f32 %v4824_v51, %v3415_v46 }
0x1507   :  { %v3462_v44 = vmul.f32 %v4826_v55, %v3414_v16 }
0x1508   :  { %v3473_v35 = vmul.f32 %v3718_v42, %v3463_v2 }
0x1509   :  { %v3472_v50 = vmul.f32 %v3718_v42, %v3462_v44 }
0x150a   :  { %v3483_v58 = vadd.f32 %v3719_v59, %v3473_v35 }
0x150b   :  { %v3482_v31 = vadd.f32 %v3719_v59, %v3472_v50 }
0x150c   :  { %3489 = vst.msk [vmem:[%s6228_s5 + $0x28] sm:$0xff] %vm240_vm1, %v3483_v58 }
0x150d   :  { %3488 = vst.msk [vmem:[%s6228_s5 + $0x20] sm:$0xff] %vm240_vm1, %v3482_v31 }

</bundles_post_ra>
